<compile_context>
chip_gen: v7x
topology: tpu7x:2x2x1
jax: 0.10.0
libtpu: 0.0.40
codegen_flags: <defaults>
</compile_context>

<pallas_src>
import jax
import jax.numpy as jnp
from jax.experimental import pallas as pl
from jax.experimental.pallas import tpu as pltpu

# Problem sizes (small, consistent with the module).
N, CIN, COUT = 2, 4, 2
D = H = W = 8
DHW = D * H * W                       # 512 -> lane axis (4 x 128)
NCIN = N * CIN                        # 8   -> full sublane occupancy
NCOUT = N * COUT                      # 4
PAD = 128                             # flat-axis halo (>= max |tap offset| = 73), lane aligned
EPS = 1e-5

# Offsets into the packed SMEM scalar vector.
B1_OFF = 0                            # folded conv1 bias + BN shift   (COUT,)
W2_OFF = COUT                         # conv2 weights  w2[o, j] at W2_OFF + o*COUT + j
B2_OFF = COUT + COUT * COUT           # conv2 bias                     (COUT,)


def output_block_kernel(x_ref, w1_ref, scal_ref, out_ref, xpad_ref):
    """Single invocation, whole batch.

    x_ref   : (N*CIN, DHW)            voxels on lanes, batch*channel on sublanes
    w1_ref  : (N*CIN, 27*COUT)        conv1 weights (BN scale folded), tiled over
                                      batch; column = tap*COUT + o, tap = kd*9+kh*3+kw
    scal_ref: (2*COUT + COUT*COUT,)   SMEM scalars (folded bias, w2, b2)
    out_ref : (N*COUT, DHW)           softmax probabilities, row = n*COUT + o
    xpad_ref: (N*CIN, 2*PAD + DHW)    VMEM scratch: flat-padded slab (in-kernel halo)
    """
    # ---- Build the flat-padded slab in VMEM (replaces the wrapper-side XLA pad).
    xpad_ref[:, :PAD] = jnp.zeros((NCIN, PAD), jnp.float32)
    xpad_ref[:, PAD + DHW:] = jnp.zeros((NCIN, PAD), jnp.float32)
    xpad_ref[:, PAD:PAD + DHW] = x_ref[...]

    # ---- Boundary masks, computed once at (1, DHW); broadcast over sublanes.
    lane = jax.lax.broadcasted_iota(jnp.int32, (1, DHW), 1)
    wi = lane & (W - 1)                   # W == 8 (power of two)
    hi = (lane >> 3) & (H - 1)
    di = lane >> 6
    cond = {
        "d": {-1: di >= 1, 0: None, 1: di <= D - 2},
        "h": {-1: hi >= 1, 0: None, 1: hi <= H - 2},
        "w": {-1: wi >= 1, 0: None, 1: wi <= W - 2},
    }

    w1v = w1_ref[...]                                          # (N*CIN, 27*COUT)
    acc = [jnp.zeros((NCIN, DHW), jnp.float32) for _ in range(COUT)]

    # ---- 27-tap 3x3x3 conv: statically offset, lane-dense windows of the slab.
    # TODO(synk): if a bundle audit shows these misaligned windows materializing
    #             VMEM copies, switch to pltpu.roll(slab, -off) + an aligned slice.
    tap = 0
    for od in (-1, 0, 1):
        for oh in (-1, 0, 1):
            for ow in (-1, 0, 1):
                off = od * H * W + oh * W + ow
                xs = xpad_ref[:, PAD + off:PAD + off + DHW]    # (N*CIN, DHW)
                mask = None
                for c in (cond["d"][od], cond["h"][oh], cond["w"][ow]):
                    if c is not None:
                        mask = c if mask is None else mask & c
                if mask is not None:
                    xs = jnp.where(mask, xs, 0.0)              # (1,DHW) mask bcast
                for o in range(COUT):
                    col = tap * COUT + o
                    acc[o] = acc[o] + xs * w1v[:, col:col + 1]
                tap += 1

    # ---- Reduce over input channels within each batch, add folded bias, ReLU.
    hid = []
    for o in range(COUT):
        per_n = [jnp.sum(acc[o][n * CIN:(n + 1) * CIN, :], axis=0, keepdims=True)
                 for n in range(N)]                            # N x (1, DHW)
        s = jnp.concatenate(per_n, axis=0)                     # (N, DHW)
        hid.append(jnp.maximum(s + scal_ref[B1_OFF + o], 0.0))

    # ---- conv2 (1x1x1): per-voxel channel mix with scalar weights.
    logits = []
    for o in range(COUT):
        l = hid[0] * scal_ref[W2_OFF + o * COUT]
        for j in range(1, COUT):
            l = l + hid[j] * scal_ref[W2_OFF + o * COUT + j]
        logits.append(l + scal_ref[B2_OFF + o])

    # ---- Channel softmax: channels are separate planes -> purely elementwise.
    m = logits[0]
    for o in range(1, COUT):
        m = jnp.maximum(m, logits[o])
    e = [jnp.exp(l - m) for l in logits]
    denom = e[0]
    for o in range(1, COUT):
        denom = denom + e[o]
    inv = pl.reciprocal(denom, approx=True)                    # EUP slot
    inv = inv * (2.0 - denom * inv)                            # one Newton step -> f32 accuracy

    # ---- Single dense lane-wide store: rows ordered n*COUT + o.
    rows = []
    for n in range(N):
        for o in range(COUT):
            rows.append((e[o] * inv)[n:n + 1, :])              # (1, DHW)
    out_ref[...] = jnp.concatenate(rows, axis=0)               # (N*COUT, DHW)


def output_block_forward(x_ncdhw, params):
    """x_ncdhw: (N, CIN, D, H, W) f32 -> (N, COUT, D, H, W) softmax probs."""
    w1_pt, b1, gamma, beta, rmean, rvar, w2_pt, b2 = params

    # Fold eval-mode BN (and the conv1 bias) into the conv1 weights / bias.
    scale = gamma / jnp.sqrt(rvar + EPS)                       # (COUT,)
    shift = beta - rmean * scale                               # (COUT,)
    w1f = w1_pt * scale[:, None, None, None, None]             # (O, I, 3, 3, 3)
    # (O, I, kd, kh, kw) -> (I, kd, kh, kw, O) -> (I, 27*O): column = tap*COUT + o
    w1v = jnp.transpose(w1f, (1, 2, 3, 4, 0)).reshape(CIN, 27 * COUT)
    w1t = jnp.tile(w1v, (N, 1)).astype(jnp.float32)            # (N*CIN, 27*COUT)
    b1f = b1 * scale + shift                                   # (COUT,)
    w2 = w2_pt.reshape(COUT, COUT)                             # [o_out, i_in]
    scal = jnp.concatenate([b1f, w2.reshape(-1), b2]).astype(jnp.float32)

    # Wrapper glue: contiguous reshape only (no transpose, no halo pad).
    x_flat = x_ncdhw.reshape(NCIN, DHW)

    out = pl.pallas_call(
        output_block_kernel,
        out_shape=jax.ShapeDtypeStruct((NCOUT, DHW), jnp.float32),
        in_specs=[
            pl.BlockSpec(memory_space=pltpu.MemorySpace.VMEM),   # x     (8, 512)
            pl.BlockSpec(memory_space=pltpu.MemorySpace.VMEM),   # w1    (8, 54)
            pl.BlockSpec(memory_space=pltpu.MemorySpace.SMEM),   # scalars (8,)
        ],
        out_specs=pl.BlockSpec(memory_space=pltpu.MemorySpace.VMEM),
        scratch_shapes=[pltpu.VMEM((NCIN, DHW + 2 * PAD), jnp.float32)],
    )(x_flat, w1t, scal)

    return out.reshape(N, COUT, D, H, W)                       # already NCDHW order


def reference_forward(x, params):
    """Pure-JAX reference mirroring the PyTorch module (eval-mode BN)."""
    w1_pt, b1, gamma, beta, rmean, rvar, w2_pt, b2 = params
    dn = ('NCDHW', 'OIDHW', 'NCDHW')
    y = jax.lax.conv_general_dilated(
        x, w1_pt, (1, 1, 1), ((1, 1), (1, 1), (1, 1)),
        dimension_numbers=dn, precision=jax.lax.Precision.HIGHEST)
    y = y + b1.reshape(1, COUT, 1, 1, 1)
    y = ((y - rmean.reshape(1, COUT, 1, 1, 1))
         / jnp.sqrt(rvar.reshape(1, COUT, 1, 1, 1) + EPS)
         * gamma.reshape(1, COUT, 1, 1, 1) + beta.reshape(1, COUT, 1, 1, 1))
    y = jnp.maximum(y, 0.0)
    y = jax.lax.conv_general_dilated(
        y, w2_pt, (1, 1, 1), ((0, 0), (0, 0), (0, 0)),
        dimension_numbers=dn, precision=jax.lax.Precision.HIGHEST)
    y = y + b2.reshape(1, COUT, 1, 1, 1)
    return jax.nn.softmax(y, axis=1)


if __name__ == "__main__":
    key = jax.random.PRNGKey(0)
    keys = jax.random.split(key, 9)

    x = jax.random.normal(keys[0], (N, CIN, D, H, W), jnp.float32)

    # Deterministic synthetic parameters (PyTorch-convention shapes).
    w1_pt = 0.2 * jax.random.normal(keys[1], (COUT, CIN, 3, 3, 3), jnp.float32)
    b1 = 0.1 * jax.random.normal(keys[2], (COUT,), jnp.float32)
    gamma = 1.0 + 0.1 * jax.random.normal(keys[3], (COUT,), jnp.float32)
    beta = 0.1 * jax.random.normal(keys[4], (COUT,), jnp.float32)
    rmean = 0.1 * jax.random.normal(keys[5], (COUT,), jnp.float32)
    rvar = jax.random.uniform(keys[6], (COUT,), jnp.float32, 0.5, 1.5)
    w2_pt = 0.3 * jax.random.normal(keys[7], (COUT, COUT, 1, 1, 1), jnp.float32)
    b2 = 0.1 * jax.random.normal(keys[8], (COUT,), jnp.float32)

    params = (w1_pt, b1, gamma, beta, rmean, rvar, w2_pt, b2)

    out = output_block_forward(x, params)
    out = jax.block_until_ready(out)

    ref = jax.block_until_ready(reference_forward(x, params))
    assert out.shape == (N, COUT, D, H, W)
    assert bool(jnp.allclose(out, ref, atol=1e-3, rtol=1e-3)), "mismatch vs reference"
    # probabilities along channel dim sum to 1
    assert bool(jnp.allclose(jnp.sum(out, axis=1), 1.0, atol=1e-4))

    print("KERNEL_OK")
</pallas_src>

<mosaic_0001>
module attributes {stable_mosaic.version = 11 : i64} {
  func.func @output_block_kernel(%arg0: memref<8x512xf32, #tpu.memory_space<vmem>>, %arg1: memref<8x54xf32, #tpu.memory_space<vmem>>, %arg2: memref<8xf32, #tpu.memory_space<smem>>, %arg3: memref<4x512xf32, #tpu.memory_space<vmem>>, %arg4: memref<8x768xf32, #tpu.memory_space<vmem>>) attributes {dimension_semantics = [], scalar_prefetch = 0 : i64, scratch_operands = 1 : i64, tpu.core_type = #tpu.core_type<tc>} {
    %cst = arith.constant 0.000000e+00 : f32
    %0 = vector.broadcast %cst : f32 to vector<8x128xf32>
    %c0 = arith.constant 0 : index
    %c0_0 = arith.constant 0 : index
    %1 = vector.load %arg4[%c0, %c0_0] : memref<8x768xf32, #tpu.memory_space<vmem>>, vector<8x128xf32>
    tpu.vector_store %arg4[%c0, %c0_0], %0 {strides = array<i32>} : memref<8x768xf32, #tpu.memory_space<vmem>>, vector<8x128xf32>,
    %cst_1 = arith.constant 0.000000e+00 : f32
    %2 = vector.broadcast %cst_1 : f32 to vector<8x128xf32>
    %c0_2 = arith.constant 0 : index
    %c640 = arith.constant 640 : index
    %3 = vector.load %arg4[%c0_2, %c640] : memref<8x768xf32, #tpu.memory_space<vmem>>, vector<8x128xf32>
    tpu.vector_store %arg4[%c0_2, %c640], %2 {strides = array<i32>} : memref<8x768xf32, #tpu.memory_space<vmem>>, vector<8x128xf32>,
    %c0_3 = arith.constant 0 : index
    %c0_4 = arith.constant 0 : index
    %4 = vector.load %arg0[%c0_3, %c0_4] : memref<8x512xf32, #tpu.memory_space<vmem>>, vector<8x512xf32>
    %c0_5 = arith.constant 0 : index
    %c128 = arith.constant 128 : index
    %5 = vector.load %arg4[%c0_5, %c128] : memref<8x768xf32, #tpu.memory_space<vmem>>, vector<8x512xf32>
    tpu.vector_store %arg4[%c0_5, %c128], %4 {strides = array<i32>} : memref<8x768xf32, #tpu.memory_space<vmem>>, vector<8x512xf32>,
    %6 = tpu.iota {dimensions = array<i32: 1>} : vector<1x512xi32>
    %c7_i32 = arith.constant 7 : i32
    %7 = vector.broadcast %c7_i32 : i32 to vector<1x512xi32>
    %8 = arith.andi %6, %7 : vector<1x512xi32>
    %c3_i32 = arith.constant 3 : i32
    %9 = vector.broadcast %c3_i32 : i32 to vector<1x512xi32>
    %10 = arith.shrsi %6, %9 : vector<1x512xi32>
    %c7_i32_6 = arith.constant 7 : i32
    %11 = vector.broadcast %c7_i32_6 : i32 to vector<1x512xi32>
    %12 = arith.andi %10, %11 : vector<1x512xi32>
    %c6_i32 = arith.constant 6 : i32
    %13 = vector.broadcast %c6_i32 : i32 to vector<1x512xi32>
    %14 = arith.shrsi %6, %13 : vector<1x512xi32>
    %c1_i32 = arith.constant 1 : i32
    %15 = vector.broadcast %c1_i32 : i32 to vector<1x512xi32>
    %16 = arith.cmpi sge, %14, %15 : vector<1x512xi32>
    %c6_i32_7 = arith.constant 6 : i32
    %17 = vector.broadcast %c6_i32_7 : i32 to vector<1x512xi32>
    %18 = arith.cmpi sle, %14, %17 : vector<1x512xi32>
    %c1_i32_8 = arith.constant 1 : i32
    %19 = vector.broadcast %c1_i32_8 : i32 to vector<1x512xi32>
    %20 = arith.cmpi sge, %12, %19 : vector<1x512xi32>
    %c6_i32_9 = arith.constant 6 : i32
    %21 = vector.broadcast %c6_i32_9 : i32 to vector<1x512xi32>
    %22 = arith.cmpi sle, %12, %21 : vector<1x512xi32>
    %c1_i32_10 = arith.constant 1 : i32
    %23 = vector.broadcast %c1_i32_10 : i32 to vector<1x512xi32>
    %24 = arith.cmpi sge, %8, %23 : vector<1x512xi32>
    %c6_i32_11 = arith.constant 6 : i32
    %25 = vector.broadcast %c6_i32_11 : i32 to vector<1x512xi32>
    %26 = arith.cmpi sle, %8, %25 : vector<1x512xi32>
    %c0_12 = arith.constant 0 : index
    %c0_13 = arith.constant 0 : index
    %27 = vector.load %arg1[%c0_12, %c0_13] : memref<8x54xf32, #tpu.memory_space<vmem>>, vector<8x54xf32>
    %cst_14 = arith.constant 0.000000e+00 : f32
    %28 = vector.broadcast %cst_14 : f32 to vector<8x512xf32>
    %cst_15 = arith.constant 0.000000e+00 : f32
    %29 = vector.broadcast %cst_15 : f32 to vector<8x512xf32>
    %c0_16 = arith.constant 0 : index
    %c55 = arith.constant 55 : index
    %30 = vector.load %arg4[%c0_16, %c55] : memref<8x768xf32, #tpu.memory_space<vmem>>, vector<8x512xf32>
    %31 = arith.andi %16, %20 : vector<1x512xi1>
    %32 = arith.andi %31, %24 : vector<1x512xi1>
    %cst_17 = arith.constant 0.000000e+00 : f32
    %33 = vector.shape_cast %32 : vector<1x512xi1> to vector<1x512xi1>
    %34 = vector.broadcast %33 : vector<1x512xi1> to vector<8x512xi1>
    %35 = vector.broadcast %cst_17 : f32 to vector<8x512xf32>
    %36 = arith.select %34, %30, %35 : vector<8x512xi1>, vector<8x512xf32>
    %37 = vector.extract_strided_slice %27 {offsets = [0, 0], sizes = [8, 1], strides = [1, 1]} : vector<8x54xf32> to vector<8x1xf32>
    %38 = vector.broadcast %37 : vector<8x1xf32> to vector<8x512xf32>
    %39 = arith.mulf %36, %38 : vector<8x512xf32>
    %40 = arith.addf %28, %39 : vector<8x512xf32>
    %41 = vector.extract_strided_slice %27 {offsets = [0, 1], sizes = [8, 1], strides = [1, 1]} : vector<8x54xf32> to vector<8x1xf32>
    %42 = vector.broadcast %41 : vector<8x1xf32> to vector<8x512xf32>
    %43 = arith.mulf %36, %42 : vector<8x512xf32>
    %44 = arith.addf %29, %43 : vector<8x512xf32>
    %c0_18 = arith.constant 0 : index
    %c56 = arith.constant 56 : index
    %45 = vector.load %arg4[%c0_18, %c56] : memref<8x768xf32, #tpu.memory_space<vmem>>, vector<8x512xf32>
    %46 = arith.andi %16, %20 : vector<1x512xi1>
    %cst_19 = arith.constant 0.000000e+00 : f32
    %47 = vector.shape_cast %46 : vector<1x512xi1> to vector<1x512xi1>
    %48 = vector.broadcast %47 : vector<1x512xi1> to vector<8x512xi1>
    %49 = vector.broadcast %cst_19 : f32 to vector<8x512xf32>
    %50 = arith.select %48, %45, %49 : vector<8x512xi1>, vector<8x512xf32>
    %51 = vector.extract_strided_slice %27 {offsets = [0, 2], sizes = [8, 1], strides = [1, 1]} : vector<8x54xf32> to vector<8x1xf32>
    %52 = vector.broadcast %51 : vector<8x1xf32> to vector<8x512xf32>
    %53 = arith.mulf %50, %52 : vector<8x512xf32>
    %54 = arith.addf %40, %53 : vector<8x512xf32>
    %55 = vector.extract_strided_slice %27 {offsets = [0, 3], sizes = [8, 1], strides = [1, 1]} : vector<8x54xf32> to vector<8x1xf32>
    %56 = vector.broadcast %55 : vector<8x1xf32> to vector<8x512xf32>
    %57 = arith.mulf %50, %56 : vector<8x512xf32>
    %58 = arith.addf %44, %57 : vector<8x512xf32>
    %c0_20 = arith.constant 0 : index
    %c57 = arith.constant 57 : index
    %59 = vector.load %arg4[%c0_20, %c57] : memref<8x768xf32, #tpu.memory_space<vmem>>, vector<8x512xf32>
    %60 = arith.andi %16, %20 : vector<1x512xi1>
    %61 = arith.andi %60, %26 : vector<1x512xi1>
    %cst_21 = arith.constant 0.000000e+00 : f32
    %62 = vector.shape_cast %61 : vector<1x512xi1> to vector<1x512xi1>
    %63 = vector.broadcast %62 : vector<1x512xi1> to vector<8x512xi1>
    %64 = vector.broadcast %cst_21 : f32 to vector<8x512xf32>
    %65 = arith.select %63, %59, %64 : vector<8x512xi1>, vector<8x512xf32>
    %66 = vector.extract_strided_slice %27 {offsets = [0, 4], sizes = [8, 1], strides = [1, 1]} : vector<8x54xf32> to vector<8x1xf32>
    %67 = vector.broadcast %66 : vector<8x1xf32> to vector<8x512xf32>
    %68 = arith.mulf %65, %67 : vector<8x512xf32>
    %69 = arith.addf %54, %68 : vector<8x512xf32>
    %70 = vector.extract_strided_slice %27 {offsets = [0, 5], sizes = [8, 1], strides = [1, 1]} : vector<8x54xf32> to vector<8x1xf32>
    %71 = vector.broadcast %70 : vector<8x1xf32> to vector<8x512xf32>
    %72 = arith.mulf %65, %71 : vector<8x512xf32>
    %73 = arith.addf %58, %72 : vector<8x512xf32>
    %c0_22 = arith.constant 0 : index
    %c63 = arith.constant 63 : index
    %74 = vector.load %arg4[%c0_22, %c63] : memref<8x768xf32, #tpu.memory_space<vmem>>, vector<8x512xf32>
    %75 = arith.andi %16, %24 : vector<1x512xi1>
    %cst_23 = arith.constant 0.000000e+00 : f32
    %76 = vector.shape_cast %75 : vector<1x512xi1> to vector<1x512xi1>
    %77 = vector.broadcast %76 : vector<1x512xi1> to vector<8x512xi1>
    %78 = vector.broadcast %cst_23 : f32 to vector<8x512xf32>
    %79 = arith.select %77, %74, %78 : vector<8x512xi1>, vector<8x512xf32>
    %80 = vector.extract_strided_slice %27 {offsets = [0, 6], sizes = [8, 1], strides = [1, 1]} : vector<8x54xf32> to vector<8x1xf32>
    %81 = vector.broadcast %80 : vector<8x1xf32> to vector<8x512xf32>
    %82 = arith.mulf %79, %81 : vector<8x512xf32>
    %83 = arith.addf %69, %82 : vector<8x512xf32>
    %84 = vector.extract_strided_slice %27 {offsets = [0, 7], sizes = [8, 1], strides = [1, 1]} : vector<8x54xf32> to vector<8x1xf32>
    %85 = vector.broadcast %84 : vector<8x1xf32> to vector<8x512xf32>
    %86 = arith.mulf %79, %85 : vector<8x512xf32>
    %87 = arith.addf %73, %86 : vector<8x512xf32>
    %c0_24 = arith.constant 0 : index
    %c64 = arith.constant 64 : index
    %88 = vector.load %arg4[%c0_24, %c64] : memref<8x768xf32, #tpu.memory_space<vmem>>, vector<8x512xf32>
    %cst_25 = arith.constant 0.000000e+00 : f32
    %89 = vector.shape_cast %16 : vector<1x512xi1> to vector<1x512xi1>
    %90 = vector.broadcast %89 : vector<1x512xi1> to vector<8x512xi1>
    %91 = vector.broadcast %cst_25 : f32 to vector<8x512xf32>
    %92 = arith.select %90, %88, %91 : vector<8x512xi1>, vector<8x512xf32>
    %93 = vector.extract_strided_slice %27 {offsets = [0, 8], sizes = [8, 1], strides = [1, 1]} : vector<8x54xf32> to vector<8x1xf32>
    %94 = vector.broadcast %93 : vector<8x1xf32> to vector<8x512xf32>
    %95 = arith.mulf %92, %94 : vector<8x512xf32>
    %96 = arith.addf %83, %95 : vector<8x512xf32>
    %97 = vector.extract_strided_slice %27 {offsets = [0, 9], sizes = [8, 1], strides = [1, 1]} : vector<8x54xf32> to vector<8x1xf32>
    %98 = vector.broadcast %97 : vector<8x1xf32> to vector<8x512xf32>
    %99 = arith.mulf %92, %98 : vector<8x512xf32>
    %100 = arith.addf %87, %99 : vector<8x512xf32>
    %c0_26 = arith.constant 0 : index
    %c65 = arith.constant 65 : index
    %101 = vector.load %arg4[%c0_26, %c65] : memref<8x768xf32, #tpu.memory_space<vmem>>, vector<8x512xf32>
    %102 = arith.andi %16, %26 : vector<1x512xi1>
    %cst_27 = arith.constant 0.000000e+00 : f32
    %103 = vector.shape_cast %102 : vector<1x512xi1> to vector<1x512xi1>
    %104 = vector.broadcast %103 : vector<1x512xi1> to vector<8x512xi1>
    %105 = vector.broadcast %cst_27 : f32 to vector<8x512xf32>
    %106 = arith.select %104, %101, %105 : vector<8x512xi1>, vector<8x512xf32>
    %107 = vector.extract_strided_slice %27 {offsets = [0, 10], sizes = [8, 1], strides = [1, 1]} : vector<8x54xf32> to vector<8x1xf32>
    %108 = vector.broadcast %107 : vector<8x1xf32> to vector<8x512xf32>
    %109 = arith.mulf %106, %108 : vector<8x512xf32>
    %110 = arith.addf %96, %109 : vector<8x512xf32>
    %111 = vector.extract_strided_slice %27 {offsets = [0, 11], sizes = [8, 1], strides = [1, 1]} : vector<8x54xf32> to vector<8x1xf32>
    %112 = vector.broadcast %111 : vector<8x1xf32> to vector<8x512xf32>
    %113 = arith.mulf %106, %112 : vector<8x512xf32>
    %114 = arith.addf %100, %113 : vector<8x512xf32>
    %c0_28 = arith.constant 0 : index
    %c71 = arith.constant 71 : index
    %115 = vector.load %arg4[%c0_28, %c71] : memref<8x768xf32, #tpu.memory_space<vmem>>, vector<8x512xf32>
    %116 = arith.andi %16, %22 : vector<1x512xi1>
    %117 = arith.andi %116, %24 : vector<1x512xi1>
    %cst_29 = arith.constant 0.000000e+00 : f32
    %118 = vector.shape_cast %117 : vector<1x512xi1> to vector<1x512xi1>
    %119 = vector.broadcast %118 : vector<1x512xi1> to vector<8x512xi1>
    %120 = vector.broadcast %cst_29 : f32 to vector<8x512xf32>
    %121 = arith.select %119, %115, %120 : vector<8x512xi1>, vector<8x512xf32>
    %122 = vector.extract_strided_slice %27 {offsets = [0, 12], sizes = [8, 1], strides = [1, 1]} : vector<8x54xf32> to vector<8x1xf32>
    %123 = vector.broadcast %122 : vector<8x1xf32> to vector<8x512xf32>
    %124 = arith.mulf %121, %123 : vector<8x512xf32>
    %125 = arith.addf %110, %124 : vector<8x512xf32>
    %126 = vector.extract_strided_slice %27 {offsets = [0, 13], sizes = [8, 1], strides = [1, 1]} : vector<8x54xf32> to vector<8x1xf32>
    %127 = vector.broadcast %126 : vector<8x1xf32> to vector<8x512xf32>
    %128 = arith.mulf %121, %127 : vector<8x512xf32>
    %129 = arith.addf %114, %128 : vector<8x512xf32>
    %c0_30 = arith.constant 0 : index
    %c72 = arith.constant 72 : index
    %130 = vector.load %arg4[%c0_30, %c72] : memref<8x768xf32, #tpu.memory_space<vmem>>, vector<8x512xf32>
    %131 = arith.andi %16, %22 : vector<1x512xi1>
    %cst_31 = arith.constant 0.000000e+00 : f32
    %132 = vector.shape_cast %131 : vector<1x512xi1> to vector<1x512xi1>
    %133 = vector.broadcast %132 : vector<1x512xi1> to vector<8x512xi1>
    %134 = vector.broadcast %cst_31 : f32 to vector<8x512xf32>
    %135 = arith.select %133, %130, %134 : vector<8x512xi1>, vector<8x512xf32>
    %136 = vector.extract_strided_slice %27 {offsets = [0, 14], sizes = [8, 1], strides = [1, 1]} : vector<8x54xf32> to vector<8x1xf32>
    %137 = vector.broadcast %136 : vector<8x1xf32> to vector<8x512xf32>
    %138 = arith.mulf %135, %137 : vector<8x512xf32>
    %139 = arith.addf %125, %138 : vector<8x512xf32>
    %140 = vector.extract_strided_slice %27 {offsets = [0, 15], sizes = [8, 1], strides = [1, 1]} : vector<8x54xf32> to vector<8x1xf32>
    %141 = vector.broadcast %140 : vector<8x1xf32> to vector<8x512xf32>
    %142 = arith.mulf %135, %141 : vector<8x512xf32>
    %143 = arith.addf %129, %142 : vector<8x512xf32>
    %c0_32 = arith.constant 0 : index
    %c73 = arith.constant 73 : index
    %144 = vector.load %arg4[%c0_32, %c73] : memref<8x768xf32, #tpu.memory_space<vmem>>, vector<8x512xf32>
    %145 = arith.andi %16, %22 : vector<1x512xi1>
    %146 = arith.andi %145, %26 : vector<1x512xi1>
    %cst_33 = arith.constant 0.000000e+00 : f32
    %147 = vector.shape_cast %146 : vector<1x512xi1> to vector<1x512xi1>
    %148 = vector.broadcast %147 : vector<1x512xi1> to vector<8x512xi1>
    %149 = vector.broadcast %cst_33 : f32 to vector<8x512xf32>
    %150 = arith.select %148, %144, %149 : vector<8x512xi1>, vector<8x512xf32>
    %151 = vector.extract_strided_slice %27 {offsets = [0, 16], sizes = [8, 1], strides = [1, 1]} : vector<8x54xf32> to vector<8x1xf32>
    %152 = vector.broadcast %151 : vector<8x1xf32> to vector<8x512xf32>
    %153 = arith.mulf %150, %152 : vector<8x512xf32>
    %154 = arith.addf %139, %153 : vector<8x512xf32>
    %155 = vector.extract_strided_slice %27 {offsets = [0, 17], sizes = [8, 1], strides = [1, 1]} : vector<8x54xf32> to vector<8x1xf32>
    %156 = vector.broadcast %155 : vector<8x1xf32> to vector<8x512xf32>
    %157 = arith.mulf %150, %156 : vector<8x512xf32>
    %158 = arith.addf %143, %157 : vector<8x512xf32>
    %c0_34 = arith.constant 0 : index
    %c119 = arith.constant 119 : index
    %159 = vector.load %arg4[%c0_34, %c119] : memref<8x768xf32, #tpu.memory_space<vmem>>, vector<8x512xf32>
    %160 = arith.andi %20, %24 : vector<1x512xi1>
    %cst_35 = arith.constant 0.000000e+00 : f32
    %161 = vector.shape_cast %160 : vector<1x512xi1> to vector<1x512xi1>
    %162 = vector.broadcast %161 : vector<1x512xi1> to vector<8x512xi1>
    %163 = vector.broadcast %cst_35 : f32 to vector<8x512xf32>
    %164 = arith.select %162, %159, %163 : vector<8x512xi1>, vector<8x512xf32>
    %165 = vector.extract_strided_slice %27 {offsets = [0, 18], sizes = [8, 1], strides = [1, 1]} : vector<8x54xf32> to vector<8x1xf32>
    %166 = vector.broadcast %165 : vector<8x1xf32> to vector<8x512xf32>
    %167 = arith.mulf %164, %166 : vector<8x512xf32>
    %168 = arith.addf %154, %167 : vector<8x512xf32>
    %169 = vector.extract_strided_slice %27 {offsets = [0, 19], sizes = [8, 1], strides = [1, 1]} : vector<8x54xf32> to vector<8x1xf32>
    %170 = vector.broadcast %169 : vector<8x1xf32> to vector<8x512xf32>
    %171 = arith.mulf %164, %170 : vector<8x512xf32>
    %172 = arith.addf %158, %171 : vector<8x512xf32>
    %c0_36 = arith.constant 0 : index
    %c120 = arith.constant 120 : index
    %173 = vector.load %arg4[%c0_36, %c120] : memref<8x768xf32, #tpu.memory_space<vmem>>, vector<8x512xf32>
    %cst_37 = arith.constant 0.000000e+00 : f32
    %174 = vector.shape_cast %20 : vector<1x512xi1> to vector<1x512xi1>
    %175 = vector.broadcast %174 : vector<1x512xi1> to vector<8x512xi1>
    %176 = vector.broadcast %cst_37 : f32 to vector<8x512xf32>
    %177 = arith.select %175, %173, %176 : vector<8x512xi1>, vector<8x512xf32>
    %178 = vector.extract_strided_slice %27 {offsets = [0, 20], sizes = [8, 1], strides = [1, 1]} : vector<8x54xf32> to vector<8x1xf32>
    %179 = vector.broadcast %178 : vector<8x1xf32> to vector<8x512xf32>
    %180 = arith.mulf %177, %179 : vector<8x512xf32>
    %181 = arith.addf %168, %180 : vector<8x512xf32>
    %182 = vector.extract_strided_slice %27 {offsets = [0, 21], sizes = [8, 1], strides = [1, 1]} : vector<8x54xf32> to vector<8x1xf32>
    %183 = vector.broadcast %182 : vector<8x1xf32> to vector<8x512xf32>
    %184 = arith.mulf %177, %183 : vector<8x512xf32>
    %185 = arith.addf %172, %184 : vector<8x512xf32>
    %c0_38 = arith.constant 0 : index
    %c121 = arith.constant 121 : index
    %186 = vector.load %arg4[%c0_38, %c121] : memref<8x768xf32, #tpu.memory_space<vmem>>, vector<8x512xf32>
    %187 = arith.andi %20, %26 : vector<1x512xi1>
    %cst_39 = arith.constant 0.000000e+00 : f32
    %188 = vector.shape_cast %187 : vector<1x512xi1> to vector<1x512xi1>
    %189 = vector.broadcast %188 : vector<1x512xi1> to vector<8x512xi1>
    %190 = vector.broadcast %cst_39 : f32 to vector<8x512xf32>
    %191 = arith.select %189, %186, %190 : vector<8x512xi1>, vector<8x512xf32>
    %192 = vector.extract_strided_slice %27 {offsets = [0, 22], sizes = [8, 1], strides = [1, 1]} : vector<8x54xf32> to vector<8x1xf32>
    %193 = vector.broadcast %192 : vector<8x1xf32> to vector<8x512xf32>
    %194 = arith.mulf %191, %193 : vector<8x512xf32>
    %195 = arith.addf %181, %194 : vector<8x512xf32>
    %196 = vector.extract_strided_slice %27 {offsets = [0, 23], sizes = [8, 1], strides = [1, 1]} : vector<8x54xf32> to vector<8x1xf32>
    %197 = vector.broadcast %196 : vector<8x1xf32> to vector<8x512xf32>
    %198 = arith.mulf %191, %197 : vector<8x512xf32>
    %199 = arith.addf %185, %198 : vector<8x512xf32>
    %c0_40 = arith.constant 0 : index
    %c127 = arith.constant 127 : index
    %200 = vector.load %arg4[%c0_40, %c127] : memref<8x768xf32, #tpu.memory_space<vmem>>, vector<8x512xf32>
    %cst_41 = arith.constant 0.000000e+00 : f32
    %201 = vector.shape_cast %24 : vector<1x512xi1> to vector<1x512xi1>
    %202 = vector.broadcast %201 : vector<1x512xi1> to vector<8x512xi1>
    %203 = vector.broadcast %cst_41 : f32 to vector<8x512xf32>
    %204 = arith.select %202, %200, %203 : vector<8x512xi1>, vector<8x512xf32>
    %205 = vector.extract_strided_slice %27 {offsets = [0, 24], sizes = [8, 1], strides = [1, 1]} : vector<8x54xf32> to vector<8x1xf32>
    %206 = vector.broadcast %205 : vector<8x1xf32> to vector<8x512xf32>
    %207 = arith.mulf %204, %206 : vector<8x512xf32>
    %208 = arith.addf %195, %207 : vector<8x512xf32>
    %209 = vector.extract_strided_slice %27 {offsets = [0, 25], sizes = [8, 1], strides = [1, 1]} : vector<8x54xf32> to vector<8x1xf32>
    %210 = vector.broadcast %209 : vector<8x1xf32> to vector<8x512xf32>
    %211 = arith.mulf %204, %210 : vector<8x512xf32>
    %212 = arith.addf %199, %211 : vector<8x512xf32>
    %c0_42 = arith.constant 0 : index
    %c128_43 = arith.constant 128 : index
    %213 = vector.load %arg4[%c0_42, %c128_43] : memref<8x768xf32, #tpu.memory_space<vmem>>, vector<8x512xf32>
    %214 = vector.extract_strided_slice %27 {offsets = [0, 26], sizes = [8, 1], strides = [1, 1]} : vector<8x54xf32> to vector<8x1xf32>
    %215 = vector.broadcast %214 : vector<8x1xf32> to vector<8x512xf32>
    %216 = arith.mulf %213, %215 : vector<8x512xf32>
    %217 = arith.addf %208, %216 : vector<8x512xf32>
    %218 = vector.extract_strided_slice %27 {offsets = [0, 27], sizes = [8, 1], strides = [1, 1]} : vector<8x54xf32> to vector<8x1xf32>
    %219 = vector.broadcast %218 : vector<8x1xf32> to vector<8x512xf32>
    %220 = arith.mulf %213, %219 : vector<8x512xf32>
    %221 = arith.addf %212, %220 : vector<8x512xf32>
    %c0_44 = arith.constant 0 : index
    %c129 = arith.constant 129 : index
    %222 = vector.load %arg4[%c0_44, %c129] : memref<8x768xf32, #tpu.memory_space<vmem>>, vector<8x512xf32>
    %cst_45 = arith.constant 0.000000e+00 : f32
    %223 = vector.shape_cast %26 : vector<1x512xi1> to vector<1x512xi1>
    %224 = vector.broadcast %223 : vector<1x512xi1> to vector<8x512xi1>
    %225 = vector.broadcast %cst_45 : f32 to vector<8x512xf32>
    %226 = arith.select %224, %222, %225 : vector<8x512xi1>, vector<8x512xf32>
    %227 = vector.extract_strided_slice %27 {offsets = [0, 28], sizes = [8, 1], strides = [1, 1]} : vector<8x54xf32> to vector<8x1xf32>
    %228 = vector.broadcast %227 : vector<8x1xf32> to vector<8x512xf32>
    %229 = arith.mulf %226, %228 : vector<8x512xf32>
    %230 = arith.addf %217, %229 : vector<8x512xf32>
    %231 = vector.extract_strided_slice %27 {offsets = [0, 29], sizes = [8, 1], strides = [1, 1]} : vector<8x54xf32> to vector<8x1xf32>
    %232 = vector.broadcast %231 : vector<8x1xf32> to vector<8x512xf32>
    %233 = arith.mulf %226, %232 : vector<8x512xf32>
    %234 = arith.addf %221, %233 : vector<8x512xf32>
    %c0_46 = arith.constant 0 : index
    %c135 = arith.constant 135 : index
    %235 = vector.load %arg4[%c0_46, %c135] : memref<8x768xf32, #tpu.memory_space<vmem>>, vector<8x512xf32>
    %236 = arith.andi %22, %24 : vector<1x512xi1>
    %cst_47 = arith.constant 0.000000e+00 : f32
    %237 = vector.shape_cast %236 : vector<1x512xi1> to vector<1x512xi1>
    %238 = vector.broadcast %237 : vector<1x512xi1> to vector<8x512xi1>
    %239 = vector.broadcast %cst_47 : f32 to vector<8x512xf32>
    %240 = arith.select %238, %235, %239 : vector<8x512xi1>, vector<8x512xf32>
    %241 = vector.extract_strided_slice %27 {offsets = [0, 30], sizes = [8, 1], strides = [1, 1]} : vector<8x54xf32> to vector<8x1xf32>
    %242 = vector.broadcast %241 : vector<8x1xf32> to vector<8x512xf32>
    %243 = arith.mulf %240, %242 : vector<8x512xf32>
    %244 = arith.addf %230, %243 : vector<8x512xf32>
    %245 = vector.extract_strided_slice %27 {offsets = [0, 31], sizes = [8, 1], strides = [1, 1]} : vector<8x54xf32> to vector<8x1xf32>
    %246 = vector.broadcast %245 : vector<8x1xf32> to vector<8x512xf32>
    %247 = arith.mulf %240, %246 : vector<8x512xf32>
    %248 = arith.addf %234, %247 : vector<8x512xf32>
    %c0_48 = arith.constant 0 : index
    %c136 = arith.constant 136 : index
    %249 = vector.load %arg4[%c0_48, %c136] : memref<8x768xf32, #tpu.memory_space<vmem>>, vector<8x512xf32>
    %cst_49 = arith.constant 0.000000e+00 : f32
    %250 = vector.shape_cast %22 : vector<1x512xi1> to vector<1x512xi1>
    %251 = vector.broadcast %250 : vector<1x512xi1> to vector<8x512xi1>
    %252 = vector.broadcast %cst_49 : f32 to vector<8x512xf32>
    %253 = arith.select %251, %249, %252 : vector<8x512xi1>, vector<8x512xf32>
    %254 = vector.extract_strided_slice %27 {offsets = [0, 32], sizes = [8, 1], strides = [1, 1]} : vector<8x54xf32> to vector<8x1xf32>
    %255 = vector.broadcast %254 : vector<8x1xf32> to vector<8x512xf32>
    %256 = arith.mulf %253, %255 : vector<8x512xf32>
    %257 = arith.addf %244, %256 : vector<8x512xf32>
    %258 = vector.extract_strided_slice %27 {offsets = [0, 33], sizes = [8, 1], strides = [1, 1]} : vector<8x54xf32> to vector<8x1xf32>
    %259 = vector.broadcast %258 : vector<8x1xf32> to vector<8x512xf32>
    %260 = arith.mulf %253, %259 : vector<8x512xf32>
    %261 = arith.addf %248, %260 : vector<8x512xf32>
    %c0_50 = arith.constant 0 : index
    %c137 = arith.constant 137 : index
    %262 = vector.load %arg4[%c0_50, %c137] : memref<8x768xf32, #tpu.memory_space<vmem>>, vector<8x512xf32>
    %263 = arith.andi %22, %26 : vector<1x512xi1>
    %cst_51 = arith.constant 0.000000e+00 : f32
    %264 = vector.shape_cast %263 : vector<1x512xi1> to vector<1x512xi1>
    %265 = vector.broadcast %264 : vector<1x512xi1> to vector<8x512xi1>
    %266 = vector.broadcast %cst_51 : f32 to vector<8x512xf32>
    %267 = arith.select %265, %262, %266 : vector<8x512xi1>, vector<8x512xf32>
    %268 = vector.extract_strided_slice %27 {offsets = [0, 34], sizes = [8, 1], strides = [1, 1]} : vector<8x54xf32> to vector<8x1xf32>
    %269 = vector.broadcast %268 : vector<8x1xf32> to vector<8x512xf32>
    %270 = arith.mulf %267, %269 : vector<8x512xf32>
    %271 = arith.addf %257, %270 : vector<8x512xf32>
    %272 = vector.extract_strided_slice %27 {offsets = [0, 35], sizes = [8, 1], strides = [1, 1]} : vector<8x54xf32> to vector<8x1xf32>
    %273 = vector.broadcast %272 : vector<8x1xf32> to vector<8x512xf32>
    %274 = arith.mulf %267, %273 : vector<8x512xf32>
    %275 = arith.addf %261, %274 : vector<8x512xf32>
    %c0_52 = arith.constant 0 : index
    %c183 = arith.constant 183 : index
    %276 = vector.load %arg4[%c0_52, %c183] : memref<8x768xf32, #tpu.memory_space<vmem>>, vector<8x512xf32>
    %277 = arith.andi %18, %20 : vector<1x512xi1>
    %278 = arith.andi %277, %24 : vector<1x512xi1>
    %cst_53 = arith.constant 0.000000e+00 : f32
    %279 = vector.shape_cast %278 : vector<1x512xi1> to vector<1x512xi1>
    %280 = vector.broadcast %279 : vector<1x512xi1> to vector<8x512xi1>
    %281 = vector.broadcast %cst_53 : f32 to vector<8x512xf32>
    %282 = arith.select %280, %276, %281 : vector<8x512xi1>, vector<8x512xf32>
    %283 = vector.extract_strided_slice %27 {offsets = [0, 36], sizes = [8, 1], strides = [1, 1]} : vector<8x54xf32> to vector<8x1xf32>
    %284 = vector.broadcast %283 : vector<8x1xf32> to vector<8x512xf32>
    %285 = arith.mulf %282, %284 : vector<8x512xf32>
    %286 = arith.addf %271, %285 : vector<8x512xf32>
    %287 = vector.extract_strided_slice %27 {offsets = [0, 37], sizes = [8, 1], strides = [1, 1]} : vector<8x54xf32> to vector<8x1xf32>
    %288 = vector.broadcast %287 : vector<8x1xf32> to vector<8x512xf32>
    %289 = arith.mulf %282, %288 : vector<8x512xf32>
    %290 = arith.addf %275, %289 : vector<8x512xf32>
    %c0_54 = arith.constant 0 : index
    %c184 = arith.constant 184 : index
    %291 = vector.load %arg4[%c0_54, %c184] : memref<8x768xf32, #tpu.memory_space<vmem>>, vector<8x512xf32>
    %292 = arith.andi %18, %20 : vector<1x512xi1>
    %cst_55 = arith.constant 0.000000e+00 : f32
    %293 = vector.shape_cast %292 : vector<1x512xi1> to vector<1x512xi1>
    %294 = vector.broadcast %293 : vector<1x512xi1> to vector<8x512xi1>
    %295 = vector.broadcast %cst_55 : f32 to vector<8x512xf32>
    %296 = arith.select %294, %291, %295 : vector<8x512xi1>, vector<8x512xf32>
    %297 = vector.extract_strided_slice %27 {offsets = [0, 38], sizes = [8, 1], strides = [1, 1]} : vector<8x54xf32> to vector<8x1xf32>
    %298 = vector.broadcast %297 : vector<8x1xf32> to vector<8x512xf32>
    %299 = arith.mulf %296, %298 : vector<8x512xf32>
    %300 = arith.addf %286, %299 : vector<8x512xf32>
    %301 = vector.extract_strided_slice %27 {offsets = [0, 39], sizes = [8, 1], strides = [1, 1]} : vector<8x54xf32> to vector<8x1xf32>
    %302 = vector.broadcast %301 : vector<8x1xf32> to vector<8x512xf32>
    %303 = arith.mulf %296, %302 : vector<8x512xf32>
    %304 = arith.addf %290, %303 : vector<8x512xf32>
    %c0_56 = arith.constant 0 : index
    %c185 = arith.constant 185 : index
    %305 = vector.load %arg4[%c0_56, %c185] : memref<8x768xf32, #tpu.memory_space<vmem>>, vector<8x512xf32>
    %306 = arith.andi %18, %20 : vector<1x512xi1>
    %307 = arith.andi %306, %26 : vector<1x512xi1>
    %cst_57 = arith.constant 0.000000e+00 : f32
    %308 = vector.shape_cast %307 : vector<1x512xi1> to vector<1x512xi1>
    %309 = vector.broadcast %308 : vector<1x512xi1> to vector<8x512xi1>
    %310 = vector.broadcast %cst_57 : f32 to vector<8x512xf32>
    %311 = arith.select %309, %305, %310 : vector<8x512xi1>, vector<8x512xf32>
    %312 = vector.extract_strided_slice %27 {offsets = [0, 40], sizes = [8, 1], strides = [1, 1]} : vector<8x54xf32> to vector<8x1xf32>
    %313 = vector.broadcast %312 : vector<8x1xf32> to vector<8x512xf32>
    %314 = arith.mulf %311, %313 : vector<8x512xf32>
    %315 = arith.addf %300, %314 : vector<8x512xf32>
    %316 = vector.extract_strided_slice %27 {offsets = [0, 41], sizes = [8, 1], strides = [1, 1]} : vector<8x54xf32> to vector<8x1xf32>
    %317 = vector.broadcast %316 : vector<8x1xf32> to vector<8x512xf32>
    %318 = arith.mulf %311, %317 : vector<8x512xf32>
    %319 = arith.addf %304, %318 : vector<8x512xf32>
    %c0_58 = arith.constant 0 : index
    %c191 = arith.constant 191 : index
    %320 = vector.load %arg4[%c0_58, %c191] : memref<8x768xf32, #tpu.memory_space<vmem>>, vector<8x512xf32>
    %321 = arith.andi %18, %24 : vector<1x512xi1>
    %cst_59 = arith.constant 0.000000e+00 : f32
    %322 = vector.shape_cast %321 : vector<1x512xi1> to vector<1x512xi1>
    %323 = vector.broadcast %322 : vector<1x512xi1> to vector<8x512xi1>
    %324 = vector.broadcast %cst_59 : f32 to vector<8x512xf32>
    %325 = arith.select %323, %320, %324 : vector<8x512xi1>, vector<8x512xf32>
    %326 = vector.extract_strided_slice %27 {offsets = [0, 42], sizes = [8, 1], strides = [1, 1]} : vector<8x54xf32> to vector<8x1xf32>
    %327 = vector.broadcast %326 : vector<8x1xf32> to vector<8x512xf32>
    %328 = arith.mulf %325, %327 : vector<8x512xf32>
    %329 = arith.addf %315, %328 : vector<8x512xf32>
    %330 = vector.extract_strided_slice %27 {offsets = [0, 43], sizes = [8, 1], strides = [1, 1]} : vector<8x54xf32> to vector<8x1xf32>
    %331 = vector.broadcast %330 : vector<8x1xf32> to vector<8x512xf32>
    %332 = arith.mulf %325, %331 : vector<8x512xf32>
    %333 = arith.addf %319, %332 : vector<8x512xf32>
    %c0_60 = arith.constant 0 : index
    %c192 = arith.constant 192 : index
    %334 = vector.load %arg4[%c0_60, %c192] : memref<8x768xf32, #tpu.memory_space<vmem>>, vector<8x512xf32>
    %cst_61 = arith.constant 0.000000e+00 : f32
    %335 = vector.shape_cast %18 : vector<1x512xi1> to vector<1x512xi1>
    %336 = vector.broadcast %335 : vector<1x512xi1> to vector<8x512xi1>
    %337 = vector.broadcast %cst_61 : f32 to vector<8x512xf32>
    %338 = arith.select %336, %334, %337 : vector<8x512xi1>, vector<8x512xf32>
    %339 = vector.extract_strided_slice %27 {offsets = [0, 44], sizes = [8, 1], strides = [1, 1]} : vector<8x54xf32> to vector<8x1xf32>
    %340 = vector.broadcast %339 : vector<8x1xf32> to vector<8x512xf32>
    %341 = arith.mulf %338, %340 : vector<8x512xf32>
    %342 = arith.addf %329, %341 : vector<8x512xf32>
    %343 = vector.extract_strided_slice %27 {offsets = [0, 45], sizes = [8, 1], strides = [1, 1]} : vector<8x54xf32> to vector<8x1xf32>
    %344 = vector.broadcast %343 : vector<8x1xf32> to vector<8x512xf32>
    %345 = arith.mulf %338, %344 : vector<8x512xf32>
    %346 = arith.addf %333, %345 : vector<8x512xf32>
    %c0_62 = arith.constant 0 : index
    %c193 = arith.constant 193 : index
    %347 = vector.load %arg4[%c0_62, %c193] : memref<8x768xf32, #tpu.memory_space<vmem>>, vector<8x512xf32>
    %348 = arith.andi %18, %26 : vector<1x512xi1>
    %cst_63 = arith.constant 0.000000e+00 : f32
    %349 = vector.shape_cast %348 : vector<1x512xi1> to vector<1x512xi1>
    %350 = vector.broadcast %349 : vector<1x512xi1> to vector<8x512xi1>
    %351 = vector.broadcast %cst_63 : f32 to vector<8x512xf32>
    %352 = arith.select %350, %347, %351 : vector<8x512xi1>, vector<8x512xf32>
    %353 = vector.extract_strided_slice %27 {offsets = [0, 46], sizes = [8, 1], strides = [1, 1]} : vector<8x54xf32> to vector<8x1xf32>
    %354 = vector.broadcast %353 : vector<8x1xf32> to vector<8x512xf32>
    %355 = arith.mulf %352, %354 : vector<8x512xf32>
    %356 = arith.addf %342, %355 : vector<8x512xf32>
    %357 = vector.extract_strided_slice %27 {offsets = [0, 47], sizes = [8, 1], strides = [1, 1]} : vector<8x54xf32> to vector<8x1xf32>
    %358 = vector.broadcast %357 : vector<8x1xf32> to vector<8x512xf32>
    %359 = arith.mulf %352, %358 : vector<8x512xf32>
    %360 = arith.addf %346, %359 : vector<8x512xf32>
    %c0_64 = arith.constant 0 : index
    %c199 = arith.constant 199 : index
    %361 = vector.load %arg4[%c0_64, %c199] : memref<8x768xf32, #tpu.memory_space<vmem>>, vector<8x512xf32>
    %362 = arith.andi %18, %22 : vector<1x512xi1>
    %363 = arith.andi %362, %24 : vector<1x512xi1>
    %cst_65 = arith.constant 0.000000e+00 : f32
    %364 = vector.shape_cast %363 : vector<1x512xi1> to vector<1x512xi1>
    %365 = vector.broadcast %364 : vector<1x512xi1> to vector<8x512xi1>
    %366 = vector.broadcast %cst_65 : f32 to vector<8x512xf32>
    %367 = arith.select %365, %361, %366 : vector<8x512xi1>, vector<8x512xf32>
    %368 = vector.extract_strided_slice %27 {offsets = [0, 48], sizes = [8, 1], strides = [1, 1]} : vector<8x54xf32> to vector<8x1xf32>
    %369 = vector.broadcast %368 : vector<8x1xf32> to vector<8x512xf32>
    %370 = arith.mulf %367, %369 : vector<8x512xf32>
    %371 = arith.addf %356, %370 : vector<8x512xf32>
    %372 = vector.extract_strided_slice %27 {offsets = [0, 49], sizes = [8, 1], strides = [1, 1]} : vector<8x54xf32> to vector<8x1xf32>
    %373 = vector.broadcast %372 : vector<8x1xf32> to vector<8x512xf32>
    %374 = arith.mulf %367, %373 : vector<8x512xf32>
    %375 = arith.addf %360, %374 : vector<8x512xf32>
    %c0_66 = arith.constant 0 : index
    %c200 = arith.constant 200 : index
    %376 = vector.load %arg4[%c0_66, %c200] : memref<8x768xf32, #tpu.memory_space<vmem>>, vector<8x512xf32>
    %377 = arith.andi %18, %22 : vector<1x512xi1>
    %cst_67 = arith.constant 0.000000e+00 : f32
    %378 = vector.shape_cast %377 : vector<1x512xi1> to vector<1x512xi1>
    %379 = vector.broadcast %378 : vector<1x512xi1> to vector<8x512xi1>
    %380 = vector.broadcast %cst_67 : f32 to vector<8x512xf32>
    %381 = arith.select %379, %376, %380 : vector<8x512xi1>, vector<8x512xf32>
    %382 = vector.extract_strided_slice %27 {offsets = [0, 50], sizes = [8, 1], strides = [1, 1]} : vector<8x54xf32> to vector<8x1xf32>
    %383 = vector.broadcast %382 : vector<8x1xf32> to vector<8x512xf32>
    %384 = arith.mulf %381, %383 : vector<8x512xf32>
    %385 = arith.addf %371, %384 : vector<8x512xf32>
    %386 = vector.extract_strided_slice %27 {offsets = [0, 51], sizes = [8, 1], strides = [1, 1]} : vector<8x54xf32> to vector<8x1xf32>
    %387 = vector.broadcast %386 : vector<8x1xf32> to vector<8x512xf32>
    %388 = arith.mulf %381, %387 : vector<8x512xf32>
    %389 = arith.addf %375, %388 : vector<8x512xf32>
    %c0_68 = arith.constant 0 : index
    %c201 = arith.constant 201 : index
    %390 = vector.load %arg4[%c0_68, %c201] : memref<8x768xf32, #tpu.memory_space<vmem>>, vector<8x512xf32>
    %391 = arith.andi %18, %22 : vector<1x512xi1>
    %392 = arith.andi %391, %26 : vector<1x512xi1>
    %cst_69 = arith.constant 0.000000e+00 : f32
    %393 = vector.shape_cast %392 : vector<1x512xi1> to vector<1x512xi1>
    %394 = vector.broadcast %393 : vector<1x512xi1> to vector<8x512xi1>
    %395 = vector.broadcast %cst_69 : f32 to vector<8x512xf32>
    %396 = arith.select %394, %390, %395 : vector<8x512xi1>, vector<8x512xf32>
    %397 = vector.extract_strided_slice %27 {offsets = [0, 52], sizes = [8, 1], strides = [1, 1]} : vector<8x54xf32> to vector<8x1xf32>
    %398 = vector.broadcast %397 : vector<8x1xf32> to vector<8x512xf32>
    %399 = arith.mulf %396, %398 : vector<8x512xf32>
    %400 = arith.addf %385, %399 : vector<8x512xf32>
    %401 = vector.extract_strided_slice %27 {offsets = [0, 53], sizes = [8, 1], strides = [1, 1]} : vector<8x54xf32> to vector<8x1xf32>
    %402 = vector.broadcast %401 : vector<8x1xf32> to vector<8x512xf32>
    %403 = arith.mulf %396, %402 : vector<8x512xf32>
    %404 = arith.addf %389, %403 : vector<8x512xf32>
    %405 = vector.extract_strided_slice %400 {offsets = [0, 0], sizes = [4, 512], strides = [1, 1]} : vector<8x512xf32> to vector<4x512xf32>
    %cst_70 = arith.constant dense<0.000000e+00> : vector<512xf32>
    %406 = vector.multi_reduction <add>, %405, %cst_70 [0] : vector<4x512xf32> to vector<512xf32>
    %407 = vector.shape_cast %406 : vector<512xf32> to vector<1x512xf32>
    %408 = vector.extract_strided_slice %400 {offsets = [4, 0], sizes = [4, 512], strides = [1, 1]} : vector<8x512xf32> to vector<4x512xf32>
    %cst_71 = arith.constant dense<0.000000e+00> : vector<512xf32>
    %409 = vector.multi_reduction <add>, %408, %cst_71 [0] : vector<4x512xf32> to vector<512xf32>
    %410 = vector.shape_cast %409 : vector<512xf32> to vector<1x512xf32>
    %411 = tpu.concatenate %407, %410 in 0 : vector<1x512xf32>, vector<1x512xf32> -> vector<2x512xf32>
    %c0_72 = arith.constant 0 : index
    %412 = memref.load %arg2[%c0_72] : memref<8xf32, #tpu.memory_space<smem>>
    %413 = vector.broadcast %412 : f32 to vector<2x512xf32>
    %414 = arith.addf %411, %413 : vector<2x512xf32>
    %cst_73 = arith.constant 0.000000e+00 : f32
    %415 = vector.broadcast %cst_73 : f32 to vector<2x512xf32>
    %416 = arith.maximumf %414, %415 : vector<2x512xf32>
    %417 = vector.extract_strided_slice %404 {offsets = [0, 0], sizes = [4, 512], strides = [1, 1]} : vector<8x512xf32> to vector<4x512xf32>
    %cst_74 = arith.constant dense<0.000000e+00> : vector<512xf32>
    %418 = vector.multi_reduction <add>, %417, %cst_74 [0] : vector<4x512xf32> to vector<512xf32>
    %419 = vector.shape_cast %418 : vector<512xf32> to vector<1x512xf32>
    %420 = vector.extract_strided_slice %404 {offsets = [4, 0], sizes = [4, 512], strides = [1, 1]} : vector<8x512xf32> to vector<4x512xf32>
    %cst_75 = arith.constant dense<0.000000e+00> : vector<512xf32>
    %421 = vector.multi_reduction <add>, %420, %cst_75 [0] : vector<4x512xf32> to vector<512xf32>
    %422 = vector.shape_cast %421 : vector<512xf32> to vector<1x512xf32>
    %423 = tpu.concatenate %419, %422 in 0 : vector<1x512xf32>, vector<1x512xf32> -> vector<2x512xf32>
    %c1 = arith.constant 1 : index
    %424 = memref.load %arg2[%c1] : memref<8xf32, #tpu.memory_space<smem>>
    %425 = vector.broadcast %424 : f32 to vector<2x512xf32>
    %426 = arith.addf %423, %425 : vector<2x512xf32>
    %cst_76 = arith.constant 0.000000e+00 : f32
    %427 = vector.broadcast %cst_76 : f32 to vector<2x512xf32>
    %428 = arith.maximumf %426, %427 : vector<2x512xf32>
    %c2 = arith.constant 2 : index
    %429 = memref.load %arg2[%c2] : memref<8xf32, #tpu.memory_space<smem>>
    %430 = vector.broadcast %429 : f32 to vector<2x512xf32>
    %431 = arith.mulf %416, %430 : vector<2x512xf32>
    %c3 = arith.constant 3 : index
    %432 = memref.load %arg2[%c3] : memref<8xf32, #tpu.memory_space<smem>>
    %433 = vector.broadcast %432 : f32 to vector<2x512xf32>
    %434 = arith.mulf %428, %433 : vector<2x512xf32>
    %435 = arith.addf %431, %434 : vector<2x512xf32>
    %c6 = arith.constant 6 : index
    %436 = memref.load %arg2[%c6] : memref<8xf32, #tpu.memory_space<smem>>
    %437 = vector.broadcast %436 : f32 to vector<2x512xf32>
    %438 = arith.addf %435, %437 : vector<2x512xf32>
    %c4 = arith.constant 4 : index
    %439 = memref.load %arg2[%c4] : memref<8xf32, #tpu.memory_space<smem>>
    %440 = vector.broadcast %439 : f32 to vector<2x512xf32>
    %441 = arith.mulf %416, %440 : vector<2x512xf32>
    %c5 = arith.constant 5 : index
    %442 = memref.load %arg2[%c5] : memref<8xf32, #tpu.memory_space<smem>>
    %443 = vector.broadcast %442 : f32 to vector<2x512xf32>
    %444 = arith.mulf %428, %443 : vector<2x512xf32>
    %445 = arith.addf %441, %444 : vector<2x512xf32>
    %c7 = arith.constant 7 : index
    %446 = memref.load %arg2[%c7] : memref<8xf32, #tpu.memory_space<smem>>
    %447 = vector.broadcast %446 : f32 to vector<2x512xf32>
    %448 = arith.addf %445, %447 : vector<2x512xf32>
    %449 = arith.maximumf %438, %448 : vector<2x512xf32>
    %450 = arith.subf %438, %449 : vector<2x512xf32>
    %451 = math.exp %450 : vector<2x512xf32>
    %452 = arith.subf %448, %449 : vector<2x512xf32>
    %453 = math.exp %452 : vector<2x512xf32>
    %454 = arith.addf %451, %453 : vector<2x512xf32>
    %455 = tpu.reciprocal %454 {approx = true} : vector<2x512xf32> -> vector<2x512xf32>
    %456 = arith.mulf %454, %455 : vector<2x512xf32>
    %cst_77 = arith.constant 2.000000e+00 : f32
    %457 = vector.broadcast %cst_77 : f32 to vector<2x512xf32>
    %458 = arith.subf %457, %456 : vector<2x512xf32>
    %459 = arith.mulf %455, %458 : vector<2x512xf32>
    %460 = arith.mulf %451, %459 : vector<2x512xf32>
    %461 = vector.extract_strided_slice %460 {offsets = [0, 0], sizes = [1, 512], strides = [1, 1]} : vector<2x512xf32> to vector<1x512xf32>
    %462 = arith.mulf %453, %459 : vector<2x512xf32>
    %463 = vector.extract_strided_slice %462 {offsets = [0, 0], sizes = [1, 512], strides = [1, 1]} : vector<2x512xf32> to vector<1x512xf32>
    %464 = arith.mulf %451, %459 : vector<2x512xf32>
    %465 = vector.extract_strided_slice %464 {offsets = [1, 0], sizes = [1, 512], strides = [1, 1]} : vector<2x512xf32> to vector<1x512xf32>
    %466 = arith.mulf %453, %459 : vector<2x512xf32>
    %467 = vector.extract_strided_slice %466 {offsets = [1, 0], sizes = [1, 512], strides = [1, 1]} : vector<2x512xf32> to vector<1x512xf32>
    %468 = tpu.concatenate %461, %463, %465, %467 in 0 : vector<1x512xf32>, vector<1x512xf32>, vector<1x512xf32>, vector<1x512xf32> -> vector<4x512xf32>
    %c0_78 = arith.constant 0 : index
    %c0_79 = arith.constant 0 : index
    %469 = vector.load %arg3[%c0_78, %c0_79] : memref<4x512xf32, #tpu.memory_space<vmem>>, vector<4x512xf32>
    tpu.vector_store %arg3[%c0_78, %c0_79], %468 {strides = array<i32>} : memref<4x512xf32, #tpu.memory_space<vmem>>, vector<4x512xf32>,
    return
  }
}

</mosaic_0001>

<bundles_post_ra>
// kernel: tpu_custom_call.1
= control target key start
LH: loop header
LB: loop body
LE: loop exit
PB: predicated region body
PF: predicated region fallthrough
CT: control target
= control target key end

     0   :  { %8 = vsyncpa [#allocation4], 0  ;;  %s4289_s0 = inlined_call_operand.hbm [shape: f32[8,512], index: 0, kind: input, shape index: {}]   ;;  %s4290_s1 = inlined_call_operand.hbm [shape: f32[8,54], index: 1, kind: input, shape index: {}]   ;;  %s4291_s2 = inlined_call_operand.vmem [shape: f32[8], index: 2, kind: input, shape index: {}]   ;;  %s4292_s3 = inlined_call_operand.hbm [shape: f32[4,512], index: 3, kind: output, shape index: {}]  }
   0x1   :  { %9 = vsyncpa [#allocation8], 0 }
   0x2   :  { %10 = vsyncpa [#allocation6], 0 }
   0x3   :  { %11 = vsyncpa [#allocation5], 0  ;;  %s2271_s12 = smov [#allocation3]   ;;  %s2272_s14 = smov [#allocation7]  }
   0x4   :  { %s18_s13 = sshll.u32 %s2271_s12, 4  ;;  %s28_s15 = sshll.u32 %s2272_s14, 4  ;;  %s19_s13 = int_to_ptr.vmem [resolvable:$true] %s18_s13  ;;  %s29_s15 = int_to_ptr.vmem [resolvable:$true] %s28_s15 }
   0x5   :  { %s2185_s18 = scalar_lea.hbm %s4289_s0, 512 }
   0x6   :  { %p2186_p0 = scmp.ne.s32.totalorder %s4289_s0, %s2185_s18  ;;  %p2189_p1 = scmp.lt.u32.totalorder %s2185_s18, %s4289_s0 }
   0x8   :  { %p2191_p2 = pnand %p2189_p1, %p2186_p0 }
   0xa   :  { %2194 = shalt.err (!%p2191_p2)
}
   0xb   :  { %s2195_s23 = scalar_lea.vmem %s19_s13, 512  ;;  %p2200_p4 = scmp.lt.s32.totalorder %s19_s13, %s19_s13 }
   0xc   :  { %p2196_p3 = scmp.ne.s32.totalorder %s19_s13, %s2195_s23  ;;  %p2201_p5 = scmp.lt.s32.totalorder %s2195_s23, %s2195_s23 }
   0xe   :  { %p2202_p6 = por %p2201_p5, %p2200_p4 }
  0x10   :  { %p2203_p7 = pnand %p2202_p6, %p2196_p3 }
  0x12   :  { %2206 = shalt.err (!%p2203_p7)
}
  0x13   :  { %21 = dma.hbm_to_vmem [thread:$0]  %s4289_s0, 512, %s19_s13, [#allocation4]  }
  0x14   :  { %s2207_s28 = scalar_lea.hbm %s4290_s1, 128 }
  0x15   :  { %p2208_p8 = scmp.ne.s32.totalorder %s4290_s1, %s2207_s28  ;;  %p2211_p9 = scmp.lt.u32.totalorder %s2207_s28, %s4290_s1 }
  0x17   :  { %p2213_p10 = pnand %p2211_p9, %p2208_p8 }
  0x19   :  { %2216 = shalt.err (!%p2213_p10)
}
  0x1a   :  { %s2217_s6 = scalar_lea.vmem %s29_s15, 128  ;;  %p2222_p12 = scmp.lt.s32.totalorder %s29_s15, %s29_s15 }
  0x1b   :  { %p2218_p11 = scmp.ne.s32.totalorder %s29_s15, %s2217_s6  ;;  %p2223_p13 = scmp.lt.s32.totalorder %s2217_s6, %s2217_s6 }
  0x1d   :  { %p2224_p0 = por %p2223_p13, %p2222_p12 }
  0x1f   :  { %p2225_p1 = pnand %p2224_p0, %p2218_p11 }
  0x21   :  { %2228 = shalt.err (!%p2225_p1)
}
  0x22   :  { %31 = dma.hbm_to_vmem [thread:$0]  %s4290_s1, 128, %s29_s15, [#allocation8]  }
  0x23   :  { %s38_s10 = sshll.u32 %s4291_s2, 4  ;;  %s39_s10 = int_to_ptr.vmem [resolvable:$true] %s38_s10 }
  0x24   :  { %s2229_s11 = scalar_lea.vmem %s39_s10, 16  ;;  %p2234_p3 = scmp.lt.s32.totalorder %s39_s10, %s39_s10 }
  0x25   :  { %p2230_p2 = scmp.ne.s32.totalorder %s39_s10, %s2229_s11  ;;  %p2235_p4 = scmp.lt.s32.totalorder %s2229_s11, %s2229_s11 }
  0x27   :  { %p2236_p5 = por %p2235_p4, %p2234_p3 }
  0x29   :  { %p2237_p6 = pnand %p2236_p5, %p2230_p2 }
  0x2b   :  { %2240 = shalt.err (!%p2237_p6)
}
  0x2c   :  { %s2273_s12 = smov [#allocation9]  }
  0x2d   :  { %41 = dma.vmem_to_smem %s39_s10, 16, %s2273_s12, [#allocation6]  }
  0x2e   :  { %2263 = dma.done.wait [#allocation4], 512  }
  0x2f   :  { %2264 = vsyncadd [#allocation4], 4294966784 }
  0x30   :  { %2265 = dma.done.wait [#allocation8], 128  }
  0x31   :  { %2266 = vsyncadd [#allocation8], 4294967168 }
  0x32   :  { %2267 = dma.done.wait [#allocation6], 16  }
  0x33   :  { %2268 = vsyncadd [#allocation6], 4294967280 }
  0x34   :  { %51 = sfence }
  0x35   :  { %v2394_v0 = vld [vmem:[#allocation3 + $0x8] sm:$0xff]  ;;  %s2274_s1 = smov 73   ;;  %v2398_v1 = vld [vmem:[#allocation3 + $0x10] sm:$0xff]  ;;  %v2275_v2 = vmov 0   ;;  %v2276_v3 = vmov 1   ;;  %v4293_v4 = vmov 0.0  }
  0x36   :  { %138 = vrot.lane.b32.xlu1 %v2394_v0, %s2274_s1  ;;  %2082 = vset.pattern.permute.xlu0 %v2276_v3  ;;  %v2402_v5 = vld [vmem:[#allocation3] sm:$0xff]  ;;  %v2410_v7 = vld [vmem:[#allocation3 + $0x18] sm:$0xff]  ;;  %s2278_s2 = smov 72   ;;  %v2279_v8 = vmov 2   ;;  %v2280_v9 = vmov 3   ;;  %s2281_s13 = smov 71  }
  0x37   :  { %2081 = vset.pattern.permute.xlu1 %v2275_v2  ;;  %2077 = vrot.lane.b32.xlu0 %v4293_v4, %s2274_s1  ;;  %4382 = vst [vmem:[#allocation15_spill] sm:$0xff] %v2402_v5  ;;  %v2406_v6 = vld [vmem:[#allocation7] sm:$0xff]  ;;  %v2282_v10 = vmov 4   ;;  %v2283_v11 = vmov 5   ;;  %s2284_s14 = smov 65   ;;  %v2285_v12 = vmov 7  }
  0x38   :  { %v2286_v13 = vmov 6   ;;  %s2287_s15 = smov 64   ;;  %v2288_v14 = vmov 9   ;;  %v2289_v15 = vmov 8   ;;  %s2290_s16 = smov 63   ;;  %v2291_v16 = vmov 11  }
  0x39   :  { %v2292_v17 = vmov 10   ;;  %s2293_s17 = smov 57   ;;  %v2294_v18 = vmov 13   ;;  %s2295_s18 = smov 56   ;;  %v2296_v19 = vmov 15   ;;  %v2297_v20 = vmov 12  }
  0x3a   :  { %140 = vrot.lane.b32.xlu1 %v2398_v1, %s2274_s1  ;;  %s2298_s19 = smov 55   ;;  %v2299_v21 = vmov 17   ;;  %v2300_v22 = vmov 14   ;;  %s2301_s20 = smov 9   ;;  %v2302_v23 = vmov 19   ;;  %v2303_v26 = vmov 16  }
  0x3b   :  { %136 = vrot.lane.b32.xlu0 %v2402_v5, %s2274_s1  ;;  %s2304_s21 = smov 8   ;;  %v2305_v27 = vmov 21   ;;  %s2306_s22 = smov 7   ;;  %v2307_v33 = vmov 23   ;;  %v2308_v35 = vmov 18   ;;  %v2310_v41 = vmov 25  }
  0x3c   :  { %s2309_s23 = smov 1   ;;  %v2311_v45 = vmov 20   ;;  %s2312_s24 = smov 127   ;;  %v2313_v49 = vmov 29   ;;  %v2314_v55 = vmov 22   ;;  %v2316_v59 = vmov 31  }
  0x3d   :  { %s2315_s25 = smov 121   ;;  %v2317_v3 = vmov 24   ;;  %s2318_s26 = smov 120   ;;  %vm4329_vm12 = vcmask 596992  }
  0x3e   :  { %159 = vperm.xlu1 %2081, %v2406_v6   ;;  %s2320_s27 = smov 119   ;;  %s4058_s28 = sld [smem:[#allocation9]] }
  0x3f   :  { %142 = vrot.lane.b32.xlu0 %v2410_v7, %s2274_s1  ;;  %s4060_s29 = sld [smem:[#allocation9 + $0x1]]  ;;  %s4062_s30 = sld [smem:[#allocation9 + $0x2]] }
  0x40   :  { %s4072_s4 = sld [smem:[#allocation9 + $0x3]]  ;;  %s4074_s5 = sld [smem:[#allocation9 + $0x6]] }
  0x41   :  { %s4081_s6 = sld [smem:[#allocation9 + $0x4]]  ;;  %s4083_s0 = sld [smem:[#allocation9 + $0x5]] }
  0x42   :  { %2084 = vrot.lane.b32.xlu1 %v4293_v4, %s2278_s2  ;;  %s4123_s7 = sld [smem:[#allocation9 + $0x7]]  ;;  %s2346_s8 = smov [#allocation10]  }
  0x43   :  { %2088 = vset.pattern.permute.xlu1 %v2279_v8  ;;  %171 = vperm.xlu0 %2082, %v2406_v6   ;;  %s1982_s9 = sshll.u32 %s2346_s8, 4  ;;  %s1983_s9 = int_to_ptr.vmem [resolvable:$true] %s1982_s9 }
  0x44   :  { %s2241_s10 = scalar_lea.vmem %s1983_s9, 256  ;;  %p2246_p8 = scmp.lt.s32.totalorder %s1983_s9, %s1983_s9 }
  0x45   :  { %p2242_p7 = scmp.ne.s32.totalorder %s1983_s9, %s2241_s10  ;;  %p2247_p9 = scmp.lt.s32.totalorder %s2241_s10, %s2241_s10 }
  0x46   :  { %192 = vrot.lane.b32.xlu1 %v2402_v5, %s2278_s2 }
  0x47   :  { %194 = vrot.lane.b32.xlu0 %v2394_v0, %s2278_s2  ;;  %p2248_p10 = por %p2247_p9, %p2246_p8 }
  0x48   :  { %2089 = vset.pattern.permute.xlu0 %v2280_v9  ;;  %v2319_v9 = vmov 33  }
  0x49   :  { %p2249_p11 = pnand %p2248_p10, %p2242_p7 }
  0x4a   :  { %196 = vrot.lane.b32.xlu1 %v2398_v1, %s2278_s2 }
  0x4b   :  { %198 = vrot.lane.b32.xlu0 %v2410_v7, %s2278_s2 }
  0x4e   :  { %214 = vperm.xlu1 %2088, %v2406_v6  }
  0x4f   :  { %226 = vperm.xlu0 %2089, %v2406_v6  }
  0x52   :  { %2091 = vrot.lane.b32.xlu1 %v4293_v4, %s2281_s13 }
  0x53   :  { %2095 = vset.pattern.permute.xlu1 %v2282_v10  ;;  %253 = vrot.lane.b32.xlu0 %v2394_v0, %s2281_s13 }
  0x54   :  { %2096 = vset.pattern.permute.xlu0 %v2283_v11 }
  0x56   :  { %251 = vrot.lane.b32.xlu1 %v2402_v5, %s2281_s13 }
  0x57   :  { %257 = vrot.lane.b32.xlu0 %v2410_v7, %s2281_s13 }
  0x5a   :  { %255 = vrot.lane.b32.xlu1 %v2398_v1, %s2281_s13 }
  0x5b   :  { %285 = vperm.xlu0 %2096, %v2406_v6  }
  0x5e   :  { %273 = vperm.xlu1 %2095, %v2406_v6  }
  0x5f   :  { %312 = vrot.lane.b32.xlu0 %v2394_v0, %s2284_s14 }
  0x60   :  { %2103 = vset.pattern.permute.xlu0 %v2285_v12 }
  0x62   :  { %2098 = vrot.lane.b32.xlu1 %v4293_v4, %s2284_s14 }
  0x63   :  { %2102 = vset.pattern.permute.xlu1 %v2286_v13  ;;  %316 = vrot.lane.b32.xlu0 %v2410_v7, %s2284_s14 }
  0x66   :  { %310 = vrot.lane.b32.xlu1 %v2402_v5, %s2284_s14 }
  0x67   :  { %344 = vperm.xlu0 %2103, %v2406_v6  }
  0x6a   :  { %314 = vrot.lane.b32.xlu1 %v2398_v1, %s2284_s14 }
  0x6b   :  { %367 = vrot.lane.b32.xlu0 %v2394_v0, %s2287_s15 }
  0x6c   :  { %2110 = vset.pattern.permute.xlu0 %v2288_v14 }
  0x6e   :  { %332 = vperm.xlu1 %2102, %v2406_v6  }
  0x6f   :  { %371 = vrot.lane.b32.xlu0 %v2410_v7, %s2287_s15 }
  0x72   :  { %2105 = vrot.lane.b32.xlu1 %v4293_v4, %s2287_s15 }
  0x73   :  { %2109 = vset.pattern.permute.xlu1 %v2289_v15  ;;  %399 = vperm.xlu0 %2110, %v2406_v6  }
  0x76   :  { %365 = vrot.lane.b32.xlu1 %v2402_v5, %s2287_s15 }
  0x77   :  { %426 = vrot.lane.b32.xlu0 %v2394_v0, %s2290_s16 }
  0x78   :  { %2112 = vset.pattern.permute.xlu0 %v2291_v16  ;;  %v2321_v16 = vmov 35  }
  0x7a   :  { %369 = vrot.lane.b32.xlu1 %v2398_v1, %s2287_s15 }
  0x7b   :  { %430 = vrot.lane.b32.xlu0 %v2410_v7, %s2290_s16 }
  0x7e   :  { %387 = vperm.xlu1 %2109, %v2406_v6  }
  0x7f   :  { %458 = vperm.xlu0 %2112, %v2406_v6  }
  0x82   :  { %422 = vrot.lane.b32.xlu1 %v4293_v4, %s2290_s16 }
  0x83   :  { %2111 = vset.pattern.permute.xlu1 %v2292_v17  ;;  %489 = vrot.lane.b32.xlu0 %v2394_v0, %s2293_s17  ;;  %v2322_v17 = vmov 26  }
  0x84   :  { %2114 = vset.pattern.permute.xlu0 %v2294_v18  ;;  %v62_v18 = vlaneseq }
  0x86   :  { %424 = vrot.lane.b32.xlu1 %v2402_v5, %s2290_s16 }
  0x87   :  { %493 = vrot.lane.b32.xlu0 %v2410_v7, %s2293_s17 }
  0x8a   :  { %428 = vrot.lane.b32.xlu1 %v2398_v1, %s2290_s16 }
  0x8b   :  { %521 = vperm.xlu0 %2114, %v2406_v6  }
  0x8e   :  { %446 = vperm.xlu1 %2111, %v2406_v6  }
  0x8f   :  { %544 = vrot.lane.b32.xlu0 %v2394_v0, %s2295_s18 }
  0x90   :  { %2116 = vset.pattern.permute.xlu0 %v2296_v19 }
  0x92   :  { %485 = vrot.lane.b32.xlu1 %v4293_v4, %s2293_s17 }
  0x93   :  { %2113 = vset.pattern.permute.xlu1 %v2297_v20  ;;  %548 = vrot.lane.b32.xlu0 %v2410_v7, %s2295_s18 }
  0x96   :  { %487 = vrot.lane.b32.xlu1 %v2402_v5, %s2293_s17 }
  0x97   :  { %576 = vperm.xlu0 %2116, %v2406_v6  }
  0x9a   :  { %491 = vrot.lane.b32.xlu1 %v2398_v1, %s2293_s17 }
  0x9b   :  { %603 = vrot.lane.b32.xlu0 %v2394_v0, %s2298_s19 }
  0x9c   :  { %2118 = vset.pattern.permute.xlu0 %v2299_v21  ;;  %v2664_v21 = vand.u32 127, %v62_v18 }
  0x9e   :  { %509 = vperm.xlu1 %2113, %v2406_v6   ;;  %4401 = vst [vmem:[#allocation34_spill] sm:$0xff] %v2664_v21 }
  0x9f   :  { %607 = vrot.lane.b32.xlu0 %v2410_v7, %s2298_s19 }
  0xa2   :  { %540 = vrot.lane.b32.xlu1 %v4293_v4, %s2295_s18 }
  0xa3   :  { %2115 = vset.pattern.permute.xlu1 %v2300_v22  ;;  %635 = vperm.xlu0 %2118, %v2406_v6   ;;  %v2323_v22 = vmov 27  }
  0xa6   :  { %542 = vrot.lane.b32.xlu1 %v2402_v5, %s2295_s18 }
  0xa7   :  { %662 = vrot.lane.b32.xlu0 %v2394_v0, %s2301_s20 }
  0xa8   :  { %2120 = vset.pattern.permute.xlu0 %v2302_v23  ;;  %v2512_v24 = vpop.permute.xlu1 %138 }
  0xa9   :  { %v2514_v25 = vpop.permute.xlu0 %2077 }
  0xaa   :  { %546 = vrot.lane.b32.xlu1 %v2398_v1, %s2295_s18  ;;  %4383 = vst [vmem:[#allocation16_spill] sm:$0xff] %v2514_v25 }
  0xab   :  { %666 = vrot.lane.b32.xlu0 %v2410_v7, %s2301_s20 }
  0xac   :  { %v2522_v28 = vpop.permute.xlu1 %140 }
  0xad   :  { %v2524_v29 = vpop.permute.xlu0 %136 }
  0xae   :  { %564 = vperm.xlu1 %2115, %v2406_v6  }
  0xaf   :  { %694 = vperm.xlu0 %2120, %v2406_v6  }
  0xb1   :  { %v2532_v31 = vpop.permute.xlu0 %142 }
  0xb2   :  { %599 = vrot.lane.b32.xlu1 %v4293_v4, %s2298_s19 }
  0xb3   :  { %2117 = vset.pattern.permute.xlu1 %v2303_v26  ;;  %717 = vrot.lane.b32.xlu0 %v2394_v0, %s2304_s21 }
  0xb4   :  { %2122 = vset.pattern.permute.xlu0 %v2305_v27  ;;  %v2673_v27 = vadd.s32 256, %v2664_v21 }
  0xb6   :  { %601 = vrot.lane.b32.xlu1 %v2402_v5, %s2298_s19  ;;  %4404 = vst [vmem:[#allocation37_spill] sm:$0xff] %v2673_v27  ;;  %v4299_v18 = vshra.s32 %v2673_v27, 6 }
  0xb7   :  { %721 = vrot.lane.b32.xlu0 %v2410_v7, %s2304_s21 }
  0xb8   :  { %vm2715_vm0 = vcmp.ge.s32.totalorder %v4299_v18, 1  ;;  %v67_v18 = vand.u32 7, %v2664_v21 }
  0xba   :  { %605 = vrot.lane.b32.xlu1 %v2398_v1, %s2298_s19  ;;  %vm2786_vm13 = vcmp.ge.s32.totalorder %v67_v18, 1 }
  0xbb   :  { %749 = vperm.xlu0 %2122, %v2406_v6  }
  0xbd   :  { %v2529_v30 = vpop.permute.xlu1 %159 }
  0xbe   :  { %4384 = vst [vmem:[#allocation17_spill] sm:$0xff] %v2529_v30  ;;  %623 = vperm.xlu1 %2117, %v2406_v6  }
  0xbf   :  { %776 = vrot.lane.b32.xlu0 %v2394_v0, %s2306_s22 }
  0xc0   :  { %2124 = vset.pattern.permute.xlu0 %v2307_v33 }
  0xc1   :  { %v2536_v32 = vpop.permute.xlu1 %2084 }
  0xc2   :  { %4385 = vst [vmem:[#allocation18_spill] sm:$0xff] %v2536_v32  ;;  %658 = vrot.lane.b32.xlu1 %v4293_v4, %s2301_s20  ;;  %v2540_v34 = vpop.permute.xlu0 %171 }
  0xc3   :  { %2119 = vset.pattern.permute.xlu1 %v2308_v35  ;;  %780 = vrot.lane.b32.xlu0 %v2410_v7, %s2306_s22 }
  0xc5   :  { %v2544_v36 = vpop.permute.xlu1 %192 }
  0xc6   :  { %660 = vrot.lane.b32.xlu1 %v2402_v5, %s2301_s20  ;;  %v2548_v37 = vpop.permute.xlu0 %194 }
  0xc7   :  { %808 = vperm.xlu0 %2124, %v2406_v6  }
  0xc9   :  { %v2551_v38 = vpop.permute.xlu1 %196 }
  0xca   :  { %664 = vrot.lane.b32.xlu1 %v2398_v1, %s2301_s20  ;;  %v2555_v39 = vpop.permute.xlu0 %198 }
  0xcb   :  { %831 = vrot.lane.b32.xlu0 %v2394_v0, %s2309_s23 }
  0xcc   :  { %2126 = vset.pattern.permute.xlu0 %v2310_v41  ;;  %v2324_v41 = vmov 37  }
  0xcd   :  { %v2559_v40 = vpop.permute.xlu1 %214 }
  0xce   :  { %4386 = vst [vmem:[#allocation19_spill] sm:$0xff] %v2559_v40  ;;  %682 = vperm.xlu1 %2119, %v2406_v6   ;;  %v2562_v42 = vpop.permute.xlu0 %226 }
  0xcf   :  { %835 = vrot.lane.b32.xlu0 %v2410_v7, %s2309_s23 }
  0xd1   :  { %v2566_v43 = vpop.permute.xlu1 %2091 }
  0xd2   :  { %4387 = vst [vmem:[#allocation20_spill] sm:$0xff] %v2566_v43  ;;  %713 = vrot.lane.b32.xlu1 %v4293_v4, %s2304_s21  ;;  %v2570_v44 = vpop.permute.xlu0 %253 }
  0xd3   :  { %2121 = vset.pattern.permute.xlu1 %v2311_v45  ;;  %863 = vperm.xlu0 %2126, %v2406_v6   ;;  %v2325_v45 = vmov 28  }
  0xd5   :  { %v2573_v46 = vpop.permute.xlu1 %251 }
  0xd6   :  { %715 = vrot.lane.b32.xlu1 %v2402_v5, %s2304_s21  ;;  %v2577_v47 = vpop.permute.xlu0 %257 }
  0xd7   :  { %916 = vrot.lane.b32.xlu0 %v2402_v5, %s2312_s24 }
  0xd8   :  { %2130 = vset.pattern.permute.xlu0 %v2313_v49  ;;  %v73_v49 = vshra.s32 %v2673_v27, 3 }
  0xd9   :  { %v2581_v48 = vpop.permute.xlu1 %255 }
  0xda   :  { %719 = vrot.lane.b32.xlu1 %v2398_v1, %s2304_s21  ;;  %v2585_v50 = vpop.permute.xlu0 %285 }
  0xdb   :  { %920 = vrot.lane.b32.xlu0 %v2398_v1, %s2312_s24 }
  0xdd   :  { %v2589_v51 = vpop.permute.xlu1 %273 }
  0xde   :  { %4388 = vst [vmem:[#allocation21_spill] sm:$0xff] %v2589_v51  ;;  %737 = vperm.xlu1 %2121, %v2406_v6   ;;  %v2592_v52 = vpop.permute.xlu0 %312 }
  0xdf   :  { %924 = vrot.lane.b32.xlu0 %v4293_v4, %s2312_s24 }
  0xe1   :  { %v2596_v53 = vpop.permute.xlu1 %2098 }
  0xe2   :  { %4389 = vst [vmem:[#allocation22_spill] sm:$0xff] %v2596_v53  ;;  %772 = vrot.lane.b32.xlu1 %v4293_v4, %s2306_s22  ;;  %v2600_v54 = vpop.permute.xlu0 %316 }
  0xe3   :  { %2123 = vset.pattern.permute.xlu1 %v2314_v55  ;;  %952 = vperm.xlu0 %2130, %v2406_v6   ;;  %v2685_v55 = vadd.s32 128, %v2664_v21 }
  0xe5   :  { %v2603_v56 = vpop.permute.xlu1 %310  ;;  %4407 = vst [vmem:[#allocation40_spill] sm:$0xff] %v2685_v55 }
  0xe6   :  { %774 = vrot.lane.b32.xlu1 %v2402_v5, %s2306_s22  ;;  %v2607_v57 = vpop.permute.xlu0 %344 }
  0xe7   :  { %979 = vrot.lane.b32.xlu0 %v2398_v1, %s2315_s25 }
  0xe8   :  { %2132 = vset.pattern.permute.xlu0 %v2316_v59 }
  0xe9   :  { %v2611_v58 = vpop.permute.xlu1 %314 }
  0xea   :  { %778 = vrot.lane.b32.xlu1 %v2398_v1, %s2306_s22  ;;  %v2615_v60 = vpop.permute.xlu0 %367 }
  0xeb   :  { %983 = vrot.lane.b32.xlu0 %v4293_v4, %s2315_s25 }
  0xed   :  { %v2619_v61 = vpop.permute.xlu1 %332 }
  0xee   :  { %4390 = vst [vmem:[#allocation23_spill] sm:$0xff] %v2619_v61  ;;  %796 = vperm.xlu1 %2123, %v2406_v6   ;;  %v2622_v62 = vpop.permute.xlu0 %371  ;;  %v2086_v61 = vunpack.i.l.bf16 %v2536_v32 }
  0xef   :  { %4391 = vst [vmem:[#allocation24_spill] sm:$0xff] %v2622_v62  ;;  %1011 = vperm.xlu0 %2132, %v2406_v6  }
  0xf1   :  { %v2625_v63 = vpop.permute.xlu1 %2105 }
  0xf2   :  { %4392 = vst [vmem:[#allocation25_spill] sm:$0xff] %v2625_v63  ;;  %827 = vrot.lane.b32.xlu1 %v4293_v4, %s2309_s23  ;;  %v2629_v2 = vpop.permute.xlu0 %399 }
  0xf3   :  { %4393 = vst [vmem:[#allocation26_spill] sm:$0xff] %v2629_v2  ;;  %2125 = vset.pattern.permute.xlu1 %v2317_v3  ;;  %1034 = vrot.lane.b32.xlu0 %v2398_v1, %s2318_s26  ;;  %v2690_v3 = vadd.s32 384, %v2664_v21  ;;  %v146_v2 = vsel %vm4329_vm12, %v2524_v29, %v2512_v24 }
  0xf4   :  { %2134 = vset.pattern.permute.xlu0 %v2319_v9  ;;  %v71_v9 = vshra.s32 %v2664_v21, 3 }
  0xf5   :  { %v2633_v8 = vpop.permute.xlu1 %365  ;;  %4409 = vst [vmem:[#allocation42_spill] sm:$0xff] %v2690_v3 }
  0xf6   :  { %829 = vrot.lane.b32.xlu1 %v2402_v5, %s2309_s23  ;;  %v2637_v10 = vpop.permute.xlu0 %426 }
  0xf7   :  { %4394 = vst [vmem:[#allocation27_spill] sm:$0xff] %v2637_v10  ;;  %1038 = vrot.lane.b32.xlu0 %v4293_v4, %s2318_s26  ;;  %v147_v10 = vsel %vm4329_vm12, %v2512_v24, %v2522_v28 }
  0xf9   :  { %v2641_v11 = vpop.permute.xlu1 %369 }
  0xfa   :  { %833 = vrot.lane.b32.xlu1 %v2398_v1, %s2309_s23  ;;  %v2645_v12 = vpop.permute.xlu0 %430 }
  0xfb   :  { %4395 = vst [vmem:[#allocation28_spill] sm:$0xff] %v2645_v12  ;;  %1066 = vperm.xlu0 %2134, %v2406_v6   ;;  %v4440_v12 = vmov 0 }
  0xfd   :  { %v2648_v13 = vpop.permute.xlu1 %387 }
  0xfe   :  { %4396 = vst [vmem:[#allocation29_spill] sm:$0xff] %v2648_v13  ;;  %851 = vperm.xlu1 %2125, %v2406_v6   ;;  %v2651_v14 = vpop.permute.xlu0 %458  ;;  %v2329_v13 = vmov 45  }
  0xff   :  { %4397 = vst [vmem:[#allocation30_spill] sm:$0xff] %v2651_v14  ;;  %1093 = vrot.lane.b32.xlu0 %v2398_v1, %s2320_s27 }
 0x100   :  { %2136 = vset.pattern.permute.xlu0 %v2321_v16 }
 0x101   :  { %v2655_v15 = vpop.permute.xlu1 %422 }
 0x102   :  { %4398 = vst [vmem:[#allocation31_spill] sm:$0xff] %v2655_v15  ;;  %2127 = vset.pattern.permute.xlu1 %v2322_v17  ;;  %v2658_v19 = vpop.permute.xlu0 %489  ;;  %v2698_v17 = vand.u32 7, %v73_v49  ;;  %v69_v49 = vand.u32 7, %v2673_v27  ;;  %v4416_v27 = vshra.s32 %v2664_v21, 6  ;;  %v68_v21 = vand.u32 7, %v2685_v55 }
 0x103   :  { %875 = vperm.xlu1 %2127, %v2406_v6   ;;  %4399 = vst [vmem:[#allocation32_spill] sm:$0xff] %v2658_v19  ;;  %1097 = vrot.lane.b32.xlu0 %v4293_v4, %s2320_s27  ;;  %v2326_v4 = vmov 40   ;;  %v4417_v19 = vmov 0  ;;  %v4445_v15 = vmov 0 }
 0x104   :  { %vm4311_vm1 = vcmp.ge.s32.totalorder %v2698_v17, 1  ;;  %vm2733_vm2 = vcmp.ge.s32.totalorder %v4416_v27, 1  ;;  %vm2740_vm4 = vcmp.ge.s32.totalorder %v69_v49, 1  ;;  %vm2792_vm14 = vcmp.ge.s32.totalorder %v68_v21, 1 }
 0x105   :  { %v2662_v20 = vpop.permute.xlu1 %424  ;;  %v4418_v19 = vsel %vm2733_vm2, 4294967295, %v4417_v19  ;;  %vm2748_vm5 = vmand %vm2715_vm0, %vm4311_vm1  ;;  %vm2835_vm11 = vcmp.le.s32.totalorder %v68_v21, 6 }
 0x106   :  { %4400 = vst [vmem:[#allocation33_spill] sm:$0xff] %v2662_v20  ;;  %v2666_v23 = vpop.permute.xlu0 %493 }
 0x107   :  { %2128 = vset.pattern.permute.xlu1 %v2323_v22  ;;  %4402 = vst [vmem:[#allocation35_spill] sm:$0xff] %v2666_v23  ;;  %1125 = vperm.xlu0 %2136, %v2406_v6   ;;  %v72_v22 = vshra.s32 %v2685_v55, 3  ;;  %v4420_v23 = vmov 0 }
 0x108   :  { %887 = vperm.xlu1 %2128, %v2406_v6   ;;  %v4421_v23 = vsel %vm2740_vm4, 4294967295, %v4420_v23 }
 0x109   :  { %v2670_v26 = vpop.permute.xlu1 %428  ;;  %v2720_v14 = vand.u32 7, %v72_v22 }
 0x10a   :  { %4403 = vst [vmem:[#allocation36_spill] sm:$0xff] %v2670_v26  ;;  %v2675_v33 = vpop.permute.xlu0 %521 }
 0x10b   :  { %4405 = vst [vmem:[#allocation38_spill] sm:$0xff] %v2675_v33  ;;  %1156 = vrot.lane.b32.xlu0 %v2398_v1, %s2274_s1  ;;  %vm4316_vm7 = vcmp.ge.s32.totalorder %v2720_v14, 1 }
 0x10c   :  { %918 = vrot.lane.b32.xlu1 %v2394_v0, %s2312_s24  ;;  %2138 = vset.pattern.permute.xlu0 %v2324_v41 }
 0x10d   :  { %v2681_v35 = vpop.permute.xlu1 %446  ;;  %2129 = vset.pattern.permute.xlu1 %v2325_v45  ;;  %v74_v45 = vshra.s32 %v2690_v3, 3 }
 0x10e   :  { %4406 = vst [vmem:[#allocation39_spill] sm:$0xff] %v2681_v35  ;;  %v2687_v59 = vpop.permute.xlu0 %544 }
 0x10f   :  { %4408 = vst [vmem:[#allocation41_spill] sm:$0xff] %v2687_v59  ;;  %1187 = vperm.xlu0 %2138, %v2406_v6   ;;  %v2706_v59 = vand.u32 7, %v71_v9  ;;  %v2725_v33 = vand.u32 7, %v74_v45  ;;  %v2328_v45 = vmov 30  }
 0x110   :  { %922 = vrot.lane.b32.xlu1 %v2410_v7, %s2312_s24 }
 0x111   :  { %v2696_v16 = vpop.permute.xlu1 %485  ;;  %vm4310_vm3 = vcmp.ge.s32.totalorder %v2706_v59, 1  ;;  %vm4319_vm10 = vcmp.ge.s32.totalorder %v2725_v33, 1 }
 0x112   :  { %4410 = vst [vmem:[#allocation43_spill] sm:$0xff] %v2696_v16  ;;  %v2702_v41 = vpop.permute.xlu0 %548  ;;  %vm2768_vm8 = vmand %vm2733_vm2, %vm4310_vm3  ;;  %vm4457_vm2 = vcmask 588800  }
 0x113   :  { %4411 = vst [vmem:[#allocation44_spill] sm:$0xff] %v2702_v41  ;;  %2141 = vset.pattern.permute.xlu0 %v2326_v4  ;;  %v4413_v41 = vmov 0  ;;  %v2327_v4 = vmov 42  }
 0x114   :  { %940 = vperm.xlu1 %2129, %v2406_v6   ;;  %1287 = vperm.xlu0 %2141, %v2406_v6   ;;  %v4414_v41 = vsel %vm2715_vm0, 4294967295, %v4413_v41 }
 0x115   :  { %v2709_v35 = vpop.permute.xlu1 %487 }
 0x116   :  { %4412 = vst [vmem:[#allocation45_spill] sm:$0xff] %v2709_v35  ;;  %v2723_v9 = vpop.permute.xlu0 %576  ;;  %v4433_v35 = vmov 0 }
 0x117   :  { %4415 = vst [vmem:[#allocation46_spill] sm:$0xff] %v2723_v9  ;;  %v70_v9 = vand.u32 7, %v2690_v3  ;;  %v4434_v35 = vsel %vm2786_vm13, 4294967295, %v4433_v35 }
 0x118   :  { %975 = vrot.lane.b32.xlu1 %v2402_v5, %s2315_s25  ;;  %2143 = vset.pattern.permute.xlu0 %v2327_v4  ;;  %v4424_v4 = vshra.s32 %v2685_v55, 6  ;;  %v4430_v55 = vshra.s32 %v2690_v3, 6  ;;  %v4436_v3 = vmov 0 }
 0x119   :  { %v2738_v22 = vpop.permute.xlu1 %491  ;;  %2131 = vset.pattern.permute.xlu1 %v2328_v45  ;;  %1345 = vperm.xlu0 %2143, %v2406_v6   ;;  %v4425_v45 = vmov 0  ;;  %v4437_v3 = vsel %vm2792_vm14, 4294967295, %v4436_v3  ;;  %vm2806_vm3 = vcmp.ge.s32.totalorder %v70_v9, 1  ;;  %vm2827_vm0 = vcmp.le.s32.totalorder %v70_v9, 6 }
 0x11a   :  { %4419 = vst [vmem:[#allocation47_spill] sm:$0xff] %v2738_v22  ;;  %vm2756_vm6 = vcmp.ge.s32.totalorder %v4424_v4, 1  ;;  %v2762_v22 = vpop.permute.xlu0 %603  ;;  %vm2774_vm9 = vcmp.ge.s32.totalorder %v4430_v55, 1  ;;  %v4431_v4 = vmov 0  ;;  %v4441_v12 = vsel %vm2806_vm3, 4294967295, %v4440_v12 }
 0x11b   :  { %v4426_v45 = vsel %vm2756_vm6, 4294967295, %v4425_v45  ;;  %4427 = vst [vmem:[#allocation48_spill] sm:$0xff] %v2762_v22  ;;  %v4432_v4 = vsel %vm2774_vm9, 4294967295, %v4431_v4  ;;  %v2079_v22 = vunpack.i.l.bf16 %v2514_v25  ;;  %vm2800_vm15 = vmand %vm2756_vm6, %vm4316_vm7  ;;  %v4446_v15 = vsel %vm2827_vm0, 4294967295, %v4445_v15 }
 0x11c   :  { %977 = vrot.lane.b32.xlu1 %v2394_v0, %s2315_s25  ;;  %vm2814_vm1 = vmand %vm2774_vm9, %vm4319_vm10  ;;  %vm2831_vm10 = vcmp.le.s32.totalorder %v67_v18, 6  ;;  %vm4451_vm9 = vcmask 588800  }
 0x11d   :  { %v2790_v55 = vpop.permute.xlu1 %509  ;;  %1208 = vrot.lane.b32.xlu0 %v2394_v0, %s2278_s2  ;;  %v202_v18 = vsel %vm4451_vm9, %v2544_v36, %v2548_v37  ;;  %vm4452_vm6 = vmmov %vm4451_vm9  ;;  %vm2866_vm9 = vcmp.le.s32.totalorder %v69_v49, 6 }
 0x11e   :  { %4435 = vst [vmem:[#allocation49_spill] sm:$0xff] %v2790_v55  ;;  %v2818_v26 = vpop.permute.xlu0 %607  ;;  %2146 = vset.pattern.permute.xlu0 %v2329_v13  ;;  %v145_v13 = vsel %vm4329_vm12, %v2079_v22, %v2524_v29  ;;  %v204_v21 = vsel %vm4452_vm6, %v2551_v38, %v2555_v39  ;;  %vm120_vm7 = vmand %vm2814_vm1, %vm2806_vm3  ;;  %v148_v22 = vsel %vm4329_vm12, %v2522_v28, %v2532_v31  ;;  %v4454_v39 = vmov 0 }
 0x11f   :  { %4444 = vst [vmem:[#allocation50_spill] sm:$0xff] %v2818_v26  ;;  %v4449_v26 = vmov 0  ;;  %v4455_v39 = vsel %vm2866_vm9, 4294967295, %v4454_v39  ;;  %vm4456_vm6 = vmand %vm2748_vm5, %vm2740_vm4  ;;  %v203_v29 = vsel %vm4457_vm2, %v2548_v37, %v2551_v38  ;;  %v212_v32 = vsel %vm2814_vm1, %v204_v21, 0.0 }
 0x120   :  { %v4450_v26 = vsel %vm2835_vm11, 4294967295, %v4449_v26  ;;  %981 = vrot.lane.b32.xlu1 %v2410_v7, %s2315_s25  ;;  %v155_v24 = vsel %vm4456_vm6, %v147_v10, 0.0  ;;  %vm4459_vm3 = vmand %vm2768_vm8, %vm2786_vm13  ;;  %v210_v10 = vsel %vm2800_vm15, %v202_v18, 0.0  ;;  %v156_v38 = vsel %vm120_vm7, %v148_v22, 0.0 }
 0x121   :  { %v2853_v9 = vpop.permute.xlu1 %540  ;;  %1212 = vrot.lane.b32.xlu0 %v2410_v7, %s2278_s2  ;;  %v2887_v31 = vsel %vm4459_vm3, %v145_v13, 0.0  ;;  %vm4461_vm9 = vmmov %vm4457_vm2  ;;  %v218_v13 = vmul.f32 %v2559_v40, %v210_v10  ;;  %v165_v18 = vmul.f32 %v2529_v30, %v156_v38  ;;  %v211_v21 = vsel %vm2748_vm5, %v203_v29, 0.0 }
 0x122   :  { %4453 = vst [vmem:[#allocation51_spill] sm:$0xff] %v2853_v9  ;;  %v2880_v28 = vpop.permute.xlu0 %635  ;;  %4460 = vst [vmem:[#allocation53_spill] sm:$0xff] %v2887_v31  ;;  %v201_v49 = vsel %vm4461_vm9, %v2086_v61, %v2544_v36  ;;  %v164_v61 = vmul.f32 %v2529_v30, %v155_v24  ;;  %v220_v22 = vmul.f32 %v2559_v40, %v212_v32  ;;  %vm4469_vm12 = vnez %v4455_v39 }
 0x123   :  { %4458 = vst [vmem:[#allocation52_spill] sm:$0xff] %v2880_v28  ;;  %vm4462_vm2 = vmand %vm2800_vm15, %vm2792_vm14  ;;  %v2912_v9 = vsel %vm2768_vm8, %v201_v49, 0.0  ;;  %v2093_v49 = vunpack.i.l.bf16 %v2566_v43 }
 0x124   :  { %999 = vperm.xlu1 %2131, %v2406_v6   ;;  %v154_v37 = vsel %vm4462_vm2, %v146_v2, 0.0  ;;  %4464 = vst [vmem:[#allocation55_spill] sm:$0xff] %v2912_v9  ;;  %v219_v2 = vmul.f32 %v2559_v40, %v211_v21  ;;  %v176_v40 = vmul.f32 %v2540_v34, %v155_v24  ;;  %vm4467_vm2 = vcmask 580608   ;;  %vm4474_vm7 = vmand %vm2800_vm15, %vm2835_vm11 }
 0x125   :  { %v2902_v28 = vpop.permute.xlu1 %542  ;;  %v163_v36 = vmul.f32 %v2529_v30, %v154_v37  ;;  %1411 = vperm.xlu0 %2146, %v2406_v6   ;;  %v174_v30 = vmul.f32 %v2540_v34, %v2887_v31  ;;  %v175_v29 = vmul.f32 %v2540_v34, %v154_v37  ;;  %v177_v31 = vmul.f32 %v2540_v34, %v156_v38  ;;  %vm4468_vm9 = vmmov %vm4467_vm2 }
 0x126   :  { %4463 = vst [vmem:[#allocation54_spill] sm:$0xff] %v2902_v28  ;;  %v229_v28 = vmul.f32 %v2562_v42, %v2912_v9  ;;  %v2942_v43 = vpop.permute.xlu0 %662  ;;  %v2330_v9 = vmov 32   ;;  %v261_v34 = vsel %vm4468_vm9, %v2573_v46, %v2570_v44  ;;  %vm4470_vm6 = vmmov %vm4467_vm2  ;;  %v2961_v38 = vadd.f32 %v219_v2, %v164_v61 }
 0x127   :  { %v2934_v62 = vadd.f32 %v218_v13, %v163_v36  ;;  %4466 = vst [vmem:[#allocation57_spill] sm:$0xff] %v2942_v43  ;;  %v262_v24 = vsel %vm4470_vm6, %v2570_v44, %v2581_v48  ;;  %vm4471_vm3 = vmmov %vm4467_vm2  ;;  %v2963_v13 = vadd.f32 %v220_v22, %v165_v18  ;;  %v231_v36 = vmul.f32 %v2562_v42, %v211_v21 }
 0x128   :  { %1030 = vrot.lane.b32.xlu1 %v2402_v5, %s2318_s26  ;;  %v260_v5 = vsel %vm4467_vm2, %v2093_v49, %v2573_v46  ;;  %v230_v46 = vmul.f32 %v2562_v42, %v210_v10  ;;  %v2331_v49 = vmov 46   ;;  %v233_v44 = vadd.f32 %v229_v28, %v174_v30  ;;  %vm4473_vm2 = vmand %vm2768_vm8, %vm2831_vm10 }
 0x129   :  { %v2940_v37 = vpop.permute.xlu1 %546  ;;  %2133 = vset.pattern.permute.xlu1 %v2330_v9  ;;  %v263_v9 = vsel %vm4471_vm3, %v2581_v48, %v2577_v47  ;;  %1268 = vrot.lane.b32.xlu0 %v2398_v1, %s2281_s13  ;;  %v2100_v43 = vunpack.i.l.bf16 %v2596_v53  ;;  %vm4472_vm3 = vnez %v4418_v19  ;;  %v2981_v47 = vsel %vm4473_vm2, %v260_v5, 0.0  ;;  %vm4475_vm6 = vmand %vm2748_vm5, %vm4469_vm12 }
 0x12a   :  { %4465 = vst [vmem:[#allocation56_spill] sm:$0xff] %v2940_v37  ;;  %2147 = vset.pattern.permute.xlu0 %v2331_v49  ;;  %v232_v37 = vmul.f32 %v2562_v42, %v212_v32  ;;  %v269_v30 = vsel %vm4474_vm7, %v261_v34, 0.0  ;;  %v270_v32 = vsel %vm4475_vm6, %v262_v24, 0.0  ;;  %vm4476_vm9 = vmand %vm2814_vm1, %vm2827_vm0  ;;  %vm4477_vm8 = vnez %v4426_v45  ;;  %v3028_v10 = vpop.permute.xlu0 %666 }
 0x12b   :  { %v271_v42 = vsel %vm4476_vm9, %v263_v9, 0.0  ;;  %v288_v25 = vmul.f32 %v2585_v50, %v2981_v47  ;;  %v289_v48 = vmul.f32 %v2585_v50, %v269_v30  ;;  %vm4479_vm5 = vcmask 531456  }
 0x12c   :  { %1032 = vrot.lane.b32.xlu1 %v2394_v0, %s2318_s26  ;;  %v319_v16 = vsel %vm4479_vm5, %v2100_v43, %v2603_v56  ;;  %vm4480_vm15 = vmmov %vm4479_vm5  ;;  %vm4481_vm1 = vnez %v4414_v41  ;;  %v234_v55 = vadd.f32 %v230_v46, %v175_v29  ;;  %v235_v28 = vadd.f32 %v231_v36, %v176_v40  ;;  %v4535_v41 = vld [vmem:[#allocation35_spill] sm:$0xff] }
 0x12d   :  { %v3002_v5 = vpop.permute.xlu1 %564  ;;  %v320_v27 = vsel %vm4480_vm15, %v2603_v56, %v2592_v52  ;;  %1457 = vperm.xlu0 %2147, %v2406_v6   ;;  %vm4482_vm6 = vnez %v4441_v12  ;;  %vm4483_vm2 = vnez %v4432_v4  ;;  %vm4484_vm0 = vmmov %vm4480_vm15  ;;  %v236_v61 = vadd.f32 %v232_v37, %v177_v31 }
 0x12e   :  { %4478 = vst [vmem:[#allocation58_spill] sm:$0xff] %v3002_v5  ;;  %vm299_vm5 = vmand %vm4483_vm2, %vm4482_vm6  ;;  %v321_v43 = vsel %vm4484_vm0, %v2592_v52, %v2611_v58  ;;  %v290_v18 = vmul.f32 %v2585_v50, %v270_v32  ;;  %v291_v40 = vmul.f32 %v2585_v50, %v271_v42  ;;  %v292_v50 = vadd.f32 %v288_v25, %v233_v44 }
 0x12f   :  { %vm4485_vm15 = vmmov %vm4484_vm0  ;;  %v293_v21 = vadd.f32 %v289_v48, %v234_v55  ;;  %v277_v29 = vmul.f32 %v2589_v51, %v269_v30  ;;  %v278_v37 = vmul.f32 %v2589_v51, %v270_v32  ;;  %v2332_v9 = vmov 49   ;;  %v3091_v48 = vpop.permute.xlu0 %694 }
 0x130   :  { %v322_v56 = vsel %vm4485_vm15, %v2611_v58, %v2600_v54  ;;  %1036 = vrot.lane.b32.xlu1 %v2410_v7, %s2318_s26  ;;  %vm4486_vm0 = vmand %vm4472_vm3, %vm2786_vm13  ;;  %v2107_v58 = vunpack.i.l.bf16 %v2625_v63  ;;  %v279_v46 = vmul.f32 %v2589_v51, %v271_v42  ;;  %v294_v44 = vadd.f32 %v290_v18, %v235_v28  ;;  %v4492_v42 = vld [vmem:[#allocation24_spill] sm:$0xff] }
 0x131   :  { %v3040_v52 = vsel %vm4486_vm0, %v319_v16, 0.0  ;;  %vm4488_vm15 = vmand %vm4477_vm8, %vm2792_vm14  ;;  %v3049_v31 = vpop.permute.xlu1 %599  ;;  %v330_v22 = vsel %vm299_vm5, %v322_v56, 0.0  ;;  %1324 = vrot.lane.b32.xlu0 %v2394_v0, %s2284_s14  ;;  %v281_v28 = vadd.f32 %v277_v29, %v2934_v62  ;;  %v295_v56 = vadd.f32 %v291_v40, %v236_v61 }
 0x132   :  { %4487 = vst [vmem:[#allocation59_spill] sm:$0xff] %v3040_v52  ;;  %v328_v54 = vsel %vm4488_vm15, %v320_v27, 0.0  ;;  %vm4489_vm0 = vmand %vm4481_vm1, %vm2740_vm4  ;;  %vm4490_vm15 = vcmask 523264   ;;  %2150 = vset.pattern.permute.xlu0 %v2332_v9  ;;  %v347_v36 = vmul.f32 %v2607_v57, %v3040_v52  ;;  %v350_v30 = vmul.f32 %v2607_v57, %v330_v22  ;;  %v4494_v27 = vld [vmem:[#allocation23_spill] sm:$0xff] }
 0x133   :  { %v329_v2 = vsel %vm4489_vm0, %v321_v43, 0.0  ;;  %v374_v34 = vsel %vm4490_vm15, %v2107_v58, %v2633_v8  ;;  %vm4491_vm7 = vmmov %vm4490_vm15  ;;  %v348_v49 = vmul.f32 %v2607_v57, %v328_v54  ;;  %v336_v55 = vmul.f32 %v4494_v27, %v328_v54 }
 0x134   :  { %v375_v24 = vsel %vm4491_vm7, %v2633_v8, %v2615_v60  ;;  %1054 = vperm.xlu1 %2133, %v2406_v6   ;;  %v349_v8 = vmul.f32 %v2607_v57, %v329_v2  ;;  %v376_v32 = vsel %vm4491_vm7, %v2615_v60, %v2641_v11  ;;  %vm4493_vm15 = vmmov %vm4491_vm7  ;;  %v337_v57 = vmul.f32 %v4494_v27, %v329_v2 }
 0x135   :  { %v377_v25 = vsel %vm4493_vm15, %v2641_v11, %v4492_v42  ;;  %v3093_v16 = vpop.permute.xlu1 %601  ;;  %v3099_v60 = vsel %vm4472_vm3, %v374_v34, 0.0  ;;  %v383_v11 = vsel %vm4477_vm8, %v375_v24, 0.0  ;;  %1328 = vrot.lane.b32.xlu0 %v2410_v7, %s2284_s14  ;;  %v282_v43 = vadd.f32 %v278_v37, %v2961_v38  ;;  %v4500_v38 = vld [vmem:[#allocation15_spill] sm:$0xff] }
 0x136   :  { %4495 = vst [vmem:[#allocation24_spill] sm:$0xff] %v3099_v60  ;;  %vm4496_vm15 = vcmp.le.s32.totalorder %v2706_v59, 6  ;;  %v4497_v18 = vmov 0  ;;  %v283_v54 = vadd.f32 %v279_v46, %v2963_v13  ;;  %v351_v58 = vadd.f32 %v347_v36, %v292_v50  ;;  %v4501_v13 = vld [vmem:[#allocation26_spill] sm:$0xff]  ;;  %v4506_v42 = vld [vmem:[#allocation31_spill] sm:$0xff] }
 0x137   :  { %vm3115_vm0 = vmand %vm4472_vm3, %vm4496_vm15  ;;  %v384_v2 = vsel %vm4481_vm1, %v376_v32, 0.0  ;;  %v385_v62 = vsel %vm4483_vm2, %v377_v25, 0.0  ;;  %v352_v61 = vadd.f32 %v348_v49, %v293_v21  ;;  %v338_v40 = vmul.f32 %v4494_v27, %v330_v22  ;;  %v4505_v32 = vld [vmem:[#allocation33_spill] sm:$0xff] }
 0x138   :  { %v4498_v18 = vsel %vm3115_vm0, 4294967295, %v4497_v18  ;;  %1089 = vrot.lane.b32.xlu1 %v4500_v38, %s2320_s27  ;;  %v402_v50 = vmul.f32 %v4501_v13, %v3099_v60  ;;  %v403_v29 = vmul.f32 %v4501_v13, %v383_v11  ;;  %vm4502_vm15 = vcmp.le.s32.totalorder %v2720_v14, 6  ;;  %v4508_v38 = vld [vmem:[#allocation27_spill] sm:$0xff]  ;;  %v3300_v27 = vld [vmem:[#allocation3 + $0x8] sm:$0xff] }
 0x139   :  { %vm3138_vm9 = vmand %vm4477_vm8, %vm4502_vm15  ;;  %v3142_v34 = vpop.permute.xlu1 %605  ;;  %v2333_v24 = vmov 34   ;;  %v353_v21 = vadd.f32 %v349_v8, %v294_v44  ;;  %v354_v9 = vadd.f32 %v350_v30, %v295_v56  ;;  %v340_v22 = vadd.f32 %v336_v55, %v281_v28  ;;  %1531 = vperm.xlu0 %2150, %v2406_v6   ;;  %v3165_v6 = vpop.permute.xlu0 %717  ;;  %v4513_v30 = vld [vmem:[#allocation29_spill] sm:$0xff] }
 0x13a   :  { %2135 = vset.pattern.permute.xlu1 %v2333_v24  ;;  %v341_v46 = vadd.f32 %v337_v57, %v282_v43  ;;  %v404_v36 = vmul.f32 %v4501_v13, %v384_v2  ;;  %v405_v49 = vmul.f32 %v4501_v13, %v385_v62  ;;  %vm4507_vm15 = vcmask 515072   ;;  %v4514_v57 = vld [vmem:[#allocation36_spill] sm:$0xff] }
 0x13b   :  { %v433_v25 = vsel %vm4507_vm15, %v4506_v42, %v4505_v32  ;;  %vm4509_vm6 = vmmov %vm4507_vm15  ;;  %vm4510_vm7 = vcmp.le.s32.totalorder %v2698_v17, 6  ;;  %v391_v55 = vmul.f32 %v4513_v30, %v383_v11  ;;  %v4516_v43 = vld [vmem:[#allocation28_spill] sm:$0xff]  ;;  %vm4517_vm0 = vcmp.le.s32.totalorder %v2725_v33, 6 }
 0x13c   :  { %v434_v44 = vsel %vm4509_vm6, %v4505_v32, %v4508_v38  ;;  %vm3161_vm12 = vmand %vm4481_vm1, %vm4510_vm7  ;;  %v436_v56 = vsel %vm4509_vm6, %v4514_v57, %v4516_v43  ;;  %1091 = vrot.lane.b32.xlu1 %v2394_v0, %s2320_s27  ;;  %v342_v11 = vadd.f32 %v338_v40, %v283_v54  ;;  %v392_v24 = vmul.f32 %v4513_v30, %v384_v2  ;;  %v4523_v54 = vld [vmem:[#allocation45_spill] sm:$0xff] }
 0x13d   :  { %vm4515_vm15 = vmmov %vm4509_vm6  ;;  %v406_v32 = vadd.f32 %v402_v50, %v351_v58  ;;  %v407_v42 = vadd.f32 %v403_v29, %v352_v61  ;;  %v4524_v58 = vld [vmem:[#allocation43_spill] sm:$0xff]  ;;  %vm4525_vm13 = vcmask 465920   ;;  %v4526_v61 = vld [vmem:[#allocation32_spill] sm:$0xff]  ;;  %1380 = vrot.lane.b32.xlu0 %v2398_v1, %s2287_s15  ;;  %v408_v4 = vadd.f32 %v404_v36, %v353_v21  ;;  %v3253_v21 = vpop.permute.xlu0 %721 }
 0x13e   :  { %v435_v28 = vsel %vm4515_vm15, %v4508_v38, %v4514_v57  ;;  %vm3178_vm7 = vmand %vm4483_vm2, %vm4517_vm0  ;;  %v3189_v38 = vpop.permute.xlu1 %623  ;;  %v496_v2 = vsel %vm4525_vm13, %v4524_v58, %v4523_v54  ;;  %v4533_v50 = vld [vmem:[#allocation47_spill] sm:$0xff]  ;;  %vm4534_vm15 = vcmask 465920   ;;  %v395_v43 = vadd.f32 %v391_v55, %v340_v22  ;;  %v3273_v55 = vld [vmem:[#allocation7] sm:$0xff] }
 0x13f   :  { %vm4520_vm0 = vmand %vm4472_vm3, %vm2831_vm10  ;;  %v498_v1 = vsel %vm4534_vm15, %v4526_v61, %v4533_v50 }
 0x140   :  { %v3196_v57 = vsel %vm4520_vm0, %v433_v25, 0.0  ;;  %vm4522_vm6 = vmand %vm4477_vm8, %vm2835_vm11  ;;  %vm4528_vm8 = vnez %v4455_v39  ;;  %v2334_v25 = vmov 50   ;;  %1095 = vrot.lane.b32.xlu1 %v2410_v7, %s2320_s27 }
 0x141   :  { %4521 = vst [vmem:[#allocation15_spill] sm:$0xff] %v3196_v57  ;;  %v442_v0 = vsel %vm4522_vm6, %v434_v44, 0.0  ;;  %vm4527_vm5 = vmmov %vm4525_vm13  ;;  %vm4530_vm13 = vnez %v4446_v15  ;;  %2151 = vset.pattern.permute.xlu0 %v2334_v25  ;;  %v409_v44 = vadd.f32 %v405_v49, %v354_v9 }
 0x142   :  { %v497_v40 = vsel %vm4527_vm5, %v4523_v54, %v4526_v61  ;;  %vm4529_vm0 = vmand %vm4481_vm1, %vm4528_vm8  ;;  %vm4532_vm5 = vnez %v4441_v12  ;;  %vm4538_vm1 = vnez %v4498_v18  ;;  %v3255_v7 = vpop.permute.xlu1 %658  ;;  %1573 = vperm.xlu0 %2151, %v3273_v55  }
 0x143   :  { %v443_v19 = vsel %vm4529_vm0, %v435_v28, 0.0  ;;  %vm4531_vm6 = vmand %vm4483_vm2, %vm4530_vm13  ;;  %v393_v28 = vmul.f32 %v4513_v30, %v385_v62  ;;  %v4552_v30 = vld [vmem:[#allocation57_spill] sm:$0xff]  ;;  %vm4570_vm2 = vcmask 449536  }
 0x144   :  { %v444_v45 = vsel %vm4531_vm6, %v436_v56, 0.0  ;;  %vm476_vm3 = vmand %vm3178_vm7, %vm4532_vm5  ;;  %v4537_v56 = vld [vmem:[#allocation30_spill] sm:$0xff]  ;;  %1113 = vperm.xlu1 %2135, %v3273_v55  }
 0x145   :  { %vm4536_vm11 = vmmov %vm4534_vm15  ;;  %v461_v54 = vmul.f32 %v4537_v56, %v3196_v57  ;;  %v462_v58 = vmul.f32 %v4537_v56, %v442_v0  ;;  %v463_v9 = vmul.f32 %v4537_v56, %v443_v19  ;;  %v464_v22 = vmul.f32 %v4537_v56, %v444_v45  ;;  %v4545_v56 = vld [vmem:[#allocation38_spill] sm:$0xff] }
 0x146   :  { %v499_v29 = vsel %vm4536_vm11, %v4533_v50, %v4535_v41  ;;  %vm4539_vm11 = vnez %v4434_v35  ;;  %vm4542_vm0 = vmand %vm3138_vm9, %vm2792_vm14  ;;  %1436 = vrot.lane.b32.xlu0 %v3300_v27, %s2290_s16 }
 0x147   :  { %vm4540_vm15 = vmand %vm4538_vm1, %vm4539_vm11  ;;  %v505_v62 = vsel %vm4542_vm0, %v497_v40, 0.0  ;;  %v3271_v49 = vsel %vm476_vm3, %v499_v29, 0.0  ;;  %v4544_v40 = vld [vmem:[#allocation39_spill] sm:$0xff]  ;;  %vm4546_vm3 = vcmp.ge.s32.totalorder %v2720_v14, 1  ;;  %v467_v29 = vadd.f32 %v463_v9, %v408_v4 }
 0x148   :  { %v3246_v61 = vsel %vm4540_vm15, %v496_v2, 0.0  ;;  %vm4543_vm6 = vmand %vm3161_vm12, %vm2740_vm4  ;;  %v396_v2 = vadd.f32 %v392_v24, %v341_v46  ;;  %v450_v50 = vmul.f32 %v4544_v40, %v442_v0  ;;  %v451_v41 = vmul.f32 %v4544_v40, %v443_v19 }
 0x149   :  { %4541 = vst [vmem:[#allocation26_spill] sm:$0xff] %v3246_v61  ;;  %v3264_v36 = vsel %vm4543_vm6, %v498_v1, 0.0  ;;  %v452_v25 = vmul.f32 %v4544_v40, %v444_v45  ;;  %v397_v1 = vadd.f32 %v393_v28, %v342_v11  ;;  %v524_v63 = vmul.f32 %v4545_v56, %v3246_v61  ;;  %vm3287_vm15 = vmand %vm4546_vm3, %vm2792_vm14  ;;  %v661_v45 = vpop.permute.xlu1 %660  ;;  %v4549_v61 = vld [vmem:[#allocation54_spill] sm:$0xff]  ;;  %v4550_v40 = vld [vmem:[#allocation51_spill] sm:$0xff] }
 0x14a   :  { %v525_v53 = vmul.f32 %v4545_v56, %v505_v62  ;;  %v465_v24 = vadd.f32 %v461_v54, %v406_v32  ;;  %v466_v0 = vadd.f32 %v462_v58, %v407_v42  ;;  %v526_v11 = vmul.f32 %v4545_v56, %v3264_v36  ;;  %v3308_v58 = vpop.permute.xlu0 %749 }
 0x14b   :  { %v527_v19 = vmul.f32 %v4545_v56, %v3271_v49  ;;  %v468_v28 = vadd.f32 %v464_v22, %v409_v44  ;;  %vm4551_vm0 = vcmask 457728   ;;  %vm4553_vm6 = vcmask 72704  }
 0x14c   :  { %v551_v57 = vsel %vm4551_vm0, %v4550_v40, %v4549_v61  ;;  %v670_v60 = vsel %vm4553_vm6, %v661_v45, %v4552_v30  ;;  %v454_v32 = vadd.f32 %v450_v50, %v395_v43  ;;  %v3304_v42 = vadd.f32 %v451_v41, %v396_v2  ;;  %v4557_v2 = vld [vmem:[#allocation41_spill] sm:$0xff]  ;;  %v3333_v50 = vld [vmem:[#allocation3] sm:$0xff] }
 0x14d   :  { %v3306_v54 = vadd.f32 %v452_v25, %v397_v1  ;;  %v3312_v4 = vsel %vm3287_vm15, %v670_v60, 0.0  ;;  %vm4554_vm3 = vcmp.ge.s32.totalorder %v2698_v17, 1  ;;  %v2335_v9 = vmov 52   ;;  %1152 = vrot.lane.b32.xlu1 %v3333_v50, %s2274_s1  ;;  %v4562_v41 = vld [vmem:[#allocation49_spill] sm:$0xff]  ;;  %v665_v56 = vpop.permute.xlu1 %664 }
 0x14e   :  { %vm3318_vm0 = vmand %vm4554_vm3, %vm2740_vm4  ;;  %2153 = vset.pattern.permute.xlu0 %v2335_v9  ;;  %v3322_v43 = vadd.f32 %v524_v63, %v465_v24  ;;  %v3324_v22 = vadd.f32 %v525_v53, %v466_v0  ;;  %vm4558_vm6 = vcmask 457728   ;;  %v3331_v60 = vmul.f32 %v3091_v48, %v3312_v4  ;;  %v4564_v24 = vld [vmem:[#allocation56_spill] sm:$0xff] }
 0x14f   :  { %v552_v40 = vsel %vm4558_vm6, %v4549_v61, %v4557_v2  ;;  %vm4559_vm15 = vcmp.ge.s32.totalorder %v2725_v33, 1  ;;  %v3345_v63 = vadd.f32 %v526_v11, %v467_v29  ;;  %v3347_v61 = vadd.f32 %v527_v19, %v468_v28  ;;  %v4565_v9 = vld [vmem:[#allocation44_spill] sm:$0xff]  ;;  %v3368_v19 = vld [vmem:[#allocation3 + $0x18] sm:$0xff] }
 0x150   :  { %vm3341_vm3 = vmand %vm4559_vm15, %vm4532_vm5  ;;  %v513_v25 = vmul.f32 %v4562_v41, %v505_v62  ;;  %v3352_v1 = vsel %vm4538_vm1, %v551_v57, 0.0  ;;  %v2336_v46 = vmov 36   ;;  %v553_v0 = vsel %vm4558_vm6, %v4557_v2, %v4564_v24  ;;  %1440 = vrot.lane.b32.xlu0 %v3368_v19, %s2290_s16  ;;  %v4571_v2 = vld [vmem:[#allocation48_spill] sm:$0xff] }
 0x151   :  { %4563 = vst [vmem:[#allocation33_spill] sm:$0xff] %v3352_v1  ;;  %2137 = vset.pattern.permute.xlu1 %v2336_v46  ;;  %vm4566_vm15 = vmmov %vm4558_vm6  ;;  %vm4567_vm5 = vcmask 72704   ;;  %v560_v29 = vsel %vm3138_vm9, %v552_v40, 0.0  ;;  %vm4569_vm6 = vnez %v4450_v26 }
 0x152   :  { %v554_v11 = vsel %vm4566_vm15, %v4564_v24, %v4565_v9  ;;  %v671_v57 = vsel %vm4567_vm5, %v4552_v30, %v665_v56  ;;  %vm4568_vm4 = vmmov %vm4567_vm5  ;;  %v610_v30 = vsel %vm4570_vm2, %v3049_v31, %v3093_v16  ;;  %v612_v31 = vsel %vm4570_vm2, %v4571_v2, %v3142_v34  ;;  %1154 = vrot.lane.b32.xlu1 %v3300_v27, %s2274_s1  ;;  %v4573_v24 = vld [vmem:[#allocation50_spill] sm:$0xff] }
 0x153   :  { %v672_v62 = vsel %vm4568_vm4, %v665_v56, %v3028_v10  ;;  %v3383_v10 = vsel %vm3318_vm0, %v671_v57, 0.0  ;;  %vm4572_vm5 = vmmov %vm4570_vm2  ;;  %v561_v56 = vsel %vm3161_vm12, %v553_v0, 0.0  ;;  %v562_v46 = vsel %vm3178_vm7, %v554_v11, 0.0  ;;  %v3422_v57 = vpop.permute.xlu0 %776 }
 0x154   :  { %v3387_v28 = vsel %vm3341_vm3, %v672_v62, 0.0  ;;  %v611_v40 = vsel %vm4572_vm5, %v3093_v16, %v4571_v2  ;;  %vm589_vm15 = vmand %vm3161_vm12, %vm4528_vm8  ;;  %v3401_v44 = vmul.f32 %v3091_v48, %v3383_v10  ;;  %v514_v16 = vmul.f32 %v4562_v41, %v3264_v36  ;;  %v3424_v62 = vpop.permute.xlu1 %682  ;;  %1631 = vperm.xlu0 %2153, %v3273_v55  }
 0x155   :  { %v3405_v53 = vmul.f32 %v3091_v48, %v3387_v28  ;;  %vm590_vm0 = vmand %vm3178_vm7, %vm4530_vm13  ;;  %v515_v36 = vmul.f32 %v4562_v41, %v3271_v49  ;;  %v517_v0 = vadd.f32 %v513_v25, %v454_v32  ;;  %v4578_v49 = vld [vmem:[#allocation46_spill] sm:$0xff]  ;;  %v568_v2 = vmul.f32 %v3002_v5, %v560_v29 }
 0x156   :  { %vm4574_vm3 = vmmov %vm4570_vm2  ;;  %vm4577_vm2 = vcmp.ge.s32.totalorder %v2706_v59, 1  ;;  %v579_v32 = vmul.f32 %v4578_v49, %v3352_v1  ;;  %v580_v18 = vmul.f32 %v4578_v49, %v560_v29  ;;  %1175 = vperm.xlu1 %2137, %v3273_v55   ;;  %v569_v8 = vmul.f32 %v3002_v5, %v561_v56 }
 0x157   :  { %v613_v9 = vsel %vm4574_vm3, %v3142_v34, %v4573_v24  ;;  %vm4575_vm5 = vmand %vm4538_vm1, %vm2831_vm10  ;;  %v669_v34 = vsel %vm4568_vm4, %v3255_v7, %v661_v45  ;;  %v581_v7 = vmul.f32 %v4578_v49, %v561_v56  ;;  %v582_v45 = vmul.f32 %v4578_v49, %v562_v46 }
 0x158   :  { %v3433_v11 = vsel %vm4575_vm5, %v610_v30, 0.0  ;;  %vm646_vm3 = vmand %vm4577_vm2, %vm4539_vm11  ;;  %v620_v30 = vsel %vm589_vm15, %v612_v31, 0.0  ;;  %v621_v37 = vsel %vm590_vm0, %v613_v9, 0.0  ;;  %v4580_v31 = vld [vmem:[#allocation52_spill] sm:$0xff]  ;;  %v714_v49 = vpop.permute.xlu1 %713  ;;  %v518_v29 = vadd.f32 %v514_v16, %v3304_v42  ;;  %1498 = vrot.lane.b32.xlu0 %v3300_v27, %s2293_s17 }
 0x159   :  { %4576 = vst [vmem:[#allocation31_spill] sm:$0xff] %v3433_v11  ;;  %vm4579_vm1 = vmand %vm3138_vm9, %vm4569_vm6  ;;  %v638_v24 = vmul.f32 %v4580_v31, %v3433_v11  ;;  %v3468_v1 = vsel %vm646_vm3, %v669_v34, 0.0  ;;  %v640_v41 = vmul.f32 %v4580_v31, %v620_v30  ;;  %v519_v9 = vadd.f32 %v515_v36, %v3306_v54  ;;  %v3479_v34 = vpop.permute.xlu0 %780 }
 0x15a   :  { %v619_v25 = vsel %vm4579_vm1, %v611_v40, 0.0  ;;  %v570_v40 = vmul.f32 %v3002_v5, %v562_v46  ;;  %v583_v56 = vadd.f32 %v579_v32, %v3322_v43  ;;  %v584_v46 = vadd.f32 %v580_v18, %v3324_v22  ;;  %vm4583_vm7 = vmmov %vm4577_vm2 }
 0x15b   :  { %v639_v13 = vmul.f32 %v4580_v31, %v619_v25  ;;  %v641_v11 = vmul.f32 %v4580_v31, %v621_v37  ;;  %v4371_v5 = vmov 53   ;;  %v585_v42 = vadd.f32 %v581_v7, %v3345_v63  ;;  %vm4589_vm3 = vmmov %vm4583_vm7 }
 0x15c   :  { %2155 = vset.pattern.permute.xlu0 %v4371_v5  ;;  %v586_v16 = vadd.f32 %v582_v45, %v3347_v61  ;;  %v572_v52 = vadd.f32 %v568_v2, %v517_v0  ;;  %v697_v51 = vmul.f32 %v3091_v48, %v3468_v1  ;;  %v2338_v54 = vmov 38   ;;  %v716_v18 = vpop.permute.xlu1 %715  ;;  %vm760_vm1 = vmand %vm4589_vm3, %vm2831_vm10 }
 0x15d   :  { %2139 = vset.pattern.permute.xlu1 %v2338_v54  ;;  %v573_v43 = vadd.f32 %v569_v8, %v518_v29  ;;  %v574_v36 = vadd.f32 %v570_v40, %v519_v9  ;;  %v642_v22 = vadd.f32 %v638_v24, %v583_v56  ;;  %v627_v32 = vmul.f32 %v3189_v38, %v619_v25  ;;  %v3505_v24 = vpop.permute.xlu0 %808 }
 0x15e   :  { %1229 = vperm.xlu1 %2139, %v3273_v55   ;;  %v643_v31 = vadd.f32 %v639_v13, %v584_v46  ;;  %v644_v5 = vadd.f32 %v640_v41, %v585_v42  ;;  %vm4581_vm12 = vcmask 64512   ;;  %1502 = vrot.lane.b32.xlu0 %v3368_v19, %s2293_s17  ;;  %v645_v48 = vadd.f32 %v641_v11, %v586_v16 }
 0x15f   :  { %v724_v63 = vsel %vm4581_vm12, %v714_v49, %v716_v18  ;;  %vm4582_vm9 = vmmov %vm4581_vm12  ;;  %v628_v0 = vmul.f32 %v3189_v38, %v620_v30  ;;  %vm4584_vm15 = vcmp.ge.s32.totalorder %v2720_v14, 1  ;;  %v701_v45 = vadd.f32 %v697_v51, %v642_v22 }
 0x160   :  { %v725_v61 = vsel %vm4582_vm9, %v716_v18, %v3165_v6  ;;  %v3496_v7 = vsel %vm4583_vm7, %v724_v63, 0.0  ;;  %v702_v41 = vadd.f32 %v3331_v60, %v643_v31  ;;  %v629_v40 = vmul.f32 %v3189_v38, %v621_v37  ;;  %v720_v51 = vpop.permute.xlu1 %719  ;;  %vm4585_vm4 = vmmov %vm4582_vm9 }
 0x161   :  { %v733_v25 = vsel %vm4584_vm15, %v725_v61, 0.0  ;;  %v752_v2 = vmul.f32 %v3308_v58, %v3496_v7  ;;  %v631_v11 = vadd.f32 %v627_v32, %v572_v52  ;;  %v686_v30 = vmul.f32 %v3424_v62, %v3312_v4  ;;  %vm4586_vm0 = vmmov %vm4585_vm4  ;;  %v3531_v61 = vpop.permute.xlu0 %831 }
 0x162   :  { %v753_v8 = vmul.f32 %v3308_v58, %v733_v25  ;;  %v687_v49 = vmul.f32 %v3424_v62, %v3383_v10  ;;  %v2339_v29 = vmov 39   ;;  %v726_v9 = vsel %vm4585_vm4, %v3165_v6, %v720_v51  ;;  %1550 = vrot.lane.b32.xlu0 %v3333_v50, %s2295_s18  ;;  %vm4591_vm9 = vmmov %vm4584_vm15 }
 0x163   :  { %2140 = vset.pattern.permute.xlu1 %v2339_v29  ;;  %v756_v60 = vadd.f32 %v752_v2, %v701_v45  ;;  %v727_v37 = vsel %vm4586_vm0, %v720_v51, %v3253_v21  ;;  %v632_v52 = vadd.f32 %v628_v0, %v573_v43  ;;  %v688_v4 = vmul.f32 %v3424_v62, %v3387_v28  ;;  %vm761_vm7 = vmand %vm4591_vm9, %vm4569_vm6 }
 0x164   :  { %v757_v13 = vadd.f32 %v753_v8, %v702_v41  ;;  %1241 = vperm.xlu1 %2140, %v3273_v55   ;;  %vm4587_vm5 = vcmp.ge.s32.totalorder %v2698_v17, 1  ;;  %vm4588_vm2 = vcmp.ge.s32.totalorder %v2725_v33, 1  ;;  %v703_v6 = vadd.f32 %v3401_v44, %v644_v5  ;;  %v3528_v28 = vpop.permute.xlu1 %737 }
 0x165   :  { %v734_v10 = vsel %vm4587_vm5, %v726_v9, 0.0  ;;  %v735_v56 = vsel %vm4588_vm2, %v727_v37, 0.0  ;;  %v704_v46 = vadd.f32 %v3405_v53, %v645_v48  ;;  %v633_v16 = vadd.f32 %v629_v40, %v574_v36  ;;  %v836_v41 = vpop.permute.xlu0 %835  ;;  %vm4592_vm15 = vmmov %vm4587_vm5 }
 0x166   :  { %v754_v21 = vmul.f32 %v3308_v58, %v734_v10  ;;  %v755_v42 = vmul.f32 %v3308_v58, %v735_v56  ;;  %v690_v54 = vadd.f32 %v686_v30, %v631_v11  ;;  %v691_v43 = vadd.f32 %v687_v49, %v632_v52  ;;  %v3536_v58 = vld [vmem:[#allocation3 + $0x10] sm:$0xff]  ;;  %vm762_vm4 = vmand %vm4592_vm15, %vm4528_vm8 }
 0x167   :  { %v741_v18 = vmul.f32 %v3528_v28, %v733_v25  ;;  %v2340_v31 = vmov 41   ;;  %v692_v63 = vadd.f32 %v688_v4, %v633_v16  ;;  %v742_v5 = vmul.f32 %v3528_v28, %v734_v10  ;;  %1554 = vrot.lane.b32.xlu0 %v3536_v58, %s2295_s18  ;;  %vm4593_vm0 = vmmov %vm4588_vm2 }
 0x168   :  { %v758_v22 = vadd.f32 %v754_v21, %v703_v6  ;;  %v759_v32 = vadd.f32 %v755_v42, %v704_v46  ;;  %2142 = vset.pattern.permute.xlu1 %v2340_v31  ;;  %v743_v44 = vmul.f32 %v3528_v28, %v735_v56  ;;  %v773_v0 = vpop.permute.xlu1 %772  ;;  %vm782_vm12 = vcmask 56320   ;;  %vm763_vm5 = vmand %vm4593_vm0, %vm4530_vm13 }
 0x169   :  { %1299 = vperm.xlu1 %2142, %v3273_v55   ;;  %v745_v53 = vadd.f32 %v741_v18, %v690_v54  ;;  %v746_v36 = vadd.f32 %v742_v5, %v691_v43  ;;  %v4590_v25 = vmov 0.0   ;;  %v2341_v45 = vmov 43   ;;  %v864_v10 = vpop.permute.xlu0 %863 }
 0x16a   :  { %v747_v48 = vadd.f32 %v743_v44, %v692_v63  ;;  %vm837_vm2 = vcmask 7168   ;;  %vm4594_vm3 = vnez %v4421_v23  ;;  %vm4612_vm9 = vcmp.le.s32.totalorder %v2706_v59, 6 }
 0x16b   :  { %1558 = vrot.lane.b32.xlu0 %v4590_v25, %s2295_s18  ;;  %vm985_vm15 = vcmask 990208  }
 0x16c   :  { %v775_v2 = vpop.permute.xlu1 %774 }
 0x16d   :  { %1158 = vrot.lane.b32.xlu1 %v3368_v19, %s2274_s1  ;;  %v783_v8 = vsel %vm782_vm12, %v773_v0, %v775_v2  ;;  %v784_v40 = vsel %vm782_vm12, %v775_v2, %v3422_v57  ;;  %v3588_v18 = vpop.permute.xlu0 %916 }
 0x16e   :  { %2144 = vset.pattern.permute.xlu1 %v2341_v45  ;;  %v3555_v11 = vsel %vm760_vm1, %v783_v8, 0.0  ;;  %v792_v30 = vsel %vm761_vm7, %v784_v40, 0.0  ;;  %v2343_v45 = vmov 47   ;;  %vm4595_vm1 = vnez %v4441_v12  ;;  %vm963_vm7 = vmand %vm4612_vm9, %vm4539_vm11 }
 0x16f   :  { %1610 = vrot.lane.b32.xlu0 %v3300_v27, %s2298_s19  ;;  %v811_v49 = vmul.f32 %v3505_v24, %v3555_v11  ;;  %v812_v29 = vmul.f32 %v3505_v24, %v792_v30 }
 0x170   :  { %v779_v51 = vpop.permute.xlu1 %778 }
 0x171   :  { %1357 = vperm.xlu1 %2144, %v3273_v55   ;;  %v815_v9 = vadd.f32 %v811_v49, %v756_v60  ;;  %v816_v37 = vadd.f32 %v812_v29, %v757_v13  ;;  %v785_v52 = vsel %vm782_vm12, %v3422_v57, %v779_v51  ;;  %v786_v4 = vsel %vm782_vm12, %v779_v51, %v3479_v34  ;;  %v3594_v44 = vpop.permute.xlu0 %920 }
 0x172   :  { %v793_v56 = vsel %vm762_vm4, %v785_v52, 0.0  ;;  %v794_v6 = vsel %vm763_vm5, %v786_v4, 0.0  ;;  %v2342_v13 = vmov 44   ;;  %vm926_vm12 = vcmask 1039360  }
 0x173   :  { %1614 = vrot.lane.b32.xlu0 %v3368_v19, %s2298_s19  ;;  %v813_v46 = vmul.f32 %v3505_v24, %v793_v56  ;;  %v814_v60 = vmul.f32 %v3505_v24, %v794_v6  ;;  %vm4613_vm4 = vcmp.le.s32.totalorder %v2720_v14, 6  ;;  %vm4614_vm5 = vcmp.le.s32.totalorder %v2698_v17, 6 }
 0x174   :  { %v3581_v21 = vpop.permute.xlu1 %796  ;;  %vm964_vm0 = vmand %vm4613_vm4, %vm2792_vm14 }
 0x175   :  { %1206 = vrot.lane.b32.xlu1 %v3333_v50, %s2278_s2  ;;  %v817_v57 = vadd.f32 %v813_v46, %v758_v22  ;;  %v818_v42 = vadd.f32 %v814_v60, %v759_v32  ;;  %v800_v34 = vmul.f32 %v3581_v21, %v792_v30  ;;  %v801_v16 = vmul.f32 %v3581_v21, %v793_v56  ;;  %v925_v56 = vpop.permute.xlu0 %924  ;;  %v4596_v60 = vld [vmem:[#allocation55_spill] sm:$0xff] }
 0x176   :  { %2145 = vset.pattern.permute.xlu1 %v2342_v13  ;;  %v802_v54 = vmul.f32 %v3581_v21, %v794_v6  ;;  %v4597_v13 = vld [vmem:[#allocation19_spill] sm:$0xff] }
 0x177   :  { %v804_v43 = vadd.f32 %v800_v34, %v745_v53  ;;  %v805_v31 = vadd.f32 %v801_v16, %v746_v36  ;;  %v217_v34 = vmul.f32 %v4597_v13, %v4596_v60  ;;  %v4607_v13 = vld [vmem:[#allocation26_spill] sm:$0xff] }
 0x178   :  { %v806_v24 = vadd.f32 %v802_v54, %v747_v48  ;;  %v828_v63 = vpop.permute.xlu1 %827 }
 0x179   :  { %1210 = vrot.lane.b32.xlu1 %v3536_v58, %s2278_s2 }
 0x17c   :  { %v830_v22 = vpop.permute.xlu1 %829 }
 0x17d   :  { %1399 = vperm.xlu1 %2145, %v3273_v55   ;;  %v838_v32 = vsel %vm837_vm2, %v828_v63, %v830_v22  ;;  %v839_v5 = vsel %vm837_vm2, %v830_v22, %v3531_v61  ;;  %v4598_v63 = vld [vmem:[#allocation53_spill] sm:$0xff] }
 0x17e   :  { %v3598_v0 = vsel %vm4539_vm11, %v838_v32, 0.0  ;;  %v847_v53 = vsel %vm2792_vm14, %v839_v5, 0.0  ;;  %v4600_v22 = vld [vmem:[#allocation21_spill] sm:$0xff] }
 0x17f   :  { %v866_v36 = vmul.f32 %v864_v10, %v3598_v0  ;;  %v867_v48 = vmul.f32 %v864_v10, %v847_v53  ;;  %v276_v32 = vmul.f32 %v4600_v22, %v2981_v47  ;;  %v4606_v47 = vld [vmem:[#allocation39_spill] sm:$0xff] }
 0x180   :  { %v834_v2 = vpop.permute.xlu1 %833 }
 0x181   :  { %1264 = vrot.lane.b32.xlu1 %v3333_v50, %s2281_s13  ;;  %v870_v8 = vadd.f32 %v866_v36, %v815_v9  ;;  %v871_v40 = vadd.f32 %v867_v48, %v816_v37  ;;  %v840_v30 = vsel %vm837_vm2, %v3531_v61, %v834_v2  ;;  %v841_v49 = vsel %vm837_vm2, %v834_v2, %v836_v41  ;;  %v4601_v48 = vld [vmem:[#allocation59_spill] sm:$0xff]  ;;  %vm965_vm2 = vmand %vm4614_vm5, %vm4594_vm3 }
 0x182   :  { %2148 = vset.pattern.permute.xlu1 %v2343_v45  ;;  %v848_v29 = vsel %vm4594_vm3, %v840_v30, 0.0  ;;  %v849_v51 = vsel %vm4595_vm1, %v841_v49, 0.0  ;;  %v4602_v45 = vld [vmem:[#allocation23_spill] sm:$0xff]  ;;  %v4604_v30 = vld [vmem:[#allocation29_spill] sm:$0xff] }
 0x183   :  { %v868_v52 = vmul.f32 %v864_v10, %v848_v29  ;;  %v869_v4 = vmul.f32 %v864_v10, %v849_v51  ;;  %v335_v2 = vmul.f32 %v4602_v45, %v4601_v48 }
 0x184   :  { %v3614_v6 = vpop.permute.xlu1 %851 }
 0x185   :  { %1266 = vrot.lane.b32.xlu1 %v3300_v27, %s2281_s13  ;;  %v872_v9 = vadd.f32 %v868_v52, %v817_v57  ;;  %v873_v37 = vadd.f32 %v869_v4, %v818_v42  ;;  %v855_v61 = vmul.f32 %v3614_v6, %v847_v53  ;;  %v856_v41 = vmul.f32 %v3614_v6, %v848_v29  ;;  %v4599_v57 = vld [vmem:[#allocation17_spill] sm:$0xff]  ;;  %v953_v53 = vpop.permute.xlu0 %952 }
 0x186   :  { %v857_v46 = vmul.f32 %v3614_v6, %v849_v51  ;;  %v162_v42 = vmul.f32 %v4599_v57, %v4598_v63  ;;  %v4605_v51 = vld [vmem:[#allocation15_spill] sm:$0xff]  ;;  %v2344_v4 = vmov 48  }
 0x187   :  { %v859_v16 = vadd.f32 %v855_v61, %v804_v43  ;;  %v3623_v54 = vadd.f32 %v856_v41, %v805_v31  ;;  %v4603_v31 = vld [vmem:[#allocation24_spill] sm:$0xff]  ;;  %v449_v52 = vmul.f32 %v4606_v47, %v4605_v51  ;;  %v4609_v51 = vld [vmem:[#allocation33_spill] sm:$0xff] }
 0x188   :  { %v3625_v10 = vadd.f32 %v857_v46, %v806_v24  ;;  %v3631_v5 = vpop.permute.xlu1 %875  ;;  %v221_v36 = vadd.f32 %v217_v34, %v162_v42  ;;  %v390_v24 = vmul.f32 %v4604_v30, %v4603_v31  ;;  %v4608_v34 = vld [vmem:[#allocation49_spill] sm:$0xff] }
 0x189   :  { %1270 = vrot.lane.b32.xlu1 %v3368_v19, %s2281_s13  ;;  %v3642_v61 = vpop.permute.xlu0 %979  ;;  %v512_v63 = vmul.f32 %v4608_v34, %v4607_v13 }
 0x18a   :  { %v280_v43 = vadd.f32 %v276_v32, %v221_v36 }
 0x18c   :  { %v888_v49 = vpop.permute.xlu1 %887  ;;  %v339_v29 = vadd.f32 %v335_v2, %v280_v43 }
 0x18d   :  { %1469 = vperm.xlu1 %2148, %v3273_v55   ;;  %v890_v46 = vmul.f32 %v3333_v50, %v888_v49  ;;  %v891_v60 = vmul.f32 %v3300_v27, %v888_v49  ;;  %v892_v36 = vmul.f32 %v3536_v58, %v888_v49  ;;  %v893_v48 = vmul.f32 %v3368_v19, %v888_v49 }
 0x18e   :  { %v394_v41 = vadd.f32 %v390_v24, %v339_v29 }
 0x18f   :  { %v894_v43 = vadd.f32 %v890_v46, %v870_v8  ;;  %v895_v31 = vadd.f32 %v891_v60, %v871_v40  ;;  %v880_v46 = vmul.f32 %v3536_v58, %v3631_v5  ;;  %v881_v60 = vmul.f32 %v3368_v19, %v3631_v5 }
 0x190   :  { %v919_v57 = vpop.permute.xlu1 %918  ;;  %v453_v42 = vadd.f32 %v449_v52, %v394_v41  ;;  %v3662_v52 = vpop.permute.xlu0 %983 }
 0x191   :  { %1322 = vrot.lane.b32.xlu1 %v3333_v50, %s2284_s14  ;;  %v927_v22 = vsel %vm926_vm12, %v3588_v18, %v919_v57  ;;  %v928_v32 = vsel %vm926_vm12, %v919_v57, %v3594_v44  ;;  %v4610_v18 = vld [vmem:[#allocation58_spill] sm:$0xff]  ;;  %v896_v57 = vadd.f32 %v892_v36, %v872_v9  ;;  %v2345_v9 = vmov 51  }
 0x192   :  { %2149 = vset.pattern.permute.xlu1 %v2344_v4  ;;  %v935_v45 = vsel %vm2831_vm10, %v927_v22, 0.0  ;;  %v936_v2 = vsel %vm4569_vm6, %v928_v32, 0.0  ;;  %v516_v29 = vadd.f32 %v512_v63, %v453_v42  ;;  %v567_v47 = vmul.f32 %v4610_v18, %v4609_v51 }
 0x193   :  { %v955_v30 = vmul.f32 %v953_v53, %v935_v45  ;;  %v956_v24 = vmul.f32 %v953_v53, %v936_v2  ;;  %v879_v4 = vmul.f32 %v3300_v27, %v3631_v5  ;;  %v897_v42 = vadd.f32 %v893_v48, %v873_v37 }
 0x194   :  { %v923_v49 = vpop.permute.xlu1 %922  ;;  %v1012_v37 = vpop.permute.xlu0 %1011  ;;  %v885_v36 = vadd.f32 %v881_v60, %v3625_v10 }
 0x195   :  { %1326 = vrot.lane.b32.xlu1 %v3536_v58, %s2284_s14  ;;  %v959_v41 = vadd.f32 %v955_v30, %v894_v43  ;;  %v960_v13 = vadd.f32 %v956_v24, %v895_v31  ;;  %v929_v8 = vsel %vm926_vm12, %v3594_v44, %v923_v49  ;;  %v930_v40 = vsel %vm926_vm12, %v923_v49, %v925_v56  ;;  %v4611_v44 = vld [vmem:[#allocation31_spill] sm:$0xff] }
 0x196   :  { %v937_v34 = vsel %vm4528_vm8, %v929_v8, 0.0  ;;  %v938_v63 = vsel %vm4530_vm13, %v930_v40, 0.0  ;;  %v571_v43 = vadd.f32 %v567_v47, %v516_v29  ;;  %v626_v56 = vmul.f32 %v3189_v38, %v4611_v44 }
 0x197   :  { %v957_v22 = vmul.f32 %v953_v53, %v937_v34  ;;  %v958_v32 = vmul.f32 %v953_v53, %v938_v63  ;;  %v685_v31 = vmul.f32 %v3424_v62, %v3468_v1  ;;  %v883_v24 = vadd.f32 %v879_v4, %v859_v16 }
 0x198   :  { %v941_v30 = vpop.permute.xlu1 %940  ;;  %v884_v53 = vadd.f32 %v880_v46, %v3623_v54  ;;  %v630_v1 = vadd.f32 %v626_v56, %v571_v43  ;;  %v740_v62 = vmul.f32 %v3528_v28, %v3496_v7  ;;  %v799_v4 = vmul.f32 %v3581_v21, %v3555_v11  ;;  %v1035_v28 = vpop.permute.xlu0 %1034 }
 0x199   :  { %1519 = vperm.xlu1 %2149, %v3273_v55   ;;  %v961_v51 = vadd.f32 %v957_v22, %v896_v57  ;;  %v962_v18 = vadd.f32 %v958_v32, %v897_v42  ;;  %v943_v49 = vmul.f32 %v941_v30, %v935_v45  ;;  %v944_v8 = vmul.f32 %v941_v30, %v936_v2 }
 0x19a   :  { %v945_v38 = vmul.f32 %v941_v30, %v937_v34  ;;  %v946_v48 = vmul.f32 %v941_v30, %v938_v63  ;;  %v689_v2 = vadd.f32 %v685_v31, %v630_v1  ;;  %v854_v54 = vmul.f32 %v3614_v6, %v3598_v0 }
 0x19b   :  { %v948_v29 = vadd.f32 %v944_v8, %v883_v24  ;;  %v878_v46 = vmul.f32 %v3333_v50, %v3631_v5  ;;  %vm4615_vm12 = vcmp.le.s32.totalorder %v2725_v33, 6 }
 0x19c   :  { %v949_v47 = vadd.f32 %v945_v38, %v884_v53  ;;  %v950_v16 = vadd.f32 %v946_v48, %v885_v36  ;;  %v976_v45 = vpop.permute.xlu1 %975  ;;  %v744_v7 = vadd.f32 %v740_v62, %v689_v2  ;;  %vm966_vm9 = vmand %vm4615_vm12, %vm4595_vm1  ;;  %v1039_v43 = vpop.permute.xlu0 %1038  ;;  %v4616_v38 = vmov 53  }
 0x19d   :  { %1376 = vrot.lane.b32.xlu1 %v3333_v50, %s2287_s15 }
 0x19e   :  { %2152 = vset.pattern.permute.xlu1 %v2345_v9  ;;  %v803_v40 = vadd.f32 %v799_v4, %v744_v7 }
 0x1a0   :  { %v978_v11 = vpop.permute.xlu1 %977  ;;  %v858_v63 = vadd.f32 %v854_v54, %v803_v40  ;;  %v1067_v62 = vpop.permute.xlu0 %1066 }
 0x1a1   :  { %1378 = vrot.lane.b32.xlu1 %v3300_v27, %s2287_s15  ;;  %v986_v21 = vsel %vm985_vm15, %v976_v45, %v978_v11  ;;  %v987_v10 = vsel %vm985_vm15, %v978_v11, %v3642_v61 }
 0x1a2   :  { %v994_v60 = vsel %vm963_vm7, %v986_v21, 0.0  ;;  %v995_v34 = vsel %vm964_vm0, %v987_v10, 0.0  ;;  %v882_v44 = vadd.f32 %v878_v46, %v858_v63  ;;  %vm1040_vm7 = vcmask 982016   ;;  %vm4618_vm0 = vmmov %vm4614_vm5 }
 0x1a3   :  { %v1014_v0 = vmul.f32 %v1012_v37, %v994_v60  ;;  %v1015_v6 = vmul.f32 %v1012_v37, %v995_v34  ;;  %vm4619_vm5 = vmmov %vm4615_vm12 }
 0x1a4   :  { %v982_v57 = vpop.permute.xlu1 %981  ;;  %v947_v8 = vadd.f32 %v943_v49, %v882_v44  ;;  %v1094_v4 = vpop.permute.xlu0 %1093 }
 0x1a5   :  { %1382 = vrot.lane.b32.xlu1 %v3368_v19, %s2287_s15  ;;  %v1018_v42 = vadd.f32 %v1014_v0, %v959_v41  ;;  %v1019_v5 = vadd.f32 %v1015_v6, %v960_v13  ;;  %v988_v22 = vsel %vm985_vm15, %v3642_v61, %v982_v57  ;;  %v989_v32 = vsel %vm985_vm15, %v982_v57, %v3662_v52 }
 0x1a6   :  { %v996_v56 = vsel %vm965_vm2, %v988_v22, 0.0  ;;  %v997_v31 = vsel %vm966_vm9, %v989_v32, 0.0  ;;  %vm4617_vm15 = vcmp.le.s32.totalorder %v2706_v59, 6  ;;  %vm1099_vm9 = vcmask 973824  }
 0x1a7   :  { %v1016_v30 = vmul.f32 %v1012_v37, %v996_v56  ;;  %v1017_v24 = vmul.f32 %v1012_v37, %v997_v31  ;;  %vm4620_vm2 = vmmov %vm4617_vm15 }
 0x1a8   :  { %v1000_v9 = vpop.permute.xlu1 %999  ;;  %v1098_v6 = vpop.permute.xlu0 %1097  ;;  %vm1077_vm12 = vmand %vm4620_vm2, %vm2831_vm10 }
 0x1a9   :  { %1585 = vperm.xlu1 %2152, %v3273_v55   ;;  %v1020_v53 = vadd.f32 %v1016_v30, %v961_v51  ;;  %v1021_v41 = vadd.f32 %v1017_v24, %v962_v18  ;;  %v1002_v13 = vmul.f32 %v1000_v9, %v994_v60  ;;  %v1003_v36 = vmul.f32 %v1000_v9, %v995_v34  ;;  %vm1080_vm2 = vmand %vm4619_vm5, %vm4530_vm13 }
 0x1aa   :  { %v1004_v61 = vmul.f32 %v1000_v9, %v996_v56  ;;  %v1005_v48 = vmul.f32 %v1000_v9, %v997_v31 }
 0x1ab   :  { %v1006_v52 = vadd.f32 %v1002_v13, %v947_v8  ;;  %v1007_v1 = vadd.f32 %v1003_v36, %v948_v29 }
 0x1ac   :  { %v1008_v45 = vadd.f32 %v1004_v61, %v949_v47  ;;  %v1009_v2 = vadd.f32 %v1005_v48, %v950_v16  ;;  %v1031_v49 = vpop.permute.xlu1 %1030  ;;  %v1126_v30 = vpop.permute.xlu0 %1125 }
 0x1ad   :  { %1434 = vrot.lane.b32.xlu1 %v3333_v50, %s2290_s16 }
 0x1ae   :  { %2154 = vset.pattern.permute.xlu1 %v4616_v38 }
 0x1b0   :  { %v1033_v51 = vpop.permute.xlu1 %1032  ;;  %v3762_v38 = vpop.permute.xlu0 %1156 }
 0x1b1   :  { %1438 = vrot.lane.b32.xlu1 %v3536_v58, %s2290_s16  ;;  %v1041_v18 = vsel %vm1040_vm7, %v1031_v49, %v1033_v51  ;;  %v1042_v37 = vsel %vm1040_vm7, %v1033_v51, %v1035_v28 }
 0x1b2   :  { %v1049_v7 = vsel %vm4617_vm15, %v1041_v18, 0.0  ;;  %v1050_v29 = vsel %vm4613_vm4, %v1042_v37, 0.0  ;;  %v4623_v37 = vld [vmem:[#allocation34_spill] sm:$0xff] }
 0x1b3   :  { %v1069_v47 = vmul.f32 %v1067_v62, %v1049_v7  ;;  %v1070_v16 = vmul.f32 %v1067_v62, %v1050_v29 }
 0x1b4   :  { %v1037_v54 = vpop.permute.xlu1 %1036 }
 0x1b5   :  { %1442 = vrot.lane.b32.xlu1 %v4590_v25, %s2290_s16  ;;  %v1073_v11 = vadd.f32 %v1069_v47, %v1018_v42  ;;  %v1074_v21 = vadd.f32 %v1070_v16, %v1019_v5  ;;  %v1043_v10 = vsel %vm1040_vm7, %v1035_v28, %v1037_v54  ;;  %v1044_v40 = vsel %vm1040_vm7, %v1037_v54, %v1039_v43  ;;  %vm4621_vm7 = vmmov %vm4613_vm4  ;;  %v4627_v47 = vld [vmem:[#allocation40_spill] sm:$0xff] }
 0x1b6   :  { %v1051_v46 = vsel %vm4618_vm0, %v1043_v10, 0.0  ;;  %v1052_v60 = vsel %vm4619_vm5, %v1044_v40, 0.0  ;;  %vm1078_vm15 = vmand %vm4621_vm7, %vm4569_vm6  ;;  %v4628_v16 = vshra.s32 %v4627_v47, 6  ;;  %v1188_v10 = vpop.permute.xlu0 %1187 }
 0x1b7   :  { %v1071_v34 = vmul.f32 %v1067_v62, %v1051_v46  ;;  %v1072_v0 = vmul.f32 %v1067_v62, %v1052_v60  ;;  %vm4622_vm4 = vmmov %vm4618_vm0 }
 0x1b8   :  { %v1055_v63 = vpop.permute.xlu1 %1054  ;;  %vm1079_vm0 = vmand %vm4622_vm4, %vm4528_vm8  ;;  %vm3776_vm7 = vcmp.le.s32.totalorder %v4628_v16, 6  ;;  %vm4634_vm4 = vcmp.ge.s32.totalorder %v2720_v14, 1 }
 0x1b9   :  { %1643 = vperm.xlu1 %2154, %v3273_v55   ;;  %v1075_v57 = vadd.f32 %v1071_v34, %v1020_v53  ;;  %v1076_v55 = vadd.f32 %v1072_v0, %v1021_v41  ;;  %v1057_v22 = vmul.f32 %v1055_v63, %v1049_v7  ;;  %v1058_v42 = vmul.f32 %v1055_v63, %v1050_v29 }
 0x1ba   :  { %v1059_v5 = vmul.f32 %v1055_v63, %v1051_v46  ;;  %v1060_v28 = vmul.f32 %v1055_v63, %v1052_v60  ;;  %v4624_v7 = vshra.s32 %v4623_v37, 6  ;;  %v4625_v29 = vmov 0  ;;  %v4654_v37 = vld [vmem:[#allocation16_spill] sm:$0xff] }
 0x1bb   :  { %v1061_v32 = vadd.f32 %v1057_v22, %v1006_v52  ;;  %v1062_v43 = vadd.f32 %v1058_v42, %v1007_v1 }
 0x1bc   :  { %v1063_v44 = vadd.f32 %v1059_v5, %v1008_v45  ;;  %v1064_v56 = vadd.f32 %v1060_v28, %v1009_v2  ;;  %v1090_v31 = vpop.permute.xlu1 %1089 }
 0x1bd   :  { %1496 = vrot.lane.b32.xlu1 %v3333_v50, %s2293_s17 }
 0x1c0   :  { %v1092_v24 = vpop.permute.xlu1 %1091 }
 0x1c1   :  { %1500 = vrot.lane.b32.xlu1 %v3536_v58, %s2293_s17  ;;  %v1100_v8 = vsel %vm1099_vm9, %v1090_v31, %v1092_v24  ;;  %v1101_v9 = vsel %vm1099_vm9, %v1092_v24, %v1094_v4 }
 0x1c2   :  { %v1108_v53 = vsel %vm1077_vm12, %v1100_v8, 0.0  ;;  %v1109_v41 = vsel %vm1078_vm15, %v1101_v9, 0.0  ;;  %vm3770_vm12 = vcmp.le.s32.totalorder %v4624_v7, 6  ;;  %v2080_v7 = vunpack.i.h.bf16 %v4654_v37 }
 0x1c3   :  { %v1128_v13 = vmul.f32 %v1126_v30, %v1108_v53  ;;  %v1129_v36 = vmul.f32 %v1126_v30, %v1109_v41  ;;  %v4626_v29 = vsel %vm3770_vm12, 4294967295, %v4625_v29 }
 0x1c4   :  { %v1096_v61 = vpop.permute.xlu1 %1095 }
 0x1c5   :  { %1504 = vrot.lane.b32.xlu1 %v4590_v25, %s2293_s17  ;;  %v1132_v48 = vadd.f32 %v1128_v13, %v1073_v11  ;;  %v1133_v52 = vadd.f32 %v1129_v36, %v1074_v21  ;;  %v1102_v1 = vsel %vm1099_vm9, %v1094_v4, %v1096_v61  ;;  %v1103_v62 = vsel %vm1099_vm9, %v1096_v61, %v1098_v6  ;;  %v4639_v36 = vld [vmem:[#allocation37_spill] sm:$0xff] }
 0x1c6   :  { %v1110_v45 = vsel %vm1079_vm0, %v1102_v1, 0.0  ;;  %v1111_v2 = vsel %vm1080_vm2, %v1103_v62, 0.0  ;;  %vm4631_vm9 = vcmp.ge.s32.totalorder %v2706_v59, 1  ;;  %vm3798_vm0 = vmand %vm3776_vm7, %vm4634_vm4  ;;  %v4640_v61 = vshra.s32 %v4639_v36, 6  ;;  %v4643_v62 = vld [vmem:[#allocation42_spill] sm:$0xff] }
 0x1c7   :  { %v1130_v49 = vmul.f32 %v1126_v30, %v1110_v45  ;;  %v1131_v51 = vmul.f32 %v1126_v30, %v1111_v2  ;;  %vm3790_vm15 = vmand %vm3770_vm12, %vm4631_vm9  ;;  %vm4637_vm9 = vcmask 596992   ;;  %v4641_v1 = vmov 0 }
 0x1c8   :  { %v1114_v18 = vpop.permute.xlu1 %1113  ;;  %vm1140_vm5 = vmand %vm3790_vm15, %vm4539_vm11 }
 0x1c9   :  { %1552 = vrot.lane.b32.xlu1 %v3300_v27, %s2295_s18  ;;  %v4629_v27 = vmov 0  ;;  %v3782_v4 = vadd.f32 %v1130_v49, %v1075_v57  ;;  %v3784_v54 = vadd.f32 %v1131_v51, %v1076_v55  ;;  %v1116_v11 = vmul.f32 %v1114_v18, %v1108_v53  ;;  %vm1141_vm2 = vmand %vm3798_vm0, %vm2792_vm14  ;;  %v3812_v55 = vpop.permute.xlu0 %1287  ;;  %v4650_v49 = vld [vmem:[#allocation18_spill] sm:$0xff] }
 0x1ca   :  { %v4630_v27 = vsel %vm3776_vm7, 4294967295, %v4629_v27  ;;  %v1117_v21 = vmul.f32 %v1114_v18, %v1109_v41  ;;  %v1118_v40 = vmul.f32 %v1114_v18, %v1110_v45  ;;  %v1119_v46 = vmul.f32 %v1114_v18, %v1111_v2  ;;  %vm4638_vm4 = vmmov %vm4637_vm9 }
 0x1cb   :  { %v1120_v60 = vadd.f32 %v1116_v11, %v1061_v32  ;;  %v4644_v45 = vshra.s32 %v4643_v62, 6  ;;  %v2087_v51 = vunpack.i.h.bf16 %v4650_v49  ;;  %vm4651_vm7 = vcmp.ge.s32.totalorder %v2725_v33, 1 }
 0x1cc   :  { %v1121_v34 = vadd.f32 %v1117_v21, %v1062_v43  ;;  %v1122_v63 = vadd.f32 %v1118_v40, %v1063_v44  ;;  %v1123_v57 = vadd.f32 %v1119_v46, %v1064_v56 }
 0x1cd   :  { %1556 = vrot.lane.b32.xlu1 %v3368_v19, %s2295_s18  ;;  %v1153_v19 = vpop.permute.xlu1 %1152  ;;  %v3821_v8 = vpop.permute.xlu0 %1345 }
 0x1d1   :  { %1608 = vrot.lane.b32.xlu1 %v3333_v50, %s2298_s19  ;;  %v1155_v22 = vpop.permute.xlu1 %1154  ;;  %v1209_v41 = vpop.permute.xlu0 %1208 }
 0x1d2   :  { %v1162_v50 = vsel %vm4637_vm9, %v1153_v19, %v1155_v22  ;;  %v1163_v42 = vsel %vm4638_vm4, %v1155_v22, %v3762_v38  ;;  %vm4647_vm9 = vcmp.ge.s32.totalorder %v2698_v17, 1 }
 0x1d3   :  { %v1170_v5 = vsel %vm1140_vm5, %v1162_v50, 0.0  ;;  %v1171_v28 = vsel %vm1141_vm2, %v1163_v42, 0.0  ;;  %vm3825_vm5 = vcmp.le.s32.totalorder %v4640_v61, 6  ;;  %vm3831_vm2 = vcmp.le.s32.totalorder %v4644_v45, 6 }
 0x1d4   :  { %v1190_v32 = vmul.f32 %v1188_v10, %v1170_v5  ;;  %v1191_v43 = vmul.f32 %v1188_v10, %v1171_v28  ;;  %v4642_v1 = vsel %vm3825_vm5, 4294967295, %v4641_v1  ;;  %vm3841_vm4 = vmand %vm3825_vm5, %vm4647_vm9  ;;  %vm4655_vm9 = vcmask 588800  }
 0x1d5   :  { %1612 = vrot.lane.b32.xlu1 %v3536_v58, %s2298_s19  ;;  %v1176_v44 = vpop.permute.xlu1 %1175  ;;  %vm3850_vm14 = vmand %vm3831_vm2, %vm4651_vm7  ;;  %vm4656_vm7 = vcmask 596992  }
 0x1d6   :  { %v1194_v56 = vadd.f32 %v1190_v32, %v1132_v48  ;;  %v1195_v31 = vadd.f32 %v1191_v43, %v1133_v52  ;;  %v1178_v30 = vmul.f32 %v1176_v44, %v1170_v5  ;;  %v1179_v24 = vmul.f32 %v1176_v44, %v1171_v28  ;;  %v1213_v48 = vpop.permute.xlu0 %1212  ;;  %vm1143_vm12 = vmand %vm3850_vm14, %vm4595_vm1 }
 0x1d7   :  { %v1219_v47 = vsel %vm4655_vm9, %v1213_v48, %v2087_v51  ;;  %vm1142_vm5 = vmand %vm3841_vm4, %vm4594_vm3 }
 0x1d8   :  { %v1182_v58 = vadd.f32 %v1178_v30, %v1120_v60  ;;  %v1183_v9 = vadd.f32 %v1179_v24, %v1121_v34  ;;  %vm4657_vm11 = vmmov %vm4656_vm7  ;;  %v1227_v46 = vsel %vm3850_vm14, %v1219_v47, 0.0 }
 0x1d9   :  { %1616 = vrot.lane.b32.xlu1 %v4590_v25, %s2298_s19 }
 0x1da   :  { %v3864_v11 = vpop.permute.xlu0 %1411 }
 0x1dd   :  { %v1230_v53 = vpop.permute.xlu1 %1229 }
 0x1de   :  { %v1235_v5 = vmul.f32 %v1230_v53, %v1227_v46  ;;  %v1269_v36 = vpop.permute.xlu0 %1268 }
 0x1e3   :  { %v1242_v13 = vpop.permute.xlu1 %1241 }
 0x1e4   :  { %v1247_v28 = vmul.f32 %v1242_v13, %v1227_v46 }
 0x1e8   :  { %v3835_v52 = vpop.permute.xlu1 %1299 }
 0x1ec   :  { %v1159_v16 = vpop.permute.xlu1 %1158 }
 0x1ed   :  { %v1164_v21 = vsel %vm4656_vm7, %v3762_v38, %v1159_v16  ;;  %v1165_v40 = vsel %vm4657_vm11, %v1159_v16, %v2080_v7  ;;  %vm4658_vm11 = vmmov %vm4655_vm9  ;;  %v3880_v7 = vpop.permute.xlu0 %1457 }
 0x1ee   :  { %v1172_v60 = vsel %vm1142_vm5, %v1164_v21, 0.0  ;;  %v1173_v34 = vsel %vm1143_vm12, %v1165_v40, 0.0  ;;  %vm4659_vm12 = vmmov %vm4655_vm9 }
 0x1ef   :  { %v1180_v19 = vmul.f32 %v1176_v44, %v1172_v60  ;;  %v1181_v22 = vmul.f32 %v1176_v44, %v1173_v34  ;;  %v1192_v50 = vmul.f32 %v1188_v10, %v1172_v60  ;;  %v1193_v42 = vmul.f32 %v1188_v10, %v1173_v34  ;;  %vm4660_vm5 = vmmov %vm4655_vm9 }
 0x1f0   :  { %v3871_v32 = vpop.permute.xlu1 %1357  ;;  %vm1252_vm9 = vmand %vm3790_vm15, %vm2831_vm10 }
 0x1f1   :  { %v1184_v43 = vadd.f32 %v1180_v19, %v1122_v63  ;;  %v1185_v30 = vadd.f32 %v1181_v22, %v1123_v57  ;;  %v1196_v24 = vadd.f32 %v1192_v50, %v3782_v4  ;;  %v1197_v38 = vadd.f32 %v1193_v42, %v3784_v54  ;;  %v1325_v50 = vpop.permute.xlu0 %1324  ;;  %vm1253_vm7 = vmand %vm3798_vm0, %vm4569_vm6 }
 0x1f3   :  { %v1239_v61 = vadd.f32 %v1235_v5, %v1185_v30  ;;  %v3875_v62 = vadd.f32 %v1247_v28, %v1197_v38 }
 0x1f4   :  { %v1207_v45 = vpop.permute.xlu1 %1206 }
 0x1f5   :  { %v1216_v49 = vsel %vm4658_vm11, %v1207_v45, %v1209_v41  ;;  %vm4661_vm11 = vcmask 580608  }
 0x1f6   :  { %v1224_v10 = vsel %vm3790_vm15, %v1216_v49, 0.0  ;;  %vm1254_vm15 = vmand %vm3841_vm4, %vm4528_vm8 }
 0x1f7   :  { %v1232_v44 = vmul.f32 %v1230_v53, %v1224_v10  ;;  %v1244_v51 = vmul.f32 %v1242_v13, %v1224_v10 }
 0x1f8   :  { %v1211_v37 = vpop.permute.xlu1 %1210 }
 0x1f9   :  { %v1236_v63 = vadd.f32 %v1232_v44, %v1182_v58  ;;  %v1248_v57 = vadd.f32 %v1244_v51, %v1194_v56  ;;  %v1217_v4 = vsel %vm4659_vm12, %v1209_v41, %v1211_v37  ;;  %v1218_v54 = vsel %vm4660_vm5, %v1211_v37, %v1213_v48  ;;  %vm4662_vm12 = vmmov %vm4661_vm11 }
 0x1fa   :  { %v1225_v47 = vsel %vm3798_vm0, %v1217_v4, 0.0  ;;  %v1226_v16 = vsel %vm3841_vm4, %v1218_v54, 0.0  ;;  %vm1313_vm5 = vmand %vm3831_vm2, %vm4595_vm1  ;;  %vm4665_vm0 = vcmask 531456   ;;  %vm4669_vm4 = vnez %v4626_v29 }
 0x1fb   :  { %v1233_v21 = vmul.f32 %v1230_v53, %v1225_v47  ;;  %v1234_v40 = vmul.f32 %v1230_v53, %v1226_v16  ;;  %v1245_v46 = vmul.f32 %v1242_v13, %v1225_v47  ;;  %v1246_v60 = vmul.f32 %v1242_v13, %v1226_v16  ;;  %v1329_v13 = vpop.permute.xlu0 %1328 }
 0x1fc   :  { %v3888_v34 = vpop.permute.xlu1 %1399 }
 0x1fd   :  { %v1237_v19 = vadd.f32 %v1233_v21, %v1183_v9  ;;  %v1238_v22 = vadd.f32 %v1234_v40, %v1184_v43  ;;  %v1249_v58 = vadd.f32 %v1245_v46, %v1195_v31  ;;  %v1250_v56 = vadd.f32 %v1246_v60, %v1196_v24  ;;  %v4663_v31 = vld [vmem:[#allocation22_spill] sm:$0xff]  ;;  %v4664_v24 = vld [vmem:[#allocation20_spill] sm:$0xff] }
 0x1fe   :  { %v2101_v42 = vunpack.i.h.bf16 %v4663_v31  ;;  %v2094_v38 = vunpack.i.h.bf16 %v4664_v24 }
 0x200   :  { %v1265_v41 = vpop.permute.xlu1 %1264  ;;  %v1335_v45 = vsel %vm4665_vm0, %v1329_v13, %v2101_v42 }
 0x201   :  { %v1343_v2 = vsel %vm1313_vm5, %v1335_v45, 0.0  ;;  %vm4670_vm5 = vmmov %vm4665_vm0  ;;  %vm4672_vm0 = vnez %v4630_v27 }
 0x202   :  { %v1363_v46 = vmul.f32 %v3871_v32, %v1343_v2  ;;  %vm4674_vm1 = vmmov %vm4670_vm5 }
 0x204   :  { %v1267_v53 = vpop.permute.xlu1 %1266 }
 0x205   :  { %v1274_v48 = vsel %vm4661_vm11, %v1265_v41, %v1267_v53  ;;  %v1275_v9 = vsel %vm4662_vm12, %v1267_v53, %v1269_v36 }
 0x206   :  { %v1282_v0 = vsel %vm1252_vm9, %v1274_v48, 0.0  ;;  %v1283_v5 = vsel %vm1253_vm7, %v1275_v9, 0.0  ;;  %vm1255_vm9 = vmand %vm3850_vm14, %vm4530_vm13  ;;  %vm4668_vm14 = vnez %v4434_v35 }
 0x207   :  { %v1290_v28 = vmul.f32 %v3812_v55, %v1282_v0  ;;  %v1291_v6 = vmul.f32 %v3812_v55, %v1283_v5  ;;  %v1302_v43 = vmul.f32 %v3835_v52, %v1282_v0  ;;  %v1303_v30 = vmul.f32 %v3835_v52, %v1283_v5  ;;  %vm4666_vm7 = vmmov %vm4661_vm11 }
 0x208   :  { %v1271_v49 = vpop.permute.xlu1 %1270  ;;  %vm4667_vm11 = vmmov %vm4666_vm7 }
 0x209   :  { %v1294_v10 = vadd.f32 %v1290_v28, %v1236_v63  ;;  %v1295_v44 = vadd.f32 %v1291_v6, %v1237_v19  ;;  %v1306_v51 = vadd.f32 %v1302_v43, %v1248_v57  ;;  %v1307_v37 = vadd.f32 %v1303_v30, %v1249_v58  ;;  %vm1310_vm12 = vmand %vm4669_vm4, %vm4668_vm14 }
 0x20a   :  { %v1276_v4 = vsel %vm4666_vm7, %v1269_v36, %v1271_v49  ;;  %v1277_v54 = vsel %vm4667_vm11, %v1271_v49, %v2094_v38  ;;  %v3932_v36 = vpop.permute.xlu0 %1531  ;;  %vm4673_vm7 = vnez %v4642_v1  ;;  %vm4675_vm14 = vmmov %vm4674_vm1 }
 0x20b   :  { %v1284_v47 = vsel %vm1254_vm15, %v1276_v4, 0.0  ;;  %v1285_v16 = vsel %vm1255_vm9, %v1277_v54, 0.0  ;;  %vm4671_vm15 = vnez %v4437_v3  ;;  %vm1312_vm11 = vmand %vm4673_vm7, %vm4594_vm3 }
 0x20c   :  { %v1292_v18 = vmul.f32 %v3812_v55, %v1284_v47  ;;  %v1293_v21 = vmul.f32 %v3812_v55, %v1285_v16  ;;  %v1304_v63 = vmul.f32 %v3835_v52, %v1284_v47  ;;  %v1305_v57 = vmul.f32 %v3835_v52, %v1285_v16  ;;  %v3930_v40 = vpop.permute.xlu1 %1469  ;;  %vm1311_vm9 = vmand %vm4672_vm0, %vm4671_vm15 }
 0x20e   :  { %v1296_v60 = vadd.f32 %v1292_v18, %v1238_v22  ;;  %v1297_v19 = vadd.f32 %v1293_v21, %v1239_v61  ;;  %v1308_v58 = vadd.f32 %v1304_v63, %v1250_v56  ;;  %v1309_v41 = vadd.f32 %v1305_v57, %v3875_v62  ;;  %v1381_v61 = vpop.permute.xlu0 %1380  ;;  %v4678_v57 = vld [vmem:[#allocation25_spill] sm:$0xff] }
 0x210   :  { %v1323_v55 = vpop.permute.xlu1 %1322  ;;  %v3940_v53 = vadd.f32 %v1363_v46, %v1309_v41  ;;  %v2108_v46 = vunpack.i.h.bf16 %v4678_v57 }
 0x211   :  { %v1332_v52 = vsel %vm4670_vm5, %v1323_v55, %v1325_v50 }
 0x212   :  { %v1340_v48 = vsel %vm1310_vm12, %v1332_v52, 0.0  ;;  %v3959_v30 = vpop.permute.xlu0 %1573  ;;  %v1351_v52 = vmul.f32 %v3821_v8, %v1343_v2 }
 0x213   :  { %v1360_v22 = vmul.f32 %v3871_v32, %v1340_v48 }
 0x214   :  { %v1327_v62 = vpop.permute.xlu1 %1326 }
 0x215   :  { %v1364_v56 = vadd.f32 %v1360_v22, %v1306_v51  ;;  %v1333_v9 = vsel %vm4674_vm1, %v1325_v50, %v1327_v62  ;;  %v1334_v31 = vsel %vm4675_vm14, %v1327_v62, %v1329_v13  ;;  %v1348_v50 = vmul.f32 %v3821_v8, %v1340_v48 }
 0x216   :  { %v1341_v42 = vsel %vm1311_vm9, %v1333_v9, 0.0  ;;  %v1342_v0 = vsel %vm1312_vm11, %v1334_v31, 0.0  ;;  %v1437_v51 = vpop.permute.xlu0 %1436  ;;  %vm4676_vm1 = vcmask 523264   ;;  %v1355_v62 = vadd.f32 %v1351_v52, %v1297_v19  ;;  %vm1422_vm9 = vmand %vm4669_vm4, %vm2831_vm10 }
 0x217   :  { %v1350_v5 = vmul.f32 %v3821_v8, %v1342_v0  ;;  %v1361_v28 = vmul.f32 %v3871_v32, %v1341_v42  ;;  %v1362_v6 = vmul.f32 %v3871_v32, %v1342_v0  ;;  %v1349_v13 = vmul.f32 %v3821_v8, %v1341_v42  ;;  %vm4677_vm14 = vmmov %vm4676_vm1 }
 0x218   :  { %v3957_v43 = vpop.permute.xlu1 %1519  ;;  %v1352_v18 = vadd.f32 %v1348_v50, %v1294_v10  ;;  %vm4679_vm12 = vmmov %vm4676_vm1  ;;  %vm4681_vm11 = vcmask 515072  }
 0x219   :  { %v1354_v24 = vadd.f32 %v1350_v5, %v1296_v60  ;;  %v1365_v38 = vadd.f32 %v1361_v28, %v1307_v37  ;;  %v1366_v45 = vadd.f32 %v1362_v6, %v1308_v58  ;;  %v1353_v37 = vadd.f32 %v1349_v13, %v1295_v44  ;;  %vm4680_vm5 = vmmov %vm4676_vm1 }
 0x21a   :  { %v1441_v58 = vpop.permute.xlu0 %1440 }
 0x21c   :  { %v1377_v49 = vpop.permute.xlu1 %1376 }
 0x21e   :  { %v3987_v0 = vpop.permute.xlu0 %1631 }
 0x220   :  { %v1379_v4 = vpop.permute.xlu1 %1378 }
 0x221   :  { %v1386_v54 = vsel %vm4676_vm1, %v1377_v49, %v1379_v4  ;;  %v1387_v47 = vsel %vm4677_vm14, %v1379_v4, %v1381_v61  ;;  %vm1423_vm1 = vmand %vm4672_vm0, %vm4569_vm6 }
 0x222   :  { %v1394_v32 = vsel %vm4669_vm4, %v1386_v54, 0.0  ;;  %v1395_v16 = vsel %vm4672_vm0, %v1387_v47, 0.0  ;;  %vm1424_vm14 = vmand %vm4673_vm7, %vm4528_vm8 }
 0x223   :  { %v1402_v21 = vmul.f32 %v3888_v34, %v1394_v32  ;;  %v1403_v63 = vmul.f32 %v3888_v34, %v1395_v16  ;;  %v1415_v6 = vmul.f32 %v3864_v11, %v1395_v16 }
 0x224   :  { %v1383_v60 = vpop.permute.xlu1 %1382 }
 0x225   :  { %v3972_v41 = vadd.f32 %v1402_v21, %v1352_v18  ;;  %v3974_v55 = vadd.f32 %v1403_v63, %v1353_v37  ;;  %v1388_v48 = vsel %vm4679_vm12, %v1381_v61, %v1383_v60  ;;  %v1389_v22 = vsel %vm4680_vm5, %v1383_v60, %v2108_v46  ;;  %vm4682_vm12 = vmmov %vm4681_vm11 }
 0x226   :  { %v1396_v10 = vsel %vm4673_vm7, %v1388_v48, 0.0  ;;  %v1397_v44 = vsel %vm3831_vm2, %v1389_v22, 0.0  ;;  %v1414_v61 = vmul.f32 %v3864_v11, %v1394_v32  ;;  %vm4683_vm5 = vmmov %vm4681_vm11  ;;  %v1419_v16 = vadd.f32 %v1415_v6, %v1365_v38 }
 0x227   :  { %v1404_v9 = vmul.f32 %v3888_v34, %v1396_v10  ;;  %v1405_v31 = vmul.f32 %v3888_v34, %v1397_v44  ;;  %v4001_v34 = vpop.permute.xlu0 %1498  ;;  %v1416_v49 = vmul.f32 %v3864_v11, %v1396_v10  ;;  %v1417_v63 = vmul.f32 %v3864_v11, %v1397_v44 }
 0x228   :  { %v3985_v42 = vpop.permute.xlu1 %1585 }
 0x229   :  { %v1408_v8 = vadd.f32 %v1404_v9, %v1354_v24  ;;  %v3989_v2 = vadd.f32 %v1405_v31, %v1355_v62  ;;  %v1418_v24 = vadd.f32 %v1414_v61, %v1364_v56  ;;  %v1420_v56 = vadd.f32 %v1416_v49, %v1366_v45 }
 0x22a   :  { %v1421_v45 = vadd.f32 %v1417_v63, %v3940_v53  ;;  %v4118_v63 = vstv %s4062_s30 }
 0x22b   :  { %v1503_v46 = vpop.permute.xlu0 %1502 }
 0x22c   :  { %v1435_v5 = vpop.permute.xlu1 %1434 }
 0x22d   :  { %v1444_v19 = vsel %vm4681_vm11, %v1435_v5, %v1437_v51  ;;  %vm4684_vm11 = vmmov %vm4683_vm5 }
 0x22e   :  { %v1452_v28 = vsel %vm1422_vm9, %v1444_v19, 0.0  ;;  %vm1425_vm9 = vmand %vm3831_vm2, %vm4530_vm13 }
 0x22f   :  { %v1472_v50 = vmul.f32 %v3930_v40, %v1452_v28  ;;  %v1551_v10 = vpop.permute.xlu0 %1550 }
 0x230   :  { %v1439_v13 = vpop.permute.xlu1 %1438 }
 0x231   :  { %v4010_v4 = vadd.f32 %v1472_v50, %v1418_v24  ;;  %v1445_v54 = vsel %vm4682_vm12, %v1437_v51, %v1439_v13  ;;  %v1446_v47 = vsel %vm4683_vm5, %v1439_v13, %v1441_v58  ;;  %vm4688_vm5 = vcmp.le.s32.totalorder %v2706_v59, 6 }
 0x232   :  { %v1453_v32 = vsel %vm1423_vm1, %v1445_v54, 0.0  ;;  %v1454_v18 = vsel %vm1424_vm14, %v1446_v47, 0.0  ;;  %vm4685_vm1 = vcmp.le.s32.totalorder %v2698_v17, 6  ;;  %v1460_v24 = vmul.f32 %v3880_v7, %v1452_v28 }
 0x233   :  { %v1473_v37 = vmul.f32 %v3930_v40, %v1453_v32  ;;  %v1474_v21 = vmul.f32 %v3930_v40, %v1454_v18  ;;  %vm4032_vm14 = vmand %vm4673_vm7, %vm4685_vm1  ;;  %v1555_v1 = vpop.permute.xlu0 %1554  ;;  %vm4691_vm7 = vcmask 465920   ;;  %v1461_v28 = vmul.f32 %v3880_v7, %v1453_v32 }
 0x234   :  { %v1443_v57 = vpop.permute.xlu1 %1442  ;;  %vm1486_vm12 = vmand %vm4032_vm14, %vm4594_vm3  ;;  %vm4695_vm3 = vnez %v4434_v35  ;;  %v4110_v47 = vstv %s4058_s28 }
 0x235   :  { %v4021_v51 = vadd.f32 %v1473_v37, %v1419_v16  ;;  %v1478_v60 = vadd.f32 %v1474_v21, %v1420_v56  ;;  %v1447_v52 = vsel %vm4684_vm11, %v1441_v58, %v1443_v57  ;;  %v1462_v58 = vmul.f32 %v3880_v7, %v1454_v18 }
 0x236   :  { %v1455_v38 = vsel %vm1425_vm9, %v1447_v52, 0.0  ;;  %vm4045_vm9 = vmand %vm4669_vm4, %vm4688_vm5  ;;  %vm4692_vm11 = vcmp.le.s32.totalorder %v2725_v33, 6  ;;  %v4114_v56 = vstv %s4060_s29  ;;  %v1464_v37 = vadd.f32 %v1460_v24, %v3972_v41 }
 0x237   :  { %v1475_v48 = vmul.f32 %v3930_v40, %v1455_v38  ;;  %vm4054_vm1 = vmand %vm3831_vm2, %vm4692_vm11  ;;  %v1466_v29 = vadd.f32 %v1462_v58, %v1408_v8  ;;  %v1463_v31 = vmul.f32 %v3880_v7, %v1455_v38  ;;  %vm4697_vm2 = vnez %v4441_v12  ;;  %v1559_v6 = vpop.permute.xlu0 %1558 }
 0x238   :  { %v4026_v22 = vpop.permute.xlu1 %1643  ;;  %vm1484_vm4 = vmand %vm4045_vm9, %vm4695_vm3  ;;  %v4121_v7 = vstv %s4072_s4  ;;  %v4134_v52 = vstv %s4083_s0  ;;  %v1465_v41 = vadd.f32 %v1461_v28, %v3974_v55 }
 0x239   :  { %v1479_v11 = vadd.f32 %v1475_v48, %v1421_v45  ;;  %vm4696_vm5 = vmmov %vm4691_vm7 }
 0x23a   :  { %vm4701_vm3 = vmmov %vm4696_vm5 }
 0x23b   :  { %v1611_v38 = vpop.permute.xlu0 %1610 }
 0x23c   :  { %v1497_v44 = vpop.permute.xlu1 %1496 }
 0x23d   :  { %v1506_v33 = vsel %vm4696_vm5, %v1497_v44, %v4001_v34  ;;  %vm4702_vm5 = vmmov %vm4701_vm3 }
 0x23e   :  { %v1514_v5 = vsel %vm1484_vm4, %v1506_v33, 0.0  ;;  %vm4703_vm4 = vcmask 457728  }
 0x23f   :  { %v1534_v48 = vmul.f32 %v3932_v36, %v1514_v5  ;;  %v4169_v20 = vpop.permute.xlu0 %1614 }
 0x240   :  { %v1501_v17 = vpop.permute.xlu1 %1500 }
 0x241   :  { %v1508_v53 = vsel %vm4691_vm7, %v1501_v17, %v1503_v46  ;;  %vm4698_vm7 = vcmp.le.s32.totalorder %v2720_v14, 6  ;;  %v1467_v14 = vadd.f32 %v1463_v31, %v3989_v2  ;;  %v1507_v27 = vsel %vm4702_vm5, %v4001_v34, %v1501_v17 }
 0x242   :  { %v1516_v59 = vsel %vm1486_vm12, %v1508_v53, 0.0  ;;  %vm1487_vm12 = vmand %vm4054_vm1, %vm4697_vm2  ;;  %v1522_v2 = vmul.f32 %v3957_v43, %v1514_v5  ;;  %vm1654_vm2 = vcmask 1043456  }
 0x243   :  { %v1524_v25 = vmul.f32 %v3957_v43, %v1516_v59  ;;  %v1536_v9 = vmul.f32 %v3932_v36, %v1516_v59  ;;  %vm4089_vm11 = vmand %vm4672_vm0, %vm4698_vm7 }
 0x244   :  { %v1505_v35 = vpop.permute.xlu1 %1504  ;;  %vm1485_vm0 = vmand %vm4089_vm11, %vm4671_vm15  ;;  %v1526_v45 = vadd.f32 %v1522_v2, %v1464_v37 }
 0x245   :  { %v4093_v61 = vadd.f32 %v1524_v25, %v1466_v29  ;;  %v1540_v12 = vadd.f32 %v1536_v9, %v1478_v60  ;;  %v1509_v19 = vsel %vm4701_vm3, %v1503_v46, %v1505_v35  ;;  %vm4704_vm15 = vmmov %vm4703_vm4  ;;  %v1515_v21 = vsel %vm1485_vm0, %v1507_v27, 0.0 }
 0x246   :  { %v1517_v49 = vsel %vm1487_vm12, %v1509_v19, 0.0  ;;  %v4128_v46 = vstv %s4074_s5  ;;  %v4131_v60 = vstv %s4081_s6  ;;  %v1535_v44 = vmul.f32 %v3932_v36, %v1515_v21  ;;  %vm4705_vm12 = vmmov %vm4703_vm4 }
 0x247   :  { %v1525_v50 = vmul.f32 %v3957_v43, %v1517_v49  ;;  %v1537_v13 = vmul.f32 %v3932_v36, %v1517_v49  ;;  %vm4706_vm7 = vmmov %vm4703_vm4  ;;  %v1538_v9 = vadd.f32 %v1534_v48, %v4010_v4  ;;  %vm4707_vm0 = vcmask 449536  }
 0x248   :  { %v1553_v54 = vpop.permute.xlu1 %1552  ;;  %vm1596_vm3 = vmand %vm4045_vm9, %vm2831_vm10 }
 0x249   :  { %v1560_v3 = vsel %vm4703_vm4, %v1551_v10, %v1553_v54  ;;  %v1529_v18 = vadd.f32 %v1525_v50, %v1467_v14  ;;  %v1541_v16 = vadd.f32 %v1537_v13, %v1479_v11  ;;  %v1561_v34 = vsel %vm4704_vm15, %v1553_v54, %v1555_v1  ;;  %vm1597_vm5 = vmand %vm4089_vm11, %vm4569_vm6 }
 0x24a   :  { %v1568_v32 = vsel %vm4045_vm9, %v1560_v3, 0.0  ;;  %v1569_v11 = vsel %vm4089_vm11, %v1561_v34, 0.0  ;;  %v1523_v10 = vmul.f32 %v3957_v43, %v1515_v21  ;;  %vm1598_vm10 = vmand %vm4032_vm14, %vm4528_vm8  ;;  %vm1723_vm8 = vcmask 1040384  }
 0x24b   :  { %v1576_v53 = vmul.f32 %v3959_v30, %v1568_v32  ;;  %v1588_v59 = vmul.f32 %v3985_v42, %v1568_v32  ;;  %v1577_v33 = vmul.f32 %v3959_v30, %v1569_v11  ;;  %v1589_v43 = vmul.f32 %v3985_v42, %v1569_v11  ;;  %vm4708_vm9 = vmmov %vm4707_vm0 }
 0x24c   :  { %v1557_v57 = vpop.permute.xlu1 %1556  ;;  %v1527_v19 = vadd.f32 %v1523_v10, %v1465_v41  ;;  %vm4709_vm4 = vmmov %vm4707_vm0 }
 0x24d   :  { %v1562_v58 = vsel %vm4705_vm12, %v1555_v1, %v1557_v57  ;;  %v1563_v17 = vsel %vm4706_vm7, %v1557_v57, %v1559_v6  ;;  %v1539_v6 = vadd.f32 %v1535_v44, %v4021_v51  ;;  %v1580_v4 = vadd.f32 %v1576_v53, %v1526_v45  ;;  %vm1599_vm6 = vmand %vm4054_vm1, %vm4530_vm13 }
 0x24e   :  { %v1570_v55 = vsel %vm4032_vm14, %v1562_v58, 0.0  ;;  %v1571_v29 = vsel %vm4054_vm1, %v1563_v17, 0.0  ;;  %v1592_v40 = vadd.f32 %v1588_v59, %v1538_v9  ;;  %v1581_v51 = vadd.f32 %v1577_v33, %v1527_v19  ;;  %vm4710_vm14 = vmmov %vm4707_vm0 }
 0x24f   :  { %v1590_v36 = vmul.f32 %v3985_v42, %v1570_v55  ;;  %v1591_v1 = vmul.f32 %v3985_v42, %v1571_v29  ;;  %v1578_v31 = vmul.f32 %v3959_v30, %v1570_v55  ;;  %v1579_v35 = vmul.f32 %v3959_v30, %v1571_v29 }
 0x250   :  { %v1609_v25 = vpop.permute.xlu1 %1608  ;;  %v4176_v30 = vstv %s4123_s7  ;;  %vm1956_vm13 = vcmask 1041408   ;;  %vm1961_vm1 = vcmask 1042432  }
 0x251   :  { %v1618_v5 = vsel %vm4707_vm0, %v1609_v25, %v1611_v38  ;;  %v1594_v24 = vadd.f32 %v1590_v36, %v1540_v12  ;;  %v4163_v42 = vadd.f32 %v1591_v1, %v1541_v16  ;;  %v1593_v12 = vadd.f32 %v1589_v43, %v1539_v6 }
 0x252   :  { %v1626_v49 = vsel %vm1596_vm3, %v1618_v5, 0.0  ;;  %v1582_v13 = vadd.f32 %v1578_v31, %v4093_v61  ;;  %v4181_v54 = vadd.f32 %v1579_v35, %v1529_v18 }
 0x253   :  { %v1634_v14 = vmul.f32 %v3987_v0, %v1626_v49  ;;  %v1646_v27 = vmul.f32 %v4026_v22, %v1626_v49 }
 0x254   :  { %v1613_v50 = vpop.permute.xlu1 %1612 }
 0x255   :  { %v1619_v28 = vsel %vm4708_vm9, %v1611_v38, %v1613_v50  ;;  %v1620_v39 = vsel %vm4709_vm4, %v1613_v50, %v4169_v20  ;;  %v1638_v62 = vadd.f32 %v1634_v14, %v1580_v4  ;;  %v1650_v2 = vadd.f32 %v1646_v27, %v1592_v40 }
 0x256   :  { %v1627_v3 = vsel %vm1597_vm5, %v1619_v28, 0.0  ;;  %v1628_v16 = vsel %vm1598_vm10, %v1620_v39, 0.0 }
 0x257   :  { %v1635_v34 = vmul.f32 %v3987_v0, %v1627_v3  ;;  %v1647_v61 = vmul.f32 %v4026_v22, %v1627_v3  ;;  %v1636_v18 = vmul.f32 %v3987_v0, %v1628_v16  ;;  %v1648_v37 = vmul.f32 %v4026_v22, %v1628_v16 }
 0x258   :  { %v1655_v21 = vsel %vm1654_vm2, %v1638_v62, 0.0  ;;  %v1687_v32 = vrot.slane %v1638_v62, 4  ;;  %v1738_v57 = vsel %vm1654_vm2, %v1650_v2, 0.0  ;;  %v1770_v38 = vrot.slane %v1650_v2, 4 }
 0x259   :  { %v1656_v8 = vrot.slane %v1655_v21, 4  ;;  %v1739_v41 = vrot.slane %v1738_v57, 4  ;;  %v1639_v26 = vadd.f32 %v1635_v34, %v1581_v51  ;;  %v1651_v45 = vadd.f32 %v1647_v61, %v1593_v12 }
 0x25a   :  { %v1695_v48 = vsel %vm1654_vm2, %v1687_v32, 0.0  ;;  %v1778_v11 = vsel %vm1654_vm2, %v1770_v38, 0.0  ;;  %v1640_v10 = vadd.f32 %v1636_v18, %v1582_v13  ;;  %v4199_v44 = vadd.f32 %v1648_v37, %v1594_v24 }
 0x25b   :  { %v1657_v58 = vadd.f32 %v1656_v8, %v1655_v21  ;;  %v1696_v17 = vrot.slane %v1695_v48, 4  ;;  %v1740_v53 = vadd.f32 %v1739_v41, %v1738_v57  ;;  %v1779_v59 = vrot.slane %v1778_v11, 4 }
 0x25c   :  { %v1662_v55 = vsel %vm1654_vm2, %v1639_v26, 0.0  ;;  %v1688_v29 = vrot.slane %v1639_v26, 4  ;;  %v1745_v33 = vsel %vm1654_vm2, %v1651_v45, 0.0  ;;  %v1771_v43 = vrot.slane %v1651_v45, 4 }
 0x25d   :  { %v1658_v36 = vrot.slane %v1657_v58, 2  ;;  %v1697_v1 = vadd.f32 %v1696_v17, %v1695_v48  ;;  %v1741_v25 = vrot.slane %v1740_v53, 2  ;;  %v1780_v9 = vadd.f32 %v1779_v59, %v1778_v11 }
 0x25e   :  { %v1663_v31 = vrot.slane %v1662_v55, 4  ;;  %v1702_v35 = vsel %vm1654_vm2, %v1688_v29, 0.0  ;;  %v1746_v5 = vrot.slane %v1745_v33, 4  ;;  %v1785_v19 = vsel %vm1654_vm2, %v1771_v43, 0.0 }
 0x25f   :  { %v1659_v6 = vadd.f32 %v1658_v36, %v1657_v58  ;;  %v1698_v24 = vrot.slane %v1697_v1, 2  ;;  %v1742_v4 = vadd.f32 %v1741_v25, %v1740_v53  ;;  %v1781_v40 = vrot.slane %v1780_v9, 2 }
 0x260   :  { %v1664_v49 = vadd.f32 %v1663_v31, %v1662_v55  ;;  %v1703_v51 = vrot.slane %v1702_v35, 4  ;;  %v1747_v12 = vadd.f32 %v1746_v5, %v1745_v33  ;;  %v1786_v14 = vrot.slane %v1785_v19, 4 }
 0x261   :  { %v1660_v27 = vrot.slane %v1659_v6, 1  ;;  %v1699_v50 = vadd.f32 %v1698_v24, %v1697_v1  ;;  %v1743_v13 = vrot.slane %v1742_v4, 1  ;;  %v1782_v28 = vadd.f32 %v1781_v40, %v1780_v9 }
 0x262   :  { %v1665_v39 = vrot.slane %v1664_v49, 2  ;;  %v1704_v62 = vadd.f32 %v1703_v51, %v1702_v35  ;;  %v1748_v2 = vrot.slane %v1747_v12, 2  ;;  %v1787_v3 = vadd.f32 %v1786_v14, %v1785_v19 }
 0x263   :  { %v1661_v16 = vadd.f32 %v1660_v27, %v1659_v6  ;;  %v1700_v34 = vrot.slane %v1699_v50, 1  ;;  %v1744_v61 = vadd.f32 %v1743_v13, %v1742_v4  ;;  %v1783_v18 = vrot.slane %v1782_v28, 1 }
 0x264   :  { %v1666_v37 = vadd.f32 %v1665_v39, %v1664_v49  ;;  %v1705_v21 = vrot.slane %v1704_v62, 2  ;;  %v1749_v32 = vadd.f32 %v1748_v2, %v1747_v12  ;;  %v1788_v57 = vrot.slane %v1787_v3, 2  ;;  %v1617_v39 = vpop.permute.xlu1 %1616 }
 0x265   :  { %v1701_v38 = vadd.f32 %v1700_v34, %v1699_v50  ;;  %v1784_v8 = vadd.f32 %v1783_v18, %v1782_v28  ;;  %v1669_v41 = vsel %vm1654_vm2, %v1640_v10, 0.0  ;;  %v1689_v26 = vrot.slane %v1640_v10, 4 }
 0x266   :  { %v1667_v45 = vrot.slane %v1666_v37, 1  ;;  %v1706_v48 = vadd.f32 %v1705_v21, %v1704_v62  ;;  %v1750_v11 = vrot.slane %v1749_v32, 1  ;;  %v1789_v58 = vadd.f32 %v1788_v57, %v1787_v3 }
 0x267   :  { %v1724_v17 = vsel %vm1723_vm8, %v1661_v16, %v1701_v38  ;;  %v1806_v53 = vsel %vm1723_vm8, %v1744_v61, %v1784_v8  ;;  %v1670_v59 = vrot.slane %v1669_v41, 4  ;;  %v1709_v55 = vsel %vm1654_vm2, %v1689_v26, 0.0 }
 0x268   :  { %v1730_v29 = vadd.f32 %v4110_v47, %v1724_v17  ;;  %v1812_v33 = vadd.f32 %v4114_v56, %v1806_v53  ;;  %v1668_v43 = vadd.f32 %v1667_v45, %v1666_v37  ;;  %v1707_v36 = vrot.slane %v1706_v48, 1 }
 0x269   :  { %v1751_v1 = vadd.f32 %v1750_v11, %v1749_v32  ;;  %v1790_v25 = vrot.slane %v1789_v58, 1  ;;  %v1671_v10 = vadd.f32 %v1670_v59, %v1669_v41  ;;  %v1710_v9 = vrot.slane %v1709_v55, 4 }
 0x26a   :  { %v1734_v31 = vmax.f32 %v1730_v29, 0.0  ;;  %v1816_v35 = vmax.f32 %v1812_v33, 0.0  ;;  %v1708_v5 = vadd.f32 %v1707_v36, %v1706_v48  ;;  %v1752_v19 = vsel %vm1654_vm2, %v4199_v44, 0.0 }
 0x26b   :  { %v1791_v6 = vadd.f32 %v1790_v25, %v1789_v58  ;;  %v1672_v24 = vrot.slane %v1671_v10, 2  ;;  %v1711_v4 = vadd.f32 %v1710_v9, %v1709_v55  ;;  %v1753_v40 = vrot.slane %v1752_v19, 4 }
 0x26c   :  { %v1822_v49 = vmul.f32 %v4118_v63, %v1734_v31  ;;  %v1828_v51 = vmul.f32 %v4121_v7, %v1816_v35  ;;  %v1844_v12 = vmul.f32 %v4131_v60, %v1734_v31  ;;  %v1850_v14 = vmul.f32 %v4134_v52, %v1816_v35 }
 0x26d   :  { %v1725_v27 = vsel %vm1723_vm8, %v1668_v43, %v1708_v5  ;;  %v1807_v50 = vsel %vm1723_vm8, %v1751_v1, %v1791_v6  ;;  %v1673_v13 = vadd.f32 %v1672_v24, %v1671_v10  ;;  %v1712_v28 = vrot.slane %v1711_v4, 2 }
 0x26e   :  { %v1832_v62 = vadd.f32 %v1828_v51, %v1822_v49  ;;  %v1854_v2 = vadd.f32 %v1850_v14, %v1844_v12  ;;  %v1731_v3 = vadd.f32 %v4110_v47, %v1725_v27  ;;  %v1813_v16 = vadd.f32 %v4114_v56, %v1807_v50 }
 0x26f   :  { %v1674_v34 = vrot.slane %v1673_v13, 1  ;;  %v1713_v61 = vadd.f32 %v1712_v28, %v1711_v4  ;;  %v1754_v18 = vadd.f32 %v1753_v40, %v1752_v19  ;;  %v1772_v37 = vrot.slane %v4199_v44, 4 }
 0x270   :  { %v1838_v21 = vadd.f32 %v4128_v46, %v1832_v62  ;;  %v1735_v32 = vmax.f32 %v1731_v3, 0.0  ;;  %v1817_v57 = vmax.f32 %v1813_v16, 0.0  ;;  %v1621_v38 = vsel %vm4710_vm14, %v4169_v20, %v1617_v39 }
 0x271   :  { %v1675_v8 = vadd.f32 %v1674_v34, %v1673_v13  ;;  %v1714_v41 = vrot.slane %v1713_v61, 1  ;;  %v1755_v26 = vrot.slane %v1754_v18, 2  ;;  %v1792_v45 = vsel %vm1654_vm2, %v1772_v37, 0.0 }
 0x272   :  { %v1823_v48 = vmul.f32 %v4118_v63, %v1735_v32  ;;  %v1829_v44 = vmul.f32 %v4121_v7, %v1817_v57  ;;  %v1845_v11 = vmul.f32 %v4131_v60, %v1735_v32  ;;  %v1851_v58 = vmul.f32 %v4134_v52, %v1817_v57 }
 0x273   :  { %v1715_v15 = vadd.f32 %v1714_v41, %v1713_v61  ;;  %v1756_v17 = vadd.f32 %v1755_v26, %v1754_v18  ;;  %v1793_v23 = vrot.slane %v1792_v45, 4  ;;  %v1629_v53 = vsel %vm1599_vm6, %v1621_v38, 0.0 }
 0x274   :  { %v1833_v59 = vadd.f32 %v1829_v44, %v1823_v48  ;;  %v1855_v55 = vadd.f32 %v1851_v58, %v1845_v11  ;;  %v1637_v20 = vmul.f32 %v3987_v0, %v1629_v53  ;;  %v1649_v29 = vmul.f32 %v4026_v22, %v1629_v53 }
 0x275   :  { %v1726_v33 = vsel %vm1723_vm8, %v1675_v8, %v1715_v15  ;;  %v1757_v43 = vrot.slane %v1756_v17, 1  ;;  %v1794_v36 = vadd.f32 %v1793_v23, %v1792_v45  ;;  %v1860_v1 = vadd.f32 %v4176_v30, %v1854_v2 }
 0x276   :  { %v1839_v25 = vadd.f32 %v4128_v46, %v1833_v59  ;;  %v1732_v10 = vadd.f32 %v4110_v47, %v1726_v33  ;;  %v1641_v9 = vadd.f32 %v1637_v20, %v4181_v54  ;;  %v1653_v31 = vadd.f32 %v1649_v29, %v4163_v42 }
 0x277   :  { %v1795_v35 = vrot.slane %v1794_v36, 2  ;;  %v1861_v5 = vadd.f32 %v4176_v30, %v1855_v55  ;;  %v1864_v0 = vmax.f32 %v1838_v21, %v1860_v1  ;;  %v1758_v12 = vadd.f32 %v1757_v43, %v1756_v17 }
 0x278   :  { %v1736_v19 = vmax.f32 %v1732_v10, 0.0  ;;  %v1676_v22 = vsel %vm1654_vm2, %v1641_v9, 0.0  ;;  %v1690_v6 = vrot.slane %v1641_v9, 4  ;;  %v1759_v24 = vsel %vm1654_vm2, %v1653_v31, 0.0 }
 0x279   :  { %v1796_v4 = vadd.f32 %v1795_v35, %v1794_v36  ;;  %v1677_v40 = vrot.slane %v1676_v22, 4  ;;  %v1760_v49 = vrot.slane %v1759_v24, 4  ;;  %v1773_v51 = vrot.slane %v1653_v31, 4 }
 0x27a   :  { %v1824_v14 = vmul.f32 %v4118_v63, %v1736_v19  ;;  %v1716_v54 = vsel %vm1654_vm2, %v1690_v6, 0.0  ;;  %v1865_v42 = vmax.f32 %v1839_v25, %v1861_v5  ;;  %v1868_v62 = vsub.f32 %v1838_v21, %v1864_v0 }
 0x27b   :  { %v1797_v27 = vrot.slane %v1796_v4, 1  ;;  %v1678_v50 = vadd.f32 %v1677_v40, %v1676_v22  ;;  %v1717_v13 = vrot.slane %v1716_v54, 4  ;;  %v1761_v28 = vadd.f32 %v1760_v49, %v1759_v24 }
 0x27c   :  { %v1799_v39 = vsel %vm1654_vm2, %v1773_v51, 0.0  ;;  %v1869_v2 = vsub.f32 %v1839_v25, %v1865_v42  ;;  %v1880_v3 = vsub.f32 %v1860_v1, %v1864_v0  ;;  %v1872_v32 = vmul.f32 1.442695, %v1868_v62 }
 0x27d   :  { %v1798_v16 = vadd.f32 %v1797_v27, %v1796_v4  ;;  %v1679_v34 = vrot.slane %v1678_v50, 2  ;;  %v1718_v61 = vadd.f32 %v1717_v13, %v1716_v54  ;;  %v1762_v18 = vrot.slane %v1761_v28, 2 }
 0x27e   :  { %v1800_v37 = vrot.slane %v1799_v39, 4  ;;  %v1874_v57 = vmul.f32 1.442695, %v1869_v2  ;;  %v1881_v38 = vsub.f32 %v1861_v5, %v1865_v42  ;;  %2156 = vpow2.f32 %v1872_v32 }
 0x27f   :  { %v1808_v8 = vsel %vm1723_vm8, %v1758_v12, %v1798_v16  ;;  %v1680_v41 = vadd.f32 %v1679_v34, %v1678_v50  ;;  %v1719_v26 = vrot.slane %v1718_v61, 2  ;;  %v1763_v45 = vadd.f32 %v1762_v18, %v1761_v28 }
 0x280   :  { %v1814_v48 = vadd.f32 %v4114_v56, %v1808_v8  ;;  %v1801_v44 = vadd.f32 %v1800_v37, %v1799_v39  ;;  %v1884_v21 = vmul.f32 1.442695, %v1880_v3  ;;  %v1846_v11 = vmul.f32 %v4131_v60, %v1736_v19 }
 0x281   :  { %v1681_v58 = vrot.slane %v1680_v41, 1  ;;  %v1720_v15 = vadd.f32 %v1719_v26, %v1718_v61  ;;  %2158 = vpow2.f32 %v1874_v57  ;;  %v1886_v53 = vmul.f32 1.442695, %v1881_v38 }
 0x282   :  { %v1818_v17 = vmax.f32 %v1814_v48, 0.0  ;;  %v1802_v23 = vrot.slane %v1801_v44, 2  ;;  %2160 = vpow2.f32 %v1884_v21  ;;  %v1764_v55 = vrot.slane %v1763_v45, 1 }
 0x283   :  { %v1721_v59 = vrot.slane %v1720_v15, 1  ;;  %2162 = vpow2.f32 %v1886_v53  ;;  %v1682_v43 = vadd.f32 %v1681_v58, %v1680_v41 }
 0x284   :  { %v1830_v20 = vmul.f32 %v4121_v7, %v1818_v17  ;;  %v1852_v29 = vmul.f32 %v4134_v52, %v1818_v17  ;;  %v1803_v33 = vadd.f32 %v1802_v23, %v1801_v44  ;;  %v1765_v31 = vadd.f32 %v1764_v55, %v1763_v45 }
 0x285   :  { %v1722_v36 = vadd.f32 %v1721_v59, %v1720_v15 }
 0x286   :  { %v1834_v1 = vadd.f32 %v1830_v20, %v1824_v14  ;;  %v1856_v25 = vadd.f32 %v1852_v29, %v1846_v11  ;;  %v1804_v10 = vrot.slane %v1803_v33, 1 }
 0x287   :  { %v1727_v9 = vsel %vm1723_vm8, %v1682_v43, %v1722_v36 }
 0x288   :  { %v1840_v35 = vadd.f32 %v4128_v46, %v1834_v1  ;;  %v1733_v5 = vadd.f32 %v4110_v47, %v1727_v9  ;;  %v1805_v0 = vadd.f32 %v1804_v10, %v1803_v33  ;;  %v1862_v19 = vadd.f32 %v4176_v30, %v1856_v25  ;;  %v2157_v22 = vpop.eup %2156 }
 0x28a   :  { %v1737_v6 = vmax.f32 %v1733_v5, 0.0  ;;  %v1809_v24 = vsel %vm1723_vm8, %v1765_v31, %v1805_v0  ;;  %v1866_v4 = vmax.f32 %v1840_v35, %v1862_v19 }
 0x28b   :  { %v2159_v40 = vpop.eup %2158  ;;  %v1815_v49 = vadd.f32 %v4114_v56, %v1809_v24 }
 0x28c   :  { %v2161_v51 = vpop.eup %2160  ;;  %v1870_v12 = vsub.f32 %v1840_v35, %v1866_v4  ;;  %v1882_v14 = vsub.f32 %v1862_v19, %v1866_v4  ;;  %v1825_v42 = vmul.f32 %v4118_v63, %v1737_v6  ;;  %v1847_v27 = vmul.f32 %v4131_v60, %v1737_v6 }
 0x28d   :  { %v1819_v54 = vmax.f32 %v1815_v49, 0.0  ;;  %v1892_v47 = vadd.f32 %v2161_v51, %v2157_v22  ;;  %v2163_v50 = vpop.eup %2162 }
 0x28e   :  { %v1876_v13 = vmul.f32 1.442695, %v1870_v12  ;;  %v1888_v28 = vmul.f32 1.442695, %v1882_v14  ;;  %v1893_v2 = vadd.f32 %v2163_v50, %v2159_v40 }
 0x28f   :  { %v1831_v39 = vmul.f32 %v4121_v7, %v1819_v54  ;;  %v1853_v62 = vmul.f32 %v4134_v52, %v1819_v54  ;;  %2164 = vrcp.f32 %v1892_v47 }
 0x290   :  { %2166 = vpow2.f32 %v1876_v13 }
 0x291   :  { %v1835_v56 = vadd.f32 %v1831_v39, %v1825_v42  ;;  %v1857_v3 = vadd.f32 %v1853_v62, %v1847_v27  ;;  %2168 = vpow2.f32 %v1888_v28 }
 0x292   :  { %2170 = vrcp.f32 %v1893_v2 }
 0x293   :  { %v1841_v16 = vadd.f32 %v4128_v46, %v1835_v56  ;;  %v1863_v63 = vadd.f32 %v4176_v30, %v1857_v3 }
 0x295   :  { %v1867_v60 = vmax.f32 %v1841_v16, %v1863_v63 }
 0x297   :  { %v1871_v34 = vsub.f32 %v1841_v16, %v1867_v60  ;;  %v1883_v61 = vsub.f32 %v1863_v63, %v1867_v60 }
 0x299   :  { %v2165_v18 = vpop.eup %2164  ;;  %v1878_v37 = vmul.f32 1.442695, %v1871_v34  ;;  %v1890_v32 = vmul.f32 1.442695, %v1883_v61 }
 0x29a   :  { %v2167_v7 = vpop.eup %2166  ;;  %v1900_v57 = vmul.f32 %v2165_v18, %v1892_v47 }
 0x29b   :  { %v2169_v52 = vpop.eup %2168  ;;  %2172 = vpow2.f32 %v1878_v37 }
 0x29c   :  { %v2171_v38 = vpop.eup %2170  ;;  %2174 = vpow2.f32 %v1890_v32  ;;  %v1894_v8 = vadd.f32 %v2169_v52, %v2167_v7  ;;  %v1904_v41 = vsub.f32 2.0, %v1900_v57 }
 0x29d   :  { %v1901_v26 = vmul.f32 %v2171_v38, %v1893_v2 }
 0x29e   :  { %2176 = vrcp.f32 %v1894_v8  ;;  %v1908_v45 = vmul.f32 %v2165_v18, %v1904_v41 }
 0x29f   :  { %v1905_v46 = vsub.f32 2.0, %v1901_v26 }
 0x2a0   :  { %v1912_v48 = vmul.f32 %v2157_v22, %v1908_v45  ;;  %v1916_v30 = vmul.f32 %v2161_v51, %v1908_v45 }
 0x2a1   :  { %v1909_v44 = vmul.f32 %v2171_v38, %v1905_v46 }
 0x2a2   :  { %v1924_v21 = vrot.slane %v1916_v30, 7  ;;  %v1936_v11 = vrot.slane %v1912_v48, 7  ;;  %v1944_v17 = vrot.slane %v1916_v30, 6 }
 0x2a3   :  { %v1913_v58 = vmul.f32 %v2159_v40, %v1909_v44  ;;  %v1917_v15 = vmul.f32 %v2163_v50, %v1909_v44 }
 0x2a4   :  { %v1952_v23 = vsel %vm1723_vm8, %v1912_v48, %v1924_v21 }
 0x2a5   :  { %v2173_v53 = vpop.eup %2172  ;;  %v1925_v59 = vrot.slane %v1917_v15, 7  ;;  %v1937_v55 = vrot.slane %v1913_v58, 7  ;;  %v1957_v20 = vsel %vm1956_vm13, %v1952_v23, %v1936_v11  ;;  %v1945_v36 = vrot.slane %v1917_v15, 6 }
 0x2a6   :  { %v2175_v29 = vpop.eup %2174  ;;  %v1962_v33 = vsel %vm1961_vm1, %v1957_v20, %v1944_v17 }
 0x2a7   :  { %v1895_v43 = vadd.f32 %v2175_v29, %v2173_v53  ;;  %v1953_v1 = vsel %vm1723_vm8, %v1913_v58, %v1925_v59 }
 0x2a8   :  { %v2177_v25 = vpop.eup %2176  ;;  %v1958_v10 = vsel %vm1956_vm13, %v1953_v1, %v1937_v55 }
 0x2a9   :  { %2178 = vrcp.f32 %v1895_v43  ;;  %v1902_v9 = vmul.f32 %v2177_v25, %v1894_v8  ;;  %v1963_v31 = vsel %vm1961_vm1, %v1958_v10, %v1945_v36 }
 0x2aa   :  { %v1970_v35 = vcombine.low %v1962_v33, %v1963_v31 }
 0x2ab   :  { %v1906_v5 = vsub.f32 2.0, %v1902_v9 }
 0x2ac   :  { %1974 = vst [vmem:[#allocation10] sm:$0xff] %v1970_v35 }
 0x2ad   :  { %v1910_v0 = vmul.f32 %v2177_v25, %v1906_v5 }
 0x2af   :  { %v1914_v19 = vmul.f32 %v2167_v7, %v1910_v0  ;;  %v1918_v22 = vmul.f32 %v2169_v52, %v1910_v0 }
 0x2b1   :  { %v1926_v6 = vrot.slane %v1918_v22, 7  ;;  %v1938_v24 = vrot.slane %v1914_v19, 7  ;;  %v1946_v40 = vrot.slane %v1918_v22, 6 }
 0x2b3   :  { %v2179_v4 = vpop.eup %2178  ;;  %v1954_v49 = vsel %vm1723_vm8, %v1914_v19, %v1926_v6 }
 0x2b4   :  { %v1903_v51 = vmul.f32 %v2179_v4, %v1895_v43  ;;  %v1959_v12 = vsel %vm1956_vm13, %v1954_v49, %v1938_v24 }
 0x2b5   :  { %v1964_v14 = vsel %vm1961_vm1, %v1959_v12, %v1946_v40 }
 0x2b6   :  { %v1907_v54 = vsub.f32 2.0, %v1903_v51 }
 0x2b8   :  { %v1911_v42 = vmul.f32 %v2179_v4, %v1907_v54 }
 0x2ba   :  { %v1915_v27 = vmul.f32 %v2173_v53, %v1911_v42  ;;  %v1919_v47 = vmul.f32 %v2175_v29, %v1911_v42 }
 0x2bc   :  { %v1927_v50 = vrot.slane %v1919_v47, 7  ;;  %v1939_v13 = vrot.slane %v1915_v27, 7  ;;  %v1947_v28 = vrot.slane %v1919_v47, 6 }
 0x2be   :  { %v1955_v39 = vsel %vm1723_vm8, %v1915_v27, %v1927_v50 }
 0x2bf   :  { %v1960_v62 = vsel %vm1956_vm13, %v1955_v39, %v1939_v13 }
 0x2c0   :  { %v1965_v2 = vsel %vm1961_vm1, %v1960_v62, %v1947_v28 }
 0x2c1   :  { %v1971_v56 = vcombine.low %v1964_v14, %v1965_v2 }
 0x2c3   :  { %1975 = vst [vmem:[#allocation10 + $0x8] sm:$0xff] %v1971_v56 }
 0x2c4   :  { %2252 = shalt.err (!%p2249_p11)
}
 0x2c5   :  { %s2253_s1 = scalar_lea.hbm %s4292_s3, 256 }
 0x2c6   :  { %p2254_p12 = scmp.ne.s32.totalorder %s4292_s3, %s2253_s1  ;;  %p2257_p13 = scmp.lt.u32.totalorder %s2253_s1, %s4292_s3 }
 0x2c8   :  { %p2259_p0 = pnand %p2257_p13, %p2254_p12 }
 0x2ca   :  { %2262 = shalt.err (!%p2259_p0)
}
 0x2cb   :  { %1985 = dma.vmem_to_hbm [thread:$0]  %s1983_s9, 256, %s4292_s3, [#allocation5]  }
 0x2cc   :  { %2269 = dma.done.wait [#allocation5], 256  }
 0x2cd   :  { %2270 = vsyncadd [#allocation5], 4294967040 }
 0x2ce   :  { %1989 = vsyncpa [#allocation4], 1 }
 0x2cf   :  { %1990 = vsyncpa [#allocation8], 1 }
 0x2d0   :  { %1991 = vsyncpa [#allocation5], 1 }
 0x2d1   :  { %1992 = vsyncpa [#allocation6], 1 }

</bundles_post_ra>
